<compile_context>
chip_gen: v6e
topology: v6e:2x2x1
jax: 0.10.0
libtpu: 0.0.40
codegen_flags: <defaults>
</compile_context>

<pallas_src>
import jax
import jax.numpy as jnp
from jax.experimental import pallas as pl
from jax.experimental.pallas import tpu as pltpu


def _round_up(v, m):
    return ((v + m - 1) // m) * m


def _stacked_conv_bn_lrelu_kernel(x_ref, w_ref, b_ref, o_ref, xpad_ref):
    # x_ref   : (1, H, W, Cp)    f32   input tile (one batch element), channels padded
    # w_ref   : (L, 9*Cp, Cp)    bf16  per-layer folded (conv*BN-scale) weights
    # b_ref   : (L, 1, Cp)       f32   per-layer folded bias (+ BN shift)
    # o_ref   : (1, H, W, Cp)    f32   lane-dense output (Cp multiple of 128)
    # xpad_ref: (H+2, W+2, Cp)   f32   VMEM scratch: spatially padded activation
    H = o_ref.shape[1]
    W = o_ref.shape[2]
    Cp = o_ref.shape[3]
    L = w_ref.shape[0]

    # Zero the padded-activation scratch each step (provides the conv zero halo).
    # Cheap (one small VMEM memset) and safe regardless of how the "parallel" grid
    # axis is split across TensorCores.
    xpad_ref[...] = jnp.zeros_like(xpad_ref)
    xpad_ref[pl.ds(1, H), pl.ds(1, W), :] = x_ref[0]

    act = None
    for l in range(L):  # static unroll over the conv stack (num_convs is small)
        if l > 0:
            # next layer's input = previous layer's activation, kept in VMEM
            xpad_ref[pl.ds(1, H), pl.ds(1, W), :] = act.reshape(H, W, Cp)

        # im2col: 9 shifted views of the padded activation -> (H*W, 9*Cp) bf16 patch
        taps = [
            xpad_ref[pl.ds(ky, H), pl.ds(kx, W), :]
            .reshape(H * W, Cp)
            .astype(jnp.bfloat16)
            for ky in range(3)
            for kx in range(3)
        ]
        patch = jnp.concatenate(taps, axis=1)  # (H*W, 9*Cp)

        # Single MXU matmul per layer, f32 accumulation.
        acc = jnp.dot(patch, w_ref[l], preferred_element_type=jnp.float32)
        acc = acc + b_ref[l]                       # folded conv-bias + BN shift
        act = jnp.where(acc >= 0.0, acc, 0.01 * acc)  # LeakyReLU(0.01)

    o_ref[...] = act.reshape(1, H, W, Cp).astype(o_ref.dtype)


def stacked_conv_layers_forward(x_nchw, params, eps=1e-5):
    """StackedConvLayers forward (eval mode). params: list of dicts w/b/gamma/beta."""
    L = len(params)
    N, Cin, H, W = x_nchw.shape
    Cout = params[0]["w"].shape[0]
    Cp = _round_up(max(Cin, Cout), 128)  # lane-dense channel padding

    # NCHW -> NHWC (channels-last => channels on the 128-lane axis), pad channels.
    x = jnp.transpose(x_nchw, (0, 2, 3, 1)).astype(jnp.float32)
    x = jnp.pad(x, ((0, 0), (0, 0), (0, 0), (0, Cp - Cin)))

    # Fold conv bias + eval-mode BatchNorm (running_mean=0, running_var=1, affine)
    # into the weights; pad channel dims to Cp with zeros (padded lanes stay exactly
    # zero through LeakyReLU and contribute nothing to later layers).
    w_list, b_list = [], []
    for p in params:
        cin_l = p["w"].shape[1]
        scale = p["gamma"] / jnp.sqrt(1.0 + eps)           # BN scale (eval stats)
        shift = p["beta"]                                  # BN shift (mean=0)
        w_hwio = jnp.transpose(p["w"], (2, 3, 1, 0))       # OIHW -> HWIO
        w_f = w_hwio * scale[None, None, None, :]          # fold BN scale
        b_f = p["b"] * scale + shift                       # fold bias + BN shift
        w_f = jnp.pad(w_f, ((0, 0), (0, 0), (0, Cp - cin_l), (0, Cp - Cout)))
        b_f = jnp.pad(b_f, ((0, Cp - Cout),))
        w_list.append(w_f.reshape(9 * Cp, Cp))
        b_list.append(b_f.reshape(1, Cp))
    w_all = jnp.stack(w_list).astype(jnp.bfloat16)         # (L, 9*Cp, Cp)
    b_all = jnp.stack(b_list).astype(jnp.float32)          # (L, 1, Cp)

    out = pl.pallas_call(
        _stacked_conv_bn_lrelu_kernel,
        out_shape=jax.ShapeDtypeStruct((N, H, W, Cp), jnp.float32),
        grid=(N,),
        in_specs=[
            pl.BlockSpec((1, H, W, Cp), lambda n: (n, 0, 0, 0)),
            pl.BlockSpec((L, 9 * Cp, Cp), lambda n: (0, 0, 0)),   # resident
            pl.BlockSpec((L, 1, Cp), lambda n: (0, 0, 0)),        # resident
        ],
        out_specs=pl.BlockSpec((1, H, W, Cp), lambda n: (n, 0, 0, 0)),
        scratch_shapes=[pltpu.VMEM((H + 2, W + 2, Cp), jnp.float32)],
        compiler_params=pltpu.CompilerParams(
            dimension_semantics=("parallel",),
            vmem_limit_bytes=32 * 1024 * 1024,  # safe on v5e/v6e/v7x for these tiles
        ),
    )(x, w_all, b_all)

    # Strip channel padding, back to PyTorch-style NCHW.
    out = out[..., :Cout]
    return jnp.transpose(out, (0, 3, 1, 2))


def init_params(key, input_channels, output_channels, num_convs):
    params = []
    cin = input_channels
    for _ in range(num_convs):
        key, kw, kb = jax.random.split(key, 3)
        fan_in = cin * 3 * 3
        bound = 1.0 / jnp.sqrt(fan_in)
        w = jax.random.uniform(
            kw, (output_channels, cin, 3, 3), jnp.float32, -bound, bound
        )
        b = jax.random.uniform(kb, (output_channels,), jnp.float32, -bound, bound)
        gamma = jnp.ones((output_channels,), jnp.float32)  # BN affine defaults
        beta = jnp.zeros((output_channels,), jnp.float32)
        params.append({"w": w, "b": b, "gamma": gamma, "beta": beta})
        cin = output_channels
    return params


def _reference(x_nchw, params, eps=1e-5):
    """Plain-JAX f32 reference (eval-mode semantics) for correctness checking."""
    x = jnp.transpose(x_nchw, (0, 2, 3, 1)).astype(jnp.float32)
    for p in params:
        w_hwio = jnp.transpose(p["w"], (2, 3, 1, 0))
        y = jax.lax.conv_general_dilated(
            x, w_hwio, window_strides=(1, 1), padding=((1, 1), (1, 1)),
            dimension_numbers=("NHWC", "HWIO", "NHWC"),
        ) + p["b"]
        y = y * (p["gamma"] / jnp.sqrt(1.0 + eps)) + p["beta"]
        x = jnp.where(y >= 0, y, 0.01 * y)
    return jnp.transpose(x, (0, 3, 1, 2))


if __name__ == "__main__":
    key = jax.random.PRNGKey(0)
    kx, kp = jax.random.split(key)

    N, Cin, H, W = 2, 4, 16, 16
    Cout, num_convs = 8, 2

    x = jax.random.normal(kx, (N, Cin, H, W), jnp.float32)
    params = init_params(kp, Cin, Cout, num_convs)

    fwd = jax.jit(stacked_conv_layers_forward)
    out = jax.block_until_ready(fwd(x, params))

    ref = _reference(x, params)
    assert out.shape == (N, Cout, H, W)
    # bf16 MXU operands with f32 accumulation => ~1e-2 relative error budget vs f32 ref
    assert jnp.allclose(out, ref, atol=2e-2, rtol=2e-2), "mismatch vs reference"

    print("KERNEL_OK")
</pallas_src>

<mosaic_0001>
module attributes {stable_mosaic.version = 11 : i64} {
  func.func @_stacked_conv_bn_lrelu_kernel(%arg0: i32, %arg1: memref<1x16x16x128xf32, #tpu.memory_space<vmem>>, %arg2: memref<2x1152x128xbf16, #tpu.memory_space<vmem>>, %arg3: memref<2x1x128xf32, #tpu.memory_space<vmem>>, %arg4: memref<1x16x16x128xf32, #tpu.memory_space<vmem>>, %arg5: memref<18x18x128xf32, #tpu.memory_space<vmem>>) attributes {dimension_semantics = [#tpu.dimension_semantics<parallel>], iteration_bounds = array<i64: 2>, scalar_prefetch = 0 : i64, scratch_operands = 1 : i64, tpu.core_type = #tpu.core_type<tc>, window_params = [{transform_indices = @transform_0, window_bounds = array<i64: 1, 16, 16, 128>}, {pipeline_mode = #tpu.pipeline_mode<synchronous>, transform_indices = @transform_1, window_bounds = array<i64: 2, 1152, 128>}, {pipeline_mode = #tpu.pipeline_mode<synchronous>, transform_indices = @transform_2, window_bounds = array<i64: 2, 1, 128>}, {transform_indices = @transform_3, window_bounds = array<i64: 1, 16, 16, 128>}]} {
    %cst = arith.constant 0.000000e+00 : f32
    %0 = vector.broadcast %cst : f32 to vector<18x18x128xf32>
    %c0 = arith.constant 0 : index
    %c0_0 = arith.constant 0 : index
    %c0_1 = arith.constant 0 : index
    %1 = vector.load %arg5[%c0, %c0_0, %c0_1] : memref<18x18x128xf32, #tpu.memory_space<vmem>>, vector<18x18x128xf32>
    tpu.vector_store %arg5[%c0, %c0_0, %c0_1], %0 {strides = array<i32>} : memref<18x18x128xf32, #tpu.memory_space<vmem>>, vector<18x18x128xf32>,
    %c0_2 = arith.constant 0 : index
    %c0_3 = arith.constant 0 : index
    %c0_4 = arith.constant 0 : index
    %c0_5 = arith.constant 0 : index
    %2 = vector.load %arg1[%c0_2, %c0_3, %c0_4, %c0_5] : memref<1x16x16x128xf32, #tpu.memory_space<vmem>>, vector<1x16x16x128xf32>
    %3 = vector.shape_cast %2 : vector<1x16x16x128xf32> to vector<16x16x128xf32>
    %c1 = arith.constant 1 : index
    %c1_6 = arith.constant 1 : index
    %c0_7 = arith.constant 0 : index
    %4 = vector.load %arg5[%c1, %c1_6, %c0_7] : memref<18x18x128xf32, #tpu.memory_space<vmem>>, vector<16x16x128xf32>
    tpu.vector_store %arg5[%c1, %c1_6, %c0_7], %3 {strides = array<i32>} : memref<18x18x128xf32, #tpu.memory_space<vmem>>, vector<16x16x128xf32>,
    %c0_8 = arith.constant 0 : index
    %c0_9 = arith.constant 0 : index
    %c0_10 = arith.constant 0 : index
    %5 = vector.load %arg5[%c0_8, %c0_9, %c0_10] : memref<18x18x128xf32, #tpu.memory_space<vmem>>, vector<16x16x128xf32>
    %6 = vector.shape_cast %5 : vector<16x16x128xf32> to vector<256x128xf32>
    %7 = arith.truncf %6 : vector<256x128xf32> to vector<256x128xbf16>
    %c0_11 = arith.constant 0 : index
    %c1_12 = arith.constant 1 : index
    %c0_13 = arith.constant 0 : index
    %8 = vector.load %arg5[%c0_11, %c1_12, %c0_13] : memref<18x18x128xf32, #tpu.memory_space<vmem>>, vector<16x16x128xf32>
    %9 = vector.shape_cast %8 : vector<16x16x128xf32> to vector<256x128xf32>
    %10 = arith.truncf %9 : vector<256x128xf32> to vector<256x128xbf16>
    %c0_14 = arith.constant 0 : index
    %c2 = arith.constant 2 : index
    %c0_15 = arith.constant 0 : index
    %11 = vector.load %arg5[%c0_14, %c2, %c0_15] : memref<18x18x128xf32, #tpu.memory_space<vmem>>, vector<16x16x128xf32>
    %12 = vector.shape_cast %11 : vector<16x16x128xf32> to vector<256x128xf32>
    %13 = arith.truncf %12 : vector<256x128xf32> to vector<256x128xbf16>
    %c1_16 = arith.constant 1 : index
    %c0_17 = arith.constant 0 : index
    %c0_18 = arith.constant 0 : index
    %14 = vector.load %arg5[%c1_16, %c0_17, %c0_18] : memref<18x18x128xf32, #tpu.memory_space<vmem>>, vector<16x16x128xf32>
    %15 = vector.shape_cast %14 : vector<16x16x128xf32> to vector<256x128xf32>
    %16 = arith.truncf %15 : vector<256x128xf32> to vector<256x128xbf16>
    %c1_19 = arith.constant 1 : index
    %c1_20 = arith.constant 1 : index
    %c0_21 = arith.constant 0 : index
    %17 = vector.load %arg5[%c1_19, %c1_20, %c0_21] : memref<18x18x128xf32, #tpu.memory_space<vmem>>, vector<16x16x128xf32>
    %18 = vector.shape_cast %17 : vector<16x16x128xf32> to vector<256x128xf32>
    %19 = arith.truncf %18 : vector<256x128xf32> to vector<256x128xbf16>
    %c1_22 = arith.constant 1 : index
    %c2_23 = arith.constant 2 : index
    %c0_24 = arith.constant 0 : index
    %20 = vector.load %arg5[%c1_22, %c2_23, %c0_24] : memref<18x18x128xf32, #tpu.memory_space<vmem>>, vector<16x16x128xf32>
    %21 = vector.shape_cast %20 : vector<16x16x128xf32> to vector<256x128xf32>
    %22 = arith.truncf %21 : vector<256x128xf32> to vector<256x128xbf16>
    %c2_25 = arith.constant 2 : index
    %c0_26 = arith.constant 0 : index
    %c0_27 = arith.constant 0 : index
    %23 = vector.load %arg5[%c2_25, %c0_26, %c0_27] : memref<18x18x128xf32, #tpu.memory_space<vmem>>, vector<16x16x128xf32>
    %24 = vector.shape_cast %23 : vector<16x16x128xf32> to vector<256x128xf32>
    %25 = arith.truncf %24 : vector<256x128xf32> to vector<256x128xbf16>
    %c2_28 = arith.constant 2 : index
    %c1_29 = arith.constant 1 : index
    %c0_30 = arith.constant 0 : index
    %26 = vector.load %arg5[%c2_28, %c1_29, %c0_30] : memref<18x18x128xf32, #tpu.memory_space<vmem>>, vector<16x16x128xf32>
    %27 = vector.shape_cast %26 : vector<16x16x128xf32> to vector<256x128xf32>
    %28 = arith.truncf %27 : vector<256x128xf32> to vector<256x128xbf16>
    %c2_31 = arith.constant 2 : index
    %c2_32 = arith.constant 2 : index
    %c0_33 = arith.constant 0 : index
    %29 = vector.load %arg5[%c2_31, %c2_32, %c0_33] : memref<18x18x128xf32, #tpu.memory_space<vmem>>, vector<16x16x128xf32>
    %30 = vector.shape_cast %29 : vector<16x16x128xf32> to vector<256x128xf32>
    %31 = arith.truncf %30 : vector<256x128xf32> to vector<256x128xbf16>
    %32 = tpu.concatenate %7, %10, %13, %16, %19, %22, %25, %28, %31 in 1 : vector<256x128xbf16>, vector<256x128xbf16>, vector<256x128xbf16>, vector<256x128xbf16>, vector<256x128xbf16>, vector<256x128xbf16>, vector<256x128xbf16>, vector<256x128xbf16>, vector<256x128xbf16> -> vector<256x1152xbf16>
    %c0_34 = arith.constant 0 : index
    %c0_35 = arith.constant 0 : index
    %c0_36 = arith.constant 0 : index
    %33 = vector.load %arg2[%c0_34, %c0_35, %c0_36] : memref<2x1152x128xbf16, #tpu.memory_space<vmem>>, vector<1x1152x128xbf16>
    %34 = vector.shape_cast %33 : vector<1x1152x128xbf16> to vector<1152x128xbf16>
    %cst_37 = arith.constant dense<0.000000e+00> : vector<256x128xf32>
    %35 = tpu.matmul %32, %34, %cst_37 {dimension_numbers = #tpu.dot_dimension_numbers<[1], [0], [0], [1], [0, 0, 1, 1], [], []>} : vector<256x1152xbf16>, vector<1152x128xbf16>, vector<256x128xf32> -> vector<256x128xf32>
    %c0_38 = arith.constant 0 : index
    %c0_39 = arith.constant 0 : index
    %c0_40 = arith.constant 0 : index
    %36 = vector.load %arg3[%c0_38, %c0_39, %c0_40] : memref<2x1x128xf32, #tpu.memory_space<vmem>>, vector<1x1x128xf32>
    %37 = vector.shape_cast %36 : vector<1x1x128xf32> to vector<1x128xf32>
    %38 = vector.broadcast %37 : vector<1x128xf32> to vector<256x128xf32>
    %39 = arith.addf %35, %38 : vector<256x128xf32>
    %cst_41 = arith.constant 0.000000e+00 : f32
    %40 = vector.broadcast %cst_41 : f32 to vector<256x128xf32>
    %41 = arith.cmpf oge, %39, %40 : vector<256x128xf32>
    %cst_42 = arith.constant 0.00999999977 : f32
    %42 = vector.broadcast %cst_42 : f32 to vector<256x128xf32>
    %43 = arith.mulf %42, %39 : vector<256x128xf32>
    %44 = arith.select %41, %39, %43 : vector<256x128xi1>, vector<256x128xf32>
    %45 = vector.shape_cast %44 : vector<256x128xf32> to vector<16x16x128xf32>
    %c1_43 = arith.constant 1 : index
    %c1_44 = arith.constant 1 : index
    %c0_45 = arith.constant 0 : index
    %46 = vector.load %arg5[%c1_43, %c1_44, %c0_45] : memref<18x18x128xf32, #tpu.memory_space<vmem>>, vector<16x16x128xf32>
    tpu.vector_store %arg5[%c1_43, %c1_44, %c0_45], %45 {strides = array<i32>} : memref<18x18x128xf32, #tpu.memory_space<vmem>>, vector<16x16x128xf32>,
    %c0_46 = arith.constant 0 : index
    %c0_47 = arith.constant 0 : index
    %c0_48 = arith.constant 0 : index
    %47 = vector.load %arg5[%c0_46, %c0_47, %c0_48] : memref<18x18x128xf32, #tpu.memory_space<vmem>>, vector<16x16x128xf32>
    %48 = vector.shape_cast %47 : vector<16x16x128xf32> to vector<256x128xf32>
    %49 = arith.truncf %48 : vector<256x128xf32> to vector<256x128xbf16>
    %c0_49 = arith.constant 0 : index
    %c1_50 = arith.constant 1 : index
    %c0_51 = arith.constant 0 : index
    %50 = vector.load %arg5[%c0_49, %c1_50, %c0_51] : memref<18x18x128xf32, #tpu.memory_space<vmem>>, vector<16x16x128xf32>
    %51 = vector.shape_cast %50 : vector<16x16x128xf32> to vector<256x128xf32>
    %52 = arith.truncf %51 : vector<256x128xf32> to vector<256x128xbf16>
    %c0_52 = arith.constant 0 : index
    %c2_53 = arith.constant 2 : index
    %c0_54 = arith.constant 0 : index
    %53 = vector.load %arg5[%c0_52, %c2_53, %c0_54] : memref<18x18x128xf32, #tpu.memory_space<vmem>>, vector<16x16x128xf32>
    %54 = vector.shape_cast %53 : vector<16x16x128xf32> to vector<256x128xf32>
    %55 = arith.truncf %54 : vector<256x128xf32> to vector<256x128xbf16>
    %c1_55 = arith.constant 1 : index
    %c0_56 = arith.constant 0 : index
    %c0_57 = arith.constant 0 : index
    %56 = vector.load %arg5[%c1_55, %c0_56, %c0_57] : memref<18x18x128xf32, #tpu.memory_space<vmem>>, vector<16x16x128xf32>
    %57 = vector.shape_cast %56 : vector<16x16x128xf32> to vector<256x128xf32>
    %58 = arith.truncf %57 : vector<256x128xf32> to vector<256x128xbf16>
    %c1_58 = arith.constant 1 : index
    %c1_59 = arith.constant 1 : index
    %c0_60 = arith.constant 0 : index
    %59 = vector.load %arg5[%c1_58, %c1_59, %c0_60] : memref<18x18x128xf32, #tpu.memory_space<vmem>>, vector<16x16x128xf32>
    %60 = vector.shape_cast %59 : vector<16x16x128xf32> to vector<256x128xf32>
    %61 = arith.truncf %60 : vector<256x128xf32> to vector<256x128xbf16>
    %c1_61 = arith.constant 1 : index
    %c2_62 = arith.constant 2 : index
    %c0_63 = arith.constant 0 : index
    %62 = vector.load %arg5[%c1_61, %c2_62, %c0_63] : memref<18x18x128xf32, #tpu.memory_space<vmem>>, vector<16x16x128xf32>
    %63 = vector.shape_cast %62 : vector<16x16x128xf32> to vector<256x128xf32>
    %64 = arith.truncf %63 : vector<256x128xf32> to vector<256x128xbf16>
    %c2_64 = arith.constant 2 : index
    %c0_65 = arith.constant 0 : index
    %c0_66 = arith.constant 0 : index
    %65 = vector.load %arg5[%c2_64, %c0_65, %c0_66] : memref<18x18x128xf32, #tpu.memory_space<vmem>>, vector<16x16x128xf32>
    %66 = vector.shape_cast %65 : vector<16x16x128xf32> to vector<256x128xf32>
    %67 = arith.truncf %66 : vector<256x128xf32> to vector<256x128xbf16>
    %c2_67 = arith.constant 2 : index
    %c1_68 = arith.constant 1 : index
    %c0_69 = arith.constant 0 : index
    %68 = vector.load %arg5[%c2_67, %c1_68, %c0_69] : memref<18x18x128xf32, #tpu.memory_space<vmem>>, vector<16x16x128xf32>
    %69 = vector.shape_cast %68 : vector<16x16x128xf32> to vector<256x128xf32>
    %70 = arith.truncf %69 : vector<256x128xf32> to vector<256x128xbf16>
    %c2_70 = arith.constant 2 : index
    %c2_71 = arith.constant 2 : index
    %c0_72 = arith.constant 0 : index
    %71 = vector.load %arg5[%c2_70, %c2_71, %c0_72] : memref<18x18x128xf32, #tpu.memory_space<vmem>>, vector<16x16x128xf32>
    %72 = vector.shape_cast %71 : vector<16x16x128xf32> to vector<256x128xf32>
    %73 = arith.truncf %72 : vector<256x128xf32> to vector<256x128xbf16>
    %74 = tpu.concatenate %49, %52, %55, %58, %61, %64, %67, %70, %73 in 1 : vector<256x128xbf16>, vector<256x128xbf16>, vector<256x128xbf16>, vector<256x128xbf16>, vector<256x128xbf16>, vector<256x128xbf16>, vector<256x128xbf16>, vector<256x128xbf16>, vector<256x128xbf16> -> vector<256x1152xbf16>
    %c1_73 = arith.constant 1 : index
    %c0_74 = arith.constant 0 : index
    %c0_75 = arith.constant 0 : index
    %75 = vector.load %arg2[%c1_73, %c0_74, %c0_75] : memref<2x1152x128xbf16, #tpu.memory_space<vmem>>, vector<1x1152x128xbf16>
    %76 = vector.shape_cast %75 : vector<1x1152x128xbf16> to vector<1152x128xbf16>
    %cst_76 = arith.constant dense<0.000000e+00> : vector<256x128xf32>
    %77 = tpu.matmul %74, %76, %cst_76 {dimension_numbers = #tpu.dot_dimension_numbers<[1], [0], [0], [1], [0, 0, 1, 1], [], []>} : vector<256x1152xbf16>, vector<1152x128xbf16>, vector<256x128xf32> -> vector<256x128xf32>
    %c1_77 = arith.constant 1 : index
    %c0_78 = arith.constant 0 : index
    %c0_79 = arith.constant 0 : index
    %78 = vector.load %arg3[%c1_77, %c0_78, %c0_79] : memref<2x1x128xf32, #tpu.memory_space<vmem>>, vector<1x1x128xf32>
    %79 = vector.shape_cast %78 : vector<1x1x128xf32> to vector<1x128xf32>
    %80 = vector.broadcast %79 : vector<1x128xf32> to vector<256x128xf32>
    %81 = arith.addf %77, %80 : vector<256x128xf32>
    %cst_80 = arith.constant 0.000000e+00 : f32
    %82 = vector.broadcast %cst_80 : f32 to vector<256x128xf32>
    %83 = arith.cmpf oge, %81, %82 : vector<256x128xf32>
    %cst_81 = arith.constant 0.00999999977 : f32
    %84 = vector.broadcast %cst_81 : f32 to vector<256x128xf32>
    %85 = arith.mulf %84, %81 : vector<256x128xf32>
    %86 = arith.select %83, %81, %85 : vector<256x128xi1>, vector<256x128xf32>
    %87 = vector.shape_cast %86 : vector<256x128xf32> to vector<1x16x16x128xf32>
    %c0_82 = arith.constant 0 : index
    %c0_83 = arith.constant 0 : index
    %c0_84 = arith.constant 0 : index
    %c0_85 = arith.constant 0 : index
    %88 = vector.load %arg4[%c0_82, %c0_83, %c0_84, %c0_85] : memref<1x16x16x128xf32, #tpu.memory_space<vmem>>, vector<1x16x16x128xf32>
    tpu.vector_store %arg4[%c0_82, %c0_83, %c0_84, %c0_85], %87 {strides = array<i32>} : memref<1x16x16x128xf32, #tpu.memory_space<vmem>>, vector<1x16x16x128xf32>,
    return
  }
  func.func @transform_0(%arg0: i32) -> (i32, i32, i32, i32) {
    %c0_i32 = arith.constant 0 : i32
    %c0_i32_0 = arith.constant 0 : i32
    %c0_i32_1 = arith.constant 0 : i32
    %c0_i32_2 = arith.constant 0 : i32
    return %arg0, %c0_i32, %c0_i32_0, %c0_i32_1 : i32, i32, i32, i32
  }
  func.func @transform_1(%arg0: i32) -> (i32, i32, i32) {
    %c0_i32 = arith.constant 0 : i32
    %c0_i32_0 = arith.constant 0 : i32
    %c0_i32_1 = arith.constant 0 : i32
    %c0_i32_2 = arith.constant 0 : i32
    return %c0_i32, %c0_i32_0, %c0_i32_1 : i32, i32, i32
  }
  func.func @transform_2(%arg0: i32) -> (i32, i32, i32) {
    %c0_i32 = arith.constant 0 : i32
    %c0_i32_0 = arith.constant 0 : i32
    %c0_i32_1 = arith.constant 0 : i32
    %c0_i32_2 = arith.constant 0 : i32
    return %c0_i32, %c0_i32_0, %c0_i32_1 : i32, i32, i32
  }
  func.func @transform_3(%arg0: i32) -> (i32, i32, i32, i32) {
    %c0_i32 = arith.constant 0 : i32
    %c0_i32_0 = arith.constant 0 : i32
    %c0_i32_1 = arith.constant 0 : i32
    %c0_i32_2 = arith.constant 0 : i32
    return %arg0, %c0_i32, %c0_i32_0, %c0_i32_1 : i32, i32, i32, i32
  }
}

</mosaic_0001>

<bundles_post_ra>
// kernel: stacked_conv_layers_forward.1
= control target key start
LH: loop header
LB: loop body
LE: loop exit
PB: predicated region body
PF: predicated region fallthrough
CT: control target
= control target key end

     0   :  { %s5774_s12 = smov 0   ;;  %s7730_s0 = inlined_call_operand.vmem [shape: f32[2,16,16,128], index: 0, kind: input, shape index: {}]   ;;  %s7731_s1 = inlined_call_operand.vmem [shape: bf16[2,1152,128], index: 1, kind: input, shape index: {}]   ;;  %s7732_s2 = inlined_call_operand.vmem [shape: f32[2,1,128], index: 2, kind: input, shape index: {}]   ;;  %s7733_s3 = inlined_call_operand.vmem [shape: f32[2,16,16,128], index: 3, kind: output, shape index: {}]  }
   0x1 LB: > { %s4245_s13 = sadd.s32 4294967295, %s5750_s12   ;;  %p4249_p0 = scmp.ge.s32.totalorder %s5750_s12, 1  ;;  %s5750_s12 = sphi %s5774_s12, %s13_s12  }
   0x2   : > { %p137_p1 = scmp.lt.s32.totalorder %s5750_s12, 3 }
   0x4   : > { %p138_p2 = pnand %p4249_p0, %p137_p1 }
   0x6   : > { %141 = sbr.rel (%p138_p2) target bundleno = 1023 (0x3ff), region = 32 }
   0xb   : > { %v5598_v0 = vld [vmem:[%s7731_s1 + $0x78] sm:$0xff]   ;;  %v5752_v2 = vmov 0.0   ;;  %v5602_v5 = vld [vmem:[%s7731_s1 + $0x70] sm:$0xff]   ;;  %v5606_v9 = vld [vmem:[%s7731_s1 + $0x68] sm:$0xff]   ;;  %p161_p3 = scmp.lt.s32.totalorder %s4245_s13, 1  ;;  %v5753_v39 = vmov 0.0|0.0  }
   0xc   : > { %v5599_v1 = vld [vmem:[%s7731_s1 + $0x38] sm:$0xff]   ;;  %172 = vst [vmem:[#allocation2] sm:$0xff] %v5752_v2  ;;  %173 = vst [vmem:[#allocation2 + $0x8] sm:$0xff] %v5752_v2  ;;  %4549 = vmatprep.subr.bf16.mxu0 %v5598_v0  ;;  %v5603_v6 = vld [vmem:[%s7731_s1 + $0x30] sm:$0xff]  }
   0xd   : > { %174 = vst [vmem:[#allocation2 + $0x10] sm:$0x3] %v5752_v2  ;;  %175 = vst [vmem:[#allocation2 + $0x18] sm:$0xff] %v5752_v2  ;;  %v5600_v3 = vld [vmem:[%s7731_s1 + $0xf8] sm:$0xff]   ;;  %4550 = vmatpush3.bf16.msra.mxu0 %v5599_v1  ;;  %v5604_v7 = vld [vmem:[%s7731_s1 + $0xf0] sm:$0xff]   ;;  %s7849_s13 = smov (!%p161_p3, %s4245_s13), 1 }
   0xe   : > { %176 = vst [vmem:[#allocation2 + $0x20] sm:$0xff] %v5752_v2  ;;  %177 = vst [vmem:[#allocation2 + $0x28] sm:$0x3] %v5752_v2  ;;  %v5601_v4 = vld [vmem:[%s7731_s1 + $0xb8] sm:$0xff]   ;;  %4661 = vmatprep.subr.bf16.mxu1 %v5600_v3  ;;  %4551 = vmatprep.subr.bf16.mxu0 %v5602_v5  ;;  %v5605_v8 = vld [vmem:[%s7731_s1 + $0xb0] sm:$0xff]   ;;  %s4547_s20 = sshll.u32 %s7849_s13, 8 }
   0xf   : > { %178 = vst [vmem:[#allocation2 + $0x30] sm:$0xff] %v5752_v2  ;;  %179 = vst [vmem:[#allocation2 + $0x38] sm:$0xff] %v5752_v2  ;;  %4662 = vmatpush3.bf16.msra.mxu1 %v5601_v4  ;;  %v5607_v10 = vld [vmem:[%s7731_s1 + $0x28] sm:$0xff]   ;;  %v5610_v13 = vld [vmem:[%s7731_s1 + $0x60] sm:$0xff]   ;;  %s5887_s29 = scalar_lea.vmem %s7730_s0, %s4547_s20  ;;  %s7592_s23 = scalar_lea.vmem %s7733_s3, %s4547_s20 }
  0x10   : > { %180 = vst [vmem:[#allocation2 + $0x40] sm:$0x3] %v5752_v2  ;;  %181 = vst [vmem:[#allocation2 + $0x48] sm:$0xff] %v5752_v2  ;;  %4663 = vmatprep.subr.bf16.mxu1 %v5604_v7  ;;  %v5608_v11 = vld [vmem:[%s7731_s1 + $0xe8] sm:$0xff]   ;;  %v5611_v14 = vld [vmem:[%s7731_s1 + $0x20] sm:$0xff]  }
  0x11   : > { %182 = vst [vmem:[#allocation2 + $0x50] sm:$0xff] %v5752_v2  ;;  %183 = vst [vmem:[#allocation2 + $0x58] sm:$0x3] %v5752_v2  ;;  %4552 = vmatpush3.bf16.msra.mxu0 %v5603_v6  ;;  %v5609_v12 = vld [vmem:[%s7731_s1 + $0xa8] sm:$0xff]   ;;  %v5612_v15 = vld [vmem:[%s7731_s1 + $0xe0] sm:$0xff]  }
  0x12   : > { %184 = vst [vmem:[#allocation2 + $0x60] sm:$0xff] %v5752_v2  ;;  %185 = vst [vmem:[#allocation2 + $0x68] sm:$0xff] %v5752_v2  ;;  %4553 = vmatprep.subr.bf16.mxu0 %v5606_v9  ;;  %v5613_v16 = vld [vmem:[%s7731_s1 + $0xa0] sm:$0xff]   ;;  %v5614_v17 = vld [vmem:[%s7731_s1 + $0x58] sm:$0xff]  }
  0x13   : > { %186 = vst [vmem:[#allocation2 + $0x70] sm:$0x3] %v5752_v2  ;;  %187 = vst [vmem:[#allocation2 + $0x78] sm:$0xff] %v5752_v2  ;;  %4664 = vmatpush3.bf16.msra.mxu1 %v5605_v8  ;;  %v5615_v18 = vld [vmem:[%s7731_s1 + $0x18] sm:$0xff]   ;;  %v5618_v21 = vld [vmem:[%s7731_s1 + $0x50] sm:$0xff]  }
  0x14   : > { %188 = vst [vmem:[#allocation2 + $0x80] sm:$0xff] %v5752_v2  ;;  %189 = vst [vmem:[#allocation2 + $0x88] sm:$0x3] %v5752_v2  ;;  %4665 = vmatprep.subr.bf16.mxu1 %v5608_v11  ;;  %v5616_v19 = vld [vmem:[%s7731_s1 + $0xd8] sm:$0xff]   ;;  %v5619_v22 = vld [vmem:[%s7731_s1 + $0x10] sm:$0xff]  }
  0x15   : > { %190 = vst [vmem:[#allocation2 + $0x90] sm:$0xff] %v5752_v2  ;;  %191 = vst [vmem:[#allocation2 + $0x98] sm:$0xff] %v5752_v2  ;;  %4554 = vmatpush3.bf16.msra.mxu0 %v5607_v10  ;;  %v5617_v20 = vld [vmem:[%s7731_s1 + $0x98] sm:$0xff]   ;;  %v5620_v23 = vld [vmem:[%s7731_s1 + $0xd0] sm:$0xff]  }
  0x16   : > { %192 = vst [vmem:[#allocation2 + $0xa0] sm:$0x3] %v5752_v2  ;;  %193 = vst [vmem:[#allocation2 + $0xa8] sm:$0xff] %v5752_v2  ;;  %4555 = vmatprep.subr.bf16.mxu0 %v5610_v13  ;;  %v5621_v24 = vld [vmem:[%s7731_s1 + $0x90] sm:$0xff]   ;;  %v5622_v25 = vld [vmem:[%s7731_s1 + $0x48] sm:$0xff]  }
  0x17   : > { %194 = vst [vmem:[#allocation2 + $0xb0] sm:$0xff] %v5752_v2  ;;  %195 = vst [vmem:[#allocation2 + $0xb8] sm:$0x3] %v5752_v2  ;;  %4666 = vmatpush3.bf16.msra.mxu1 %v5609_v12  ;;  %v5623_v26 = vld [vmem:[%s7731_s1 + $0x8] sm:$0xff]   ;;  %v5626_v29 = vld [vmem:[%s7731_s1 + $0x40] sm:$0xff]  }
  0x18   : > { %196 = vst [vmem:[#allocation2 + $0xc0] sm:$0xff] %v5752_v2  ;;  %197 = vst [vmem:[#allocation2 + $0xc8] sm:$0xff] %v5752_v2  ;;  %4667 = vmatprep.subr.bf16.mxu1 %v5612_v15  ;;  %v5624_v27 = vld [vmem:[%s7731_s1 + $0xc8] sm:$0xff]   ;;  %v5627_v30 = vld [vmem:[%s7731_s1] sm:$0xff]  }
  0x19   : > { %198 = vst [vmem:[#allocation2 + $0xd0] sm:$0x3] %v5752_v2  ;;  %199 = vst [vmem:[#allocation2 + $0xd8] sm:$0xff] %v5752_v2  ;;  %4556 = vmatpush3.bf16.msra.mxu0 %v5611_v14  ;;  %v5625_v28 = vld [vmem:[%s7731_s1 + $0x88] sm:$0xff]   ;;  %v5628_v31 = vld [vmem:[%s7731_s1 + $0xc0] sm:$0xff]  }
  0x1a   : > { %200 = vst [vmem:[#allocation2 + $0xe0] sm:$0xff] %v5752_v2  ;;  %201 = vst [vmem:[#allocation2 + $0xe8] sm:$0x3] %v5752_v2  ;;  %4557 = vmatprep.subr.bf16.mxu0 %v5614_v17  ;;  %v339_v32 = vld [vmem:[#allocation2 + $0x1] sm:$0xff]  ;;  %v340_v33 = vld [vmem:[#allocation2 + $0x9] sm:$0xff] }
  0x1b   : > { %202 = vst [vmem:[#allocation2 + $0xf0] sm:$0xff] %v5752_v2  ;;  %203 = vst [vmem:[#allocation2 + $0xf8] sm:$0xff] %v5752_v2  ;;  %4668 = vmatpush3.bf16.msra.mxu1 %v5613_v16  ;;  %v371_v34 = vpack.c.bf16 %v340_v33, %v339_v32  ;;  %v5629_v35 = vld [vmem:[%s7731_s1 + $0x80] sm:$0xff]   ;;  %v5630_v36 = vld [vmem:[%s7731_s1 + $0x178] sm:$0xff]  }
  0x1c   : > { %204 = vst [vmem:[#allocation2 + $0x100] sm:$0x3] %v5752_v2  ;;  %205 = vst [vmem:[#allocation2 + $0x108] sm:$0xff] %v5752_v2  ;;  %4669 = vmatprep.subr.bf16.mxu1 %v5616_v19  ;;  %v226_v37 = vld [vmem:[%s5887_s29] sm:$0xff]  ;;  %v227_v38 = vld [vmem:[%s5887_s29 + $0x8] sm:$0xff] }
  0x1d   : > { %206 = vst [vmem:[#allocation2 + $0x110] sm:$0xff] %v5752_v2  ;;  %207 = vst [vmem:[#allocation2 + $0x118] sm:$0x3] %v5752_v2  ;;  %4558 = vmatpush3.bf16.msra.mxu0 %v5615_v18  ;;  %1339 = vmatprep.mubr.bf16.mxu0 %v371_v34  ;;  %v5631_v40 = vld [vmem:[%s7731_s1 + $0x138] sm:$0xff]   ;;  %v5900_v41 = vpack.c.bf16 %v227_v38, %v226_v37  ;;  %v228_v42 = vld [vmem:[%s5887_s29 + $0x10] sm:$0xff] }
  0x1e   : > { %208 = vst [vmem:[#allocation2 + $0x120] sm:$0xff] %v5752_v2  ;;  %209 = vst [vmem:[#allocation2 + $0x128] sm:$0xff] %v5752_v2  ;;  %4559 = vmatprep.subr.bf16.mxu0 %v5618_v21  ;;  %v229_v43 = vld [vmem:[%s5887_s29 + $0x18] sm:$0xff]  ;;  %v387_v44 = vld [vmem:[#allocation2 + $0x2] sm:$0xff] }
  0x1f   : > { %210 = vst [vmem:[#allocation2 + $0x130] sm:$0x3] %v5752_v2  ;;  %211 = vst [vmem:[#allocation2 + $0x138] sm:$0xff] %v5752_v2  ;;  %4670 = vmatpush3.bf16.msra.mxu1 %v5617_v20  ;;  %v388_v45 = vld [vmem:[#allocation2 + $0xa] sm:$0xff]  ;;  %v230_v47 = vld [vmem:[%s5887_s29 + $0x20] sm:$0xff]  ;;  %v5930_v58 = vpack.c.bf16 %v229_v43, %v228_v42 }
  0x20   : > { %212 = vst [vmem:[#allocation2 + $0x140] sm:$0xff] %v5752_v2  ;;  %213 = vst [vmem:[#allocation2 + $0x148] sm:$0x3] %v5752_v2  ;;  %4671 = vmatprep.subr.bf16.mxu1 %v5620_v23  ;;  %v5632_v46 = vld [vmem:[%s7731_s1 + $0x170] sm:$0xff]   ;;  %v231_v48 = vld [vmem:[%s5887_s29 + $0x28] sm:$0xff]  ;;  %v419_v57 = vpack.c.bf16 %v388_v45, %v387_v44 }
  0x21   : > { %214 = vst [vmem:[#allocation2 + $0x150] sm:$0xff] %v5752_v2  ;;  %215 = vst [vmem:[#allocation2 + $0x158] sm:$0xff] %v5752_v2  ;;  %4560 = vmatpush3.bf16.msra.mxu0 %v5619_v22  ;;  %v5633_v49 = vld [vmem:[%s7731_s1 + $0x130] sm:$0xff]   ;;  %v5917_v51 = vld [vmem:[%s5887_s29 + $0x38] sm:$0xff]  ;;  %v5951_v7 = vpack.c.bf16 %v231_v48, %v230_v47 }
  0x22   : > { %216 = vst [vmem:[#allocation2 + $0x160] sm:$0x3] %v5752_v2  ;;  %217 = vst [vmem:[#allocation2 + $0x168] sm:$0xff] %v5752_v2  ;;  %4561 = vmatprep.subr.bf16.mxu0 %v5622_v25  ;;  %v5914_v50 = vld [vmem:[%s5887_s29 + $0x30] sm:$0xff]  ;;  %v5634_v52 = vld [vmem:[%s7731_s1 + $0x168] sm:$0xff]  }
  0x23   : > { %218 = vst [vmem:[#allocation2 + $0x170] sm:$0xff] %v5752_v2  ;;  %219 = vst [vmem:[#allocation2 + $0x178] sm:$0x3] %v5752_v2  ;;  %4672 = vmatpush3.bf16.msra.mxu1 %v5621_v24  ;;  %v5925_v54 = vld [vmem:[%s5887_s29 + $0x40] sm:$0xff]  ;;  %v5928_v55 = vld [vmem:[%s5887_s29 + $0x48] sm:$0xff] }
  0x24   : > { %220 = vst [vmem:[#allocation2 + $0x180] sm:$0xff] %v5752_v2  ;;  %221 = vst [vmem:[#allocation2 + $0x188] sm:$0xff] %v5752_v2  ;;  %4673 = vmatprep.subr.bf16.mxu1 %v5624_v27  ;;  %v5635_v60 = vld [vmem:[%s7731_s1 + $0x128] sm:$0xff]   ;;  %v5940_v0 = vld [vmem:[%s5887_s29 + $0x50] sm:$0xff] }
  0x25   : > { %222 = vst [vmem:[#allocation2 + $0x190] sm:$0x3] %v5752_v2  ;;  %223 = vst [vmem:[#allocation2 + $0x198] sm:$0xff] %v5752_v2  ;;  %4562 = vmatpush3.bf16.msra.mxu0 %v5623_v26  ;;  %v5946_v5 = vld [vmem:[%s5887_s29 + $0x58] sm:$0xff]  ;;  %v5636_v8 = vld [vmem:[%s7731_s1 + $0x160] sm:$0xff]   ;;  %v6005_v26 = vpack.c.bf16 %v5917_v51, %v5914_v50 }
  0x26   : > { %224 = vst [vmem:[#allocation2 + $0x1a0] sm:$0xff] %v5752_v2  ;;  %225 = vst [vmem:[#allocation2 + $0x1a8] sm:$0x3] %v5752_v2  ;;  %4563 = vmatprep.subr.bf16.mxu0 %v5626_v29  ;;  %v5959_v10 = vld [vmem:[%s5887_s29 + $0x60] sm:$0xff]  ;;  %v5962_v11 = vld [vmem:[%s5887_s29 + $0x68] sm:$0xff] }
  0x27   : > { %4674 = vmatpush3.bf16.msra.mxu1 %v5625_v28  ;;  %259 = vst [vmem:[#allocation2 + $0x19] sm:$0xff] %v226_v37  ;;  %260 = vst [vmem:[#allocation2 + $0x21] sm:$0xff] %v227_v38  ;;  %v5637_v12 = vld [vmem:[%s7731_s1 + $0x120] sm:$0xff]   ;;  %v5970_v13 = vld [vmem:[%s5887_s29 + $0x70] sm:$0xff]  ;;  %v6037_v38 = vpack.c.bf16 %v5928_v55, %v5925_v54 }
  0x28   : > { %4675 = vmatprep.subr.bf16.mxu1 %v5628_v31  ;;  %261 = vst [vmem:[#allocation2 + $0x31] sm:$0xff] %v228_v42  ;;  %262 = vst [vmem:[#allocation2 + $0x39] sm:$0xff] %v229_v43  ;;  %v5974_v16 = vld [vmem:[%s5887_s29 + $0x78] sm:$0xff]  ;;  %v5984_v18 = vld [vmem:[%s5887_s29 + $0x80] sm:$0xff] }
  0x29   : > { %4564 = vmatpush3.bf16.msra.mxu0 %v5627_v30  ;;  %263 = vst [vmem:[#allocation2 + $0x49] sm:$0xff] %v230_v47  ;;  %264 = vst [vmem:[#allocation2 + $0x51] sm:$0xff] %v231_v48  ;;  %v5638_v17 = vld [vmem:[%s7731_s1 + $0x158] sm:$0xff]   ;;  %v5988_v19 = vld [vmem:[%s5887_s29 + $0x88] sm:$0xff] }
  0x2a   : > { %4773 = vmatprep.subr.bf16.mxu0 %v5630_v36  ;;  %265 = vst [vmem:[#allocation2 + $0x61] sm:$0xff] %v5914_v50  ;;  %266 = vst [vmem:[#allocation2 + $0x69] sm:$0xff] %v5917_v51  ;;  %v5639_v22 = vld [vmem:[%s7731_s1 + $0x118] sm:$0xff]   ;;  %v5996_v23 = vld [vmem:[%s5887_s29 + $0x90] sm:$0xff] }
  0x2b   : > { %4676 = vmatpush3.bf16.msra.mxu1 %v5629_v35  ;;  %267 = vst [vmem:[#allocation2 + $0x79] sm:$0xff] %v5925_v54  ;;  %268 = vst [vmem:[#allocation2 + $0x81] sm:$0xff] %v5928_v55  ;;  %v5999_v24 = vld [vmem:[%s5887_s29 + $0x98] sm:$0xff]  ;;  %v5640_v27 = vld [vmem:[%s7731_s1 + $0x150] sm:$0xff]   ;;  %v6076_v54 = vpack.c.bf16 %v5946_v5, %v5940_v0 }
  0x2c   : > { %1340 = vmatmul.mubr.bf16.vlgmr.msra.gmra.mxu0 %v5753_v39  ;;  %269 = vst [vmem:[#allocation2 + $0x91] sm:$0xff] %v5940_v0  ;;  %270 = vst [vmem:[#allocation2 + $0x99] sm:$0xff] %v5946_v5  ;;  %v6015_v29 = vld [vmem:[%s5887_s29 + $0xa0] sm:$0xff]  ;;  %v6022_v31 = vld [vmem:[%s5887_s29 + $0xa8] sm:$0xff] }
  0x2d   : > { %4774 = vmatpush3.bf16.msra.mxu0 %v5631_v40  ;;  %1347 = vmatprep.mubr.bf16.mxu0 %v5900_v41  ;;  %271 = vst [vmem:[#allocation2 + $0xa9] sm:$0xff] %v5959_v10  ;;  %272 = vst [vmem:[#allocation2 + $0xb1] sm:$0xff] %v5962_v11  ;;  %v5641_v35 = vld [vmem:[%s7731_s1 + $0x110] sm:$0xff]   ;;  %v6040_v39 = vld [vmem:[%s5887_s29 + $0xb8] sm:$0xff] }
  0x2e   : > { %4775 = vmatprep.subr.bf16.mxu0 %v5632_v46  ;;  %v435_v53 = vld [vmem:[#allocation2 + $0x18] sm:$0xff]  ;;  %v436_v56 = vld [vmem:[#allocation2 + $0x20] sm:$0xff]  ;;  %273 = vst [vmem:[#allocation2 + $0xc1] sm:$0xff] %v5970_v13  ;;  %274 = vst [vmem:[#allocation2 + $0xc9] sm:$0xff] %v5974_v16 }
  0x2f   : > { %v467_v59 = vpack.c.bf16 %v436_v56, %v435_v53  ;;  %v437_v61 = vld [vmem:[#allocation2 + $0x30] sm:$0xff]  ;;  %v438_v62 = vld [vmem:[#allocation2 + $0x38] sm:$0xff]  ;;  %v390_v2 = vld [vmem:[#allocation2 + $0x22] sm:$0xff]  ;;  %275 = vst [vmem:[#allocation2 + $0xd9] sm:$0xff] %v5984_v18 }
  0x30   : > { %v5937_v63 = vpack.c.bf16 %v438_v62, %v437_v61  ;;  %v389_v1 = vld [vmem:[#allocation2 + $0x1a] sm:$0xff]  ;;  %v439_v3 = vld [vmem:[#allocation2 + $0x48] sm:$0xff]  ;;  %v440_v4 = vld [vmem:[#allocation2 + $0x50] sm:$0xff]  ;;  %276 = vst [vmem:[#allocation2 + $0xe1] sm:$0xff] %v5988_v19 }
  0x31   : > { %4776 = vmatpush3.bf16.msra.mxu0 %v5633_v49  ;;  %1500 = vmatprep.mubr.bf16.mxu1 %v467_v59  ;;  %v5949_v6 = vpack.c.bf16 %v390_v2, %v389_v1  ;;  %v5956_v9 = vpack.c.bf16 %v440_v4, %v439_v3  ;;  %v391_v14 = vld [vmem:[#allocation2 + $0x32] sm:$0xff]  ;;  %v392_v15 = vld [vmem:[#allocation2 + $0x3a] sm:$0xff]  ;;  %v442_v21 = vld [vmem:[#allocation2 + $0x68] sm:$0xff]  ;;  %277 = vst [vmem:[#allocation2 + $0xf1] sm:$0xff] %v5996_v23 }
  0x32   : > { %4777 = vmatprep.subr.bf16.mxu0 %v5634_v52  ;;  %1501 = vmatmul.mubr.bf16.vlgmr.msra.gmra.mxu1 %v419_v57  ;;  %v441_v20 = vld [vmem:[#allocation2 + $0x60] sm:$0xff]  ;;  %v6001_v25 = vpack.c.bf16 %v392_v15, %v391_v14  ;;  %278 = vst [vmem:[#allocation2 + $0xf9] sm:$0xff] %v5999_v24  ;;  %279 = vst [vmem:[#allocation2 + $0x109] sm:$0xff] %v6015_v29  ;;  %v393_v30 = vld [vmem:[#allocation2 + $0x4a] sm:$0xff] }
  0x33   : > { %1508 = vmatprep.mubr.bf16.mxu1 %v5937_v63  ;;  %v6012_v28 = vpack.c.bf16 %v442_v21, %v441_v20  ;;  %v394_v32 = vld [vmem:[#allocation2 + $0x52] sm:$0xff]  ;;  %v444_v34 = vld [vmem:[#allocation2 + $0x80] sm:$0xff]  ;;  %280 = vst [vmem:[#allocation2 + $0x111] sm:$0xff] %v6022_v31  ;;  %282 = vst [vmem:[#allocation2 + $0x129] sm:$0xff] %v6040_v39 }
  0x34   : > { %1348 = vmatmul.mubr.bf16.gmra.mxu0 %v467_v59  ;;  %v443_v33 = vld [vmem:[#allocation2 + $0x78] sm:$0xff]  ;;  %v6030_v36 = vld [vmem:[%s5887_s29 + $0xb0] sm:$0xff]  ;;  %v6033_v37 = vpack.c.bf16 %v394_v32, %v393_v30  ;;  %v5642_v42 = vld [vmem:[%s7731_s1 + $0x148] sm:$0xff]  }
  0x35   : > { %1355 = vmatprep.mubr.bf16.mxu0 %v5930_v58  ;;  %4778 = vmatpush3.bf16.msra.mxu0 %v5635_v60  ;;  %281 = vst [vmem:[#allocation2 + $0x121] sm:$0xff] %v6030_v36  ;;  %v6042_v40 = vpack.c.bf16 %v444_v34, %v443_v33  ;;  %v6049_v43 = vld [vmem:[%s5887_s29 + $0xc0] sm:$0xff]  ;;  %v6052_v44 = vld [vmem:[%s5887_s29 + $0xc8] sm:$0xff]  ;;  %v445_v48 = vld [vmem:[#allocation2 + $0x90] sm:$0xff] }
  0x36   : > { %4779 = vmatprep.subr.bf16.mxu0 %v5636_v8  ;;  %283 = vst [vmem:[#allocation2 + $0x139] sm:$0xff] %v6049_v43  ;;  %284 = vst [vmem:[#allocation2 + $0x141] sm:$0xff] %v6052_v44  ;;  %v5643_v45 = vld [vmem:[%s7731_s1 + $0x108] sm:$0xff]   ;;  %v5644_v49 = vld [vmem:[%s7731_s1 + $0x1f8] sm:$0xff]   ;;  %v6111_v8 = vpack.c.bf16 %v5962_v11, %v5959_v10 }
  0x37   : > { %v395_v46 = vld [vmem:[#allocation2 + $0x62] sm:$0xff]  ;;  %v396_v47 = vld [vmem:[#allocation2 + $0x6a] sm:$0xff]  ;;  %v446_v50 = vld [vmem:[#allocation2 + $0x98] sm:$0xff]  ;;  %4885 = vmatprep.subr.bf16.mxu1 %v5644_v49 }
  0x38   : > { %v5645_v51 = vld [vmem:[%s7731_s1 + $0x1b8] sm:$0xff]   ;;  %v5646_v52 = vld [vmem:[%s7731_s1 + $0x1f0] sm:$0xff]   ;;  %v6072_v53 = vpack.c.bf16 %v396_v47, %v395_v46  ;;  %v6078_v55 = vpack.c.bf16 %v446_v50, %v445_v48  ;;  %v398_v60 = vld [vmem:[#allocation2 + $0x82] sm:$0xff] }
  0x39   : > { %4780 = vmatpush3.bf16.msra.mxu0 %v5637_v12  ;;  %4886 = vmatpush3.bf16.msra.mxu1 %v5645_v51  ;;  %v5647_v56 = vld [vmem:[%s7731_s1 + $0x1b0] sm:$0xff]   ;;  %v397_v59 = vld [vmem:[#allocation2 + $0x7a] sm:$0xff]  ;;  %v447_v62 = vld [vmem:[#allocation2 + $0xa8] sm:$0xff] }
  0x3a   : > { %1509 = vmatmul.mubr.bf16.gmra.mxu1 %v5949_v6  ;;  %4781 = vmatprep.subr.bf16.mxu0 %v5638_v17  ;;  %v6084_v57 = vld [vmem:[%s5887_s29 + $0xd0] sm:$0xff]  ;;  %v6088_v61 = vld [vmem:[%s5887_s29 + $0xd8] sm:$0xff]  ;;  %v5648_v1 = vld [vmem:[%s7731_s1 + $0x1e8] sm:$0xff]   ;;  %v6107_v5 = vpack.c.bf16 %v398_v60, %v397_v59  ;;  %v6179_v60 = vpack.c.bf16 %v5988_v19, %v5984_v18 }
  0x3b   : > { %1516 = vmatprep.mubr.bf16.mxu1 %v5956_v9  ;;  %4887 = vmatprep.subr.bf16.mxu1 %v5646_v52  ;;  %285 = vst [vmem:[#allocation2 + $0x151] sm:$0xff] %v6084_v57  ;;  %v448_v0 = vld [vmem:[#allocation2 + $0xb0] sm:$0xff]  ;;  %286 = vst [vmem:[#allocation2 + $0x159] sm:$0xff] %v6088_v61  ;;  %v5649_v2 = vld [vmem:[%s7731_s1 + $0x1a8] sm:$0xff]  }
  0x3c   : > { %1356 = vmatmul.mubr.bf16.gmra.mxu0 %v5937_v63  ;;  %v5650_v3 = vld [vmem:[%s7731_s1 + $0x1e0] sm:$0xff]   ;;  %v6116_v14 = vpack.c.bf16 %v448_v0, %v447_v62  ;;  %v255_v17 = vld [vmem:[%s5887_s29 + $0xe8] sm:$0xff]  ;;  %v399_v10 = vld [vmem:[#allocation2 + $0x92] sm:$0xff] }
  0x3d   : > { %1363 = vmatprep.mubr.bf16.mxu0 %v5951_v7  ;;  %4782 = vmatpush3.bf16.msra.mxu0 %v5639_v22  ;;  %v5651_v4 = vld [vmem:[%s7731_s1 + $0x1a0] sm:$0xff]   ;;  %288 = vst [vmem:[#allocation2 + $0x171] sm:$0xff] %v255_v17  ;;  %v5654_v30 = vld [vmem:[%s7731_s1 + $0x1d8] sm:$0xff]   ;;  %v5656_v33 = vld [vmem:[%s7731_s1 + $0x1d0] sm:$0xff]  }
  0x3e   : > { %4783 = vmatprep.subr.bf16.mxu0 %v5640_v27  ;;  %4888 = vmatpush3.bf16.msra.mxu1 %v5647_v56  ;;  %v5652_v12 = vld [vmem:[%s7731_s1 + $0x140] sm:$0xff]   ;;  %v450_v27 = vld [vmem:[#allocation2 + $0xc8] sm:$0xff]  ;;  %v5655_v32 = vld [vmem:[%s7731_s1 + $0x198] sm:$0xff]  }
  0x3f   : > { %4889 = vmatprep.subr.bf16.mxu1 %v5648_v1  ;;  %v254_v15 = vld [vmem:[%s5887_s29 + $0xe0] sm:$0xff]  ;;  %v5657_v47 = vld [vmem:[%s7731_s1 + $0x190] sm:$0xff]   ;;  %v451_v49 = vld [vmem:[#allocation2 + $0xd8] sm:$0xff] }
  0x40   : > { %287 = vst [vmem:[#allocation2 + $0x169] sm:$0xff] %v254_v15  ;;  %v5653_v20 = vld [vmem:[%s7731_s1 + $0x100] sm:$0xff]   ;;  %v6123_v21 = vpack.c.bf16 %v255_v17, %v254_v15  ;;  %v402_v48 = vld [vmem:[#allocation2 + $0xb2] sm:$0xff]  ;;  %v5659_v51 = vld [vmem:[%s7731_s1 + $0x188] sm:$0xff]  }
  0x41   : > { %4784 = vmatpush3.bf16.msra.mxu0 %v5641_v35  ;;  %v400_v11 = vld [vmem:[#allocation2 + $0x9a] sm:$0xff]  ;;  %v6142_v35 = vpack.c.bf16 %v5974_v16, %v5970_v13  ;;  %v5658_v13 = vld [vmem:[%s7731_s1 + $0x1c8] sm:$0xff]   ;;  %v453_v18 = vld [vmem:[#allocation2 + $0xf0] sm:$0xff] }
  0x42   : > { %1517 = vmatmul.mubr.bf16.gmra.mxu1 %v6001_v25  ;;  %4785 = vmatprep.subr.bf16.mxu0 %v5642_v42  ;;  %v449_v22 = vld [vmem:[#allocation2 + $0xc0] sm:$0xff]  ;;  %v6138_v34 = vpack.c.bf16 %v400_v11, %v399_v10  ;;  %v6145_v42 = vld [vmem:[%s5887_s29 + $0xf0] sm:$0xff]  ;;  %v6173_v56 = vld [vmem:[%s7731_s1 + $0x238] sm:$0xff]  }
  0x43   : > { %1524 = vmatprep.mubr.bf16.mxu1 %v6012_v28  ;;  %4890 = vmatpush3.bf16.msra.mxu1 %v5649_v2  ;;  %v6150_v46 = vpack.c.bf16 %v450_v27, %v449_v22  ;;  %289 = vst [vmem:[#allocation2 + $0x181] sm:$0xff] %v6145_v42  ;;  %v401_v16 = vld [vmem:[#allocation2 + $0xaa] sm:$0xff]  ;;  %v452_v50 = vld [vmem:[#allocation2 + $0xe0] sm:$0xff]  ;;  %v454_v19 = vld [vmem:[#allocation2 + $0xf8] sm:$0xff] }
  0x44   : > { %1364 = vmatmul.mubr.bf16.gmra.mxu0 %v5956_v9  ;;  %4891 = vmatprep.subr.bf16.mxu1 %v5650_v3  ;;  %v5660_v52 = vld [vmem:[%s7731_s1 + $0x1c0] sm:$0xff]   ;;  %v6175_v59 = vpack.c.bf16 %v402_v48, %v401_v16  ;;  %v6182_v62 = vpack.c.bf16 %v452_v50, %v451_v49  ;;  %v404_v2 = vld [vmem:[#allocation2 + $0xca] sm:$0xff]  ;;  %v407_v22 = vld [vmem:[#allocation2 + $0xf2] sm:$0xff] }
  0x45   : > { %1371 = vmatprep.mubr.bf16.mxu0 %v6005_v26  ;;  %4786 = vmatpush3.bf16.msra.mxu0 %v5643_v45  ;;  %v6148_v45 = vld [vmem:[%s5887_s29 + $0xf8] sm:$0xff]  ;;  %v5661_v0 = vld [vmem:[%s7731_s1 + $0x180] sm:$0xff]   ;;  %v456_v10 = vld [vmem:[#allocation2 + $0x110] sm:$0xff] }
  0x46   : > { %4787 = vmatprep.subr.bf16.mxu0 %v5652_v12  ;;  %290 = vst [vmem:[#allocation2 + $0x189] sm:$0xff] %v6148_v45  ;;  %v403_v1 = vld [vmem:[#allocation2 + $0xc2] sm:$0xff]  ;;  %v6197_v12 = vpack.c.bf16 %v454_v19, %v453_v18  ;;  %v405_v15 = vld [vmem:[#allocation2 + $0xda] sm:$0xff] }
  0x47   : > { %4892 = vmatpush3.bf16.msra.mxu1 %v5651_v4  ;;  %v6191_v3 = vpack.c.bf16 %v404_v2, %v403_v1  ;;  %v6195_v4 = vpack.c.bf16 %v5999_v24, %v5996_v23  ;;  %v406_v17 = vld [vmem:[#allocation2 + $0xe2] sm:$0xff]  ;;  %v6207_v23 = vpack.c.bf16 %v6022_v31, %v6015_v29  ;;  %v408_v27 = vld [vmem:[#allocation2 + $0xfa] sm:$0xff]  ;;  %v6219_v29 = vpack.c.bf16 %v6040_v39, %v6030_v36 }
  0x48   : > { %4893 = vmatprep.subr.bf16.mxu1 %v5654_v30  ;;  %v6203_v11 = vpack.c.bf16 %v406_v17, %v405_v15  ;;  %v457_v30 = vld [vmem:[#allocation2 + $0x120] sm:$0xff]  ;;  %v459_v16 = vld [vmem:[#allocation2 + $0x138] sm:$0xff]  ;;  %v6231_v36 = vpack.c.bf16 %v6052_v44, %v6049_v43  ;;  %v6243_v43 = vpack.c.bf16 %v6088_v61, %v6084_v57  ;;  %v463_v19 = vld [vmem:[#allocation2 + $0x168] sm:$0xff] }
  0x49   : > { %4788 = vmatpush3.bf16.msra.mxu0 %v5653_v20  ;;  %v455_v20 = vld [vmem:[#allocation2 + $0x108] sm:$0xff]  ;;  %v460_v48 = vld [vmem:[#allocation2 + $0x140] sm:$0xff]  ;;  %v464_v15 = vld [vmem:[#allocation2 + $0x170] sm:$0xff] }
  0x4a   : > { %1525 = vmatmul.mubr.bf16.gmra.mxu1 %v6033_v37  ;;  %5493 = vmatprep.subr.bf16.mxu0 %v6173_v56  ;;  %v6209_v24 = vpack.c.bf16 %v456_v10, %v455_v20  ;;  %v6233_v39 = vpack.c.bf16 %v460_v48, %v459_v16  ;;  %v411_v50 = vld [vmem:[#allocation2 + $0x122] sm:$0xff]  ;;  %v413_v2 = vld [vmem:[#allocation2 + $0x13a] sm:$0xff]  ;;  %v6253_v20 = vpack.c.bf16 %v464_v15, %v463_v19  ;;  %v415_v57 = vld [vmem:[#allocation2 + $0x152] sm:$0xff] }
  0x4b   : > { %1532 = vmatprep.mubr.bf16.mxu1 %v6042_v40  ;;  %4894 = vmatpush3.bf16.msra.mxu1 %v5655_v32  ;;  %v458_v32 = vld [vmem:[#allocation2 + $0x128] sm:$0xff]  ;;  %v416_v61 = vld [vmem:[#allocation2 + $0x15a] sm:$0xff]  ;;  %v5663_v48 = vld [vmem:[%s7731_s1 + $0x230] sm:$0xff]  }
  0x4c   : > { %1372 = vmatmul.mubr.bf16.gmra.mxu0 %v6012_v28  ;;  %4895 = vmatprep.subr.bf16.mxu1 %v5656_v33  ;;  %v6215_v33 = vpack.c.bf16 %v408_v27, %v407_v22  ;;  %v6221_v31 = vpack.c.bf16 %v458_v32, %v457_v30  ;;  %v414_v18 = vld [vmem:[#allocation2 + $0x142] sm:$0xff]  ;;  %v6259_v27 = vpack.c.bf16 %v416_v61, %v415_v57 }
  0x4d   : > { %1379 = vmatprep.mubr.bf16.mxu0 %v6037_v38  ;;  %v6251_v17 = vpack.c.bf16 %v414_v18, %v413_v2  ;;  %v465_v10 = vld [vmem:[#allocation2 + $0x180] sm:$0xff]  ;;  %v466_v22 = vld [vmem:[#allocation2 + $0x188] sm:$0xff]  ;;  %v6265_v32 = vpack.c.bf16 %v6148_v45, %v6145_v42 }
  0x4e   : > { %v6261_v30 = vpack.c.bf16 %v466_v22, %v465_v10  ;;  %v5665_v42 = vld [vmem:[%s7731_s1 + $0x220] sm:$0xff]   ;;  %v5671_v10 = vld [vmem:[%s7731_s1 + $0x278] sm:$0xff]  }
  0x4f   : > { %4896 = vmatpush3.bf16.msra.mxu1 %v5657_v47  ;;  %v409_v47 = vld [vmem:[#allocation2 + $0x10a] sm:$0xff] }
  0x50   : > { %4897 = vmatprep.subr.bf16.mxu1 %v5658_v13  ;;  %v410_v13 = vld [vmem:[#allocation2 + $0x112] sm:$0xff] }
  0x51   : > { %v6227_v49 = vpack.c.bf16 %v410_v13, %v409_v47  ;;  %v417_v47 = vld [vmem:[#allocation2 + $0x16a] sm:$0xff]  ;;  %v418_v13 = vld [vmem:[#allocation2 + $0x172] sm:$0xff] }
  0x52   : > { %1533 = vmatmul.mubr.bf16.gmra.mxu1 %v6072_v53  ;;  %v6271_v16 = vpack.c.bf16 %v418_v13, %v417_v47 }
  0x53   : > { %1540 = vmatprep.mubr.bf16.mxu1 %v6078_v55  ;;  %4898 = vmatpush3.bf16.msra.mxu1 %v5659_v51  ;;  %v412_v51 = vld [vmem:[#allocation2 + $0x12a] sm:$0xff] }
  0x54   : > { %1380 = vmatmul.mubr.bf16.gmra.mxu0 %v6042_v40  ;;  %4899 = vmatprep.subr.bf16.mxu1 %v5660_v52  ;;  %v461_v52 = vld [vmem:[#allocation2 + $0x150] sm:$0xff]  ;;  %v6239_v1 = vpack.c.bf16 %v412_v51, %v411_v50 }
  0x55   : > { %1387 = vmatprep.mubr.bf16.mxu0 %v6076_v54 }
  0x57   : > { %4900 = vmatpush3.bf16.msra.mxu1 %v5661_v0  ;;  %v462_v0 = vld [vmem:[#allocation2 + $0x158] sm:$0xff] }
  0x58   : > { %v6245_v44 = vpack.c.bf16 %v462_v0, %v461_v52 }
  0x5a   : > { %1541 = vmatmul.mubr.bf16.gmra.mxu1 %v6107_v5 }
  0x5b   : > { %1548 = vmatprep.mubr.bf16.mxu1 %v6116_v14 }
  0x5c   : > { %1388 = vmatmul.mubr.bf16.gmra.mxu0 %v6078_v55 }
  0x5d   : > { %1395 = vmatprep.mubr.bf16.mxu0 %v6111_v8 }
  0x62   : > { %1549 = vmatmul.mubr.bf16.gmra.mxu1 %v6138_v34 }
  0x63   : > { %1556 = vmatprep.mubr.bf16.mxu1 %v6150_v46 }
  0x64   : > { %1396 = vmatmul.mubr.bf16.gmra.mxu0 %v6116_v14 }
  0x65   : > { %1403 = vmatprep.mubr.bf16.mxu0 %v6142_v35 }
  0x6a   : > { %1557 = vmatmul.mubr.bf16.gmra.mxu1 %v6175_v59 }
  0x6b   : > { %1564 = vmatprep.mubr.bf16.mxu1 %v6182_v62 }
  0x6c   : > { %1404 = vmatmul.mubr.bf16.gmra.mxu0 %v6150_v46 }
  0x6d   : > { %1411 = vmatprep.mubr.bf16.mxu0 %v6179_v60 }
  0x72   : > { %1565 = vmatmul.mubr.bf16.gmra.mxu1 %v6191_v3 }
  0x73   : > { %1572 = vmatprep.mubr.bf16.mxu1 %v6197_v12 }
  0x74   : > { %1412 = vmatmul.mubr.bf16.gmra.mxu0 %v6182_v62 }
  0x75   : > { %1419 = vmatprep.mubr.bf16.mxu0 %v6195_v4 }
  0x7a   : > { %1573 = vmatmul.mubr.bf16.gmra.mxu1 %v6203_v11 }
  0x7b   : > { %1580 = vmatprep.mubr.bf16.mxu1 %v6209_v24 }
  0x7c   : > { %1420 = vmatmul.mubr.bf16.gmra.mxu0 %v6197_v12 }
  0x7d   : > { %1427 = vmatprep.mubr.bf16.mxu0 %v6207_v23 }
  0x82   : > { %1581 = vmatmul.mubr.bf16.gmra.mxu1 %v6215_v33 }
  0x83   : > { %1588 = vmatprep.mubr.bf16.mxu1 %v6221_v31 }
  0x84   : > { %1428 = vmatmul.mubr.bf16.gmra.mxu0 %v6209_v24 }
  0x85   : > { %1435 = vmatprep.mubr.bf16.mxu0 %v6219_v29 }
  0x8a   : > { %1589 = vmatmul.mubr.bf16.gmra.mxu1 %v6227_v49 }
  0x8b   : > { %1596 = vmatprep.mubr.bf16.mxu1 %v6233_v39 }
  0x8c   : > { %1436 = vmatmul.mubr.bf16.gmra.mxu0 %v6221_v31 }
  0x8d   : > { %1443 = vmatprep.mubr.bf16.mxu0 %v6231_v36 }
  0x92   : > { %1597 = vmatmul.mubr.bf16.gmra.mxu1 %v6239_v1 }
  0x93   : > { %1604 = vmatprep.mubr.bf16.mxu1 %v6245_v44 }
  0x94   : > { %1444 = vmatmul.mubr.bf16.gmra.mxu0 %v6233_v39 }
  0x95   : > { %1451 = vmatprep.mubr.bf16.mxu0 %v6243_v43 }
  0x9a   : > { %1605 = vmatmul.mubr.bf16.gmra.mxu1 %v6251_v17 }
  0x9b   : > { %1612 = vmatprep.mubr.bf16.mxu1 %v6253_v20 }
  0x9c   : > { %1452 = vmatmul.mubr.bf16.gmra.mxu0 %v6245_v44 }
  0x9d   : > { %1459 = vmatprep.mubr.bf16.mxu0 %v6123_v21 }
  0xa2   : > { %1613 = vmatmul.mubr.bf16.gmra.mxu1 %v6259_v27 }
  0xa3   : > { %1620 = vmatprep.mubr.bf16.mxu1 %v6261_v30 }
  0xa4   : > { %1460 = vmatmul.mubr.bf16.gmra.mxu0 %v6253_v20 }
  0xa5   : > { %1661 = vmatprep.mubr.bf16.mxu0 %v5949_v6  ;;  %v5664_v6 = vld [vmem:[%s7731_s1 + $0x228] sm:$0xff]  }
  0xaa   : > { %1621 = vmatmul.mubr.bf16.gmra.mxu1 %v6271_v16 }
  0xab   : > { %1822 = vmatprep.mubr.bf16.mxu1 %v5930_v58 }
  0xac   : > { %1662 = vmatmul.mubr.bf16.vlgmr.msra.gmra.mxu0 %v5900_v41  ;;  %v5666_v41 = vld [vmem:[%s7731_s1 + $0x218] sm:$0xff]  }
  0xad   : > { %5494 = vmatpush3.bf16.msra.mxu0 %v6173_v56  ;;  %1669 = vmatprep.mubr.bf16.mxu0 %v6001_v25  ;;  %v5667_v25 = vld [vmem:[%s7731_s1 + $0x210] sm:$0xff]  }
  0xae   : > { %5495 = vmatprep.subr.bf16.mxu0 %v5663_v48 }
  0xb1   : > { %5496 = vmatpush3.bf16.msra.mxu0 %v5663_v48 }
  0xb2   : > { %5497 = vmatprep.subr.bf16.mxu0 %v5664_v6  ;;  %1823 = vmatmul.mubr.bf16.vlgmr.msra.gmra.mxu1 %v5937_v63  ;;  %v5669_v63 = vld [vmem:[%s7731_s1 + $0x200] sm:$0xff]  }
  0xb3   : > { %1830 = vmatprep.mubr.bf16.mxu1 %v5951_v7 }
  0xb4   : > { %1670 = vmatmul.mubr.bf16.gmra.mxu0 %v5930_v58  ;;  %v5668_v58 = vld [vmem:[%s7731_s1 + $0x208] sm:$0xff]  }
  0xb5   : > { %1677 = vmatprep.mubr.bf16.mxu0 %v6033_v37  ;;  %5498 = vmatpush3.bf16.msra.mxu0 %v5664_v6 }
  0xb6   : > { %5499 = vmatprep.subr.bf16.mxu0 %v5665_v42 }
  0xb9   : > { %5500 = vmatpush3.bf16.msra.mxu0 %v5665_v42 }
  0xba   : > { %5501 = vmatprep.subr.bf16.mxu0 %v5666_v41  ;;  %1831 = vmatmul.mubr.bf16.gmra.mxu1 %v5956_v9 }
  0xbb   : > { %1838 = vmatprep.mubr.bf16.mxu1 %v6005_v26 }
  0xbc   : > { %1678 = vmatmul.mubr.bf16.gmra.mxu0 %v5951_v7 }
  0xbd   : > { %1685 = vmatprep.mubr.bf16.mxu0 %v6072_v53  ;;  %5502 = vmatpush3.bf16.msra.mxu0 %v5666_v41 }
  0xbe   : > { %5503 = vmatprep.subr.bf16.mxu0 %v5667_v25 }
  0xc1   : > { %5504 = vmatpush3.bf16.msra.mxu0 %v5667_v25 }
  0xc2   : > { %5505 = vmatprep.subr.bf16.mxu0 %v5668_v58  ;;  %1839 = vmatmul.mubr.bf16.gmra.mxu1 %v6012_v28 }
  0xc3   : > { %1846 = vmatprep.mubr.bf16.mxu1 %v6037_v38 }
  0xc4   : > { %1686 = vmatmul.mubr.bf16.gmra.mxu0 %v6005_v26 }
  0xc5   : > { %1693 = vmatprep.mubr.bf16.mxu0 %v6107_v5  ;;  %5506 = vmatpush3.bf16.msra.mxu0 %v5668_v58 }
  0xc6   : > { %5507 = vmatprep.subr.bf16.mxu0 %v5669_v63 }
  0xc9   : > { %5508 = vmatpush3.bf16.msra.mxu0 %v5669_v63 }
  0xca   : > { %1847 = vmatmul.mubr.bf16.gmra.mxu1 %v6042_v40  ;;  %v6334_v40 = vld [vmem:[%s7732_s2] ss:$0 sm:$0xff] }
  0xcb   : > { %1854 = vmatprep.mubr.bf16.mxu1 %v6076_v54 }
  0xcc   : > { %1694 = vmatmul.mubr.bf16.gmra.mxu0 %v6037_v38 }
  0xcd   : > { %1701 = vmatprep.mubr.bf16.mxu0 %v6138_v34 }
  0xd2   : > { %1855 = vmatmul.mubr.bf16.gmra.mxu1 %v6078_v55 }
  0xd3   : > { %1862 = vmatprep.mubr.bf16.mxu1 %v6111_v8 }
  0xd4   : > { %1702 = vmatmul.mubr.bf16.gmra.mxu0 %v6076_v54 }
  0xd5   : > { %1709 = vmatprep.mubr.bf16.mxu0 %v6175_v59 }
  0xda   : > { %1863 = vmatmul.mubr.bf16.gmra.mxu1 %v6116_v14 }
  0xdb   : > { %1870 = vmatprep.mubr.bf16.mxu1 %v6142_v35 }
  0xdc   : > { %1710 = vmatmul.mubr.bf16.gmra.mxu0 %v6111_v8 }
  0xdd   : > { %1717 = vmatprep.mubr.bf16.mxu0 %v6191_v3 }
  0xe2   : > { %1871 = vmatmul.mubr.bf16.gmra.mxu1 %v6150_v46 }
  0xe3   : > { %1878 = vmatprep.mubr.bf16.mxu1 %v6179_v60 }
  0xe4   : > { %1718 = vmatmul.mubr.bf16.gmra.mxu0 %v6142_v35 }
  0xe5   : > { %1725 = vmatprep.mubr.bf16.mxu0 %v6203_v11 }
  0xea   : > { %1879 = vmatmul.mubr.bf16.gmra.mxu1 %v6182_v62 }
  0xeb   : > { %1886 = vmatprep.mubr.bf16.mxu1 %v6195_v4 }
  0xec   : > { %v4565_v7 = vpop.f32.mrf.mxu0  ;;  %1726 = vmatmul.mubr.bf16.gmra.mxu0 %v6179_v60 }
  0xed   : > { %1733 = vmatprep.mubr.bf16.mxu0 %v6215_v33 }
  0xee   : > { %v4566_v9 = vpop.f32.mrf.mxu0 }
  0xef   : > { %v4567_v26 = vadd.f32 %v4566_v9, %v4565_v7 }
  0xf0   : > { %v4568_v28 = vpop.f32.mrf.mxu0 }
  0xf1   : > { %v1342_v55 = vadd.f32 %v4567_v26, %v6334_v40 }
  0xf2   : > { %v4569_v37 = vpop.f32.mrf.mxu0  ;;  %v4677_v54 = vpop.f32.mrf.mxu1  ;;  %1887 = vmatmul.mubr.bf16.gmra.mxu1 %v6197_v12 }
  0xf3   : > { %v4570_v38 = vadd.f32 %v4569_v37, %v4568_v28  ;;  %1894 = vmatprep.mubr.bf16.mxu1 %v6207_v23 }
  0xf4   : > { %v4571_v53 = vpop.f32.mrf.mxu0  ;;  %1734 = vmatmul.mubr.bf16.gmra.mxu0 %v6195_v4  ;;  %v4678_v8 = vpop.f32.mrf.mxu1 }
  0xf5   : > { %1741 = vmatprep.mubr.bf16.mxu0 %v6227_v49  ;;  %v4679_v34 = vadd.f32 %v4678_v8, %v4677_v54  ;;  %v1345_v56 = vadd.f32 %v4570_v38, %v6334_v40 }
  0xf6   : > { %v4572_v5 = vpop.f32.mrf.mxu0  ;;  %v4680_v45 = vpop.f32.mrf.mxu1 }
  0xf7   : > { %v4573_v14 = vadd.f32 %v4572_v5, %v4571_v53  ;;  %v6341_v46 = vadd.f32 %v4679_v34, %v1342_v55 }
  0xf8   : > { %v4574_v35 = vpop.f32.mrf.mxu0  ;;  %v4681_v60 = vpop.f32.mrf.mxu1 }
  0xf9   : > { %v4682_v3 = vadd.f32 %v4681_v60, %v4680_v45  ;;  %v1350_v33 = vadd.f32 %v4573_v14, %v6334_v40  ;;  %v5673_v60 = vld [vmem:[%s7731_s1 + $0x270] sm:$0xff]  }
  0xfa   : > { %v4575_v59 = vpop.f32.mrf.mxu0  ;;  %v4683_v12 = vpop.f32.mrf.mxu1  ;;  %1895 = vmatmul.mubr.bf16.gmra.mxu1 %v6209_v24 }
  0xfb   : > { %v4576_v62 = vadd.f32 %v4575_v59, %v4574_v35  ;;  %v6347_v11 = vadd.f32 %v4682_v3, %v1345_v56  ;;  %1902 = vmatprep.mubr.bf16.mxu1 %v6219_v29 }
  0xfc   : > { %v4577_v4 = vpop.f32.mrf.mxu0  ;;  %1742 = vmatmul.mubr.bf16.gmra.mxu0 %v6207_v23  ;;  %v4684_v50 = vpop.f32.mrf.mxu1  ;;  %v5670_v23 = vld [vmem:[%s7731_s1 + $0x2b8] sm:$0xff]  }
  0xfd   : > { %1749 = vmatprep.mubr.bf16.mxu0 %v6239_v1  ;;  %v4685_v52 = vadd.f32 %v4684_v50, %v4683_v12  ;;  %v1353_v24 = vadd.f32 %v4576_v62, %v6334_v40  ;;  %5021 = vmatprep.subr.bf16.mxu1 %v5670_v23 }
  0xfe   : > { %v4578_v49 = vpop.f32.mrf.mxu0  ;;  %v4686_v2 = vpop.f32.mrf.mxu1  ;;  %5022 = vmatpush3.bf16.msra.mxu1 %v5671_v10 }
  0xff   : > { %v4579_v51 = vadd.f32 %v4578_v49, %v4577_v4  ;;  %v6354_v18 = vadd.f32 %v4685_v52, %v1350_v33  ;;  %v561_v33 = vld [vmem:[#allocation2 + $0x182] sm:$0xff]  ;;  %v562_v49 = vld [vmem:[#allocation2 + $0x18a] sm:$0xff] }
 0x100   : > { %v4580_v0 = vpop.f32.mrf.mxu0  ;;  %v4687_v19 = vpop.f32.mrf.mxu1 }
 0x101   : > { %v4688_v57 = vadd.f32 %v4687_v19, %v4686_v2  ;;  %v1358_v13 = vadd.f32 %v4579_v51, %v6334_v40  ;;  %v6393_v2 = vpack.c.bf16 %v562_v49, %v561_v33 }
 0x102   : > { %v4581_v1 = vpop.f32.mrf.mxu0  ;;  %v4689_v22 = vpop.f32.mrf.mxu1  ;;  %1903 = vmatmul.mubr.bf16.gmra.mxu1 %v6221_v31 }
 0x103   : > { %v4582_v15 = vadd.f32 %v4581_v1, %v4580_v0  ;;  %v6363_v47 = vadd.f32 %v4688_v57, %v1353_v24  ;;  %1910 = vmatprep.mubr.bf16.mxu1 %v6231_v36 }
 0x104   : > { %v4583_v61 = vpop.f32.mrf.mxu0  ;;  %1750 = vmatmul.mubr.bf16.gmra.mxu0 %v6219_v29  ;;  %v4690_v6 = vpop.f32.mrf.mxu1 }
 0x105   : > { %1757 = vmatprep.mubr.bf16.mxu0 %v6251_v17  ;;  %v4691_v29 = vadd.f32 %v4690_v6, %v4689_v22  ;;  %v1361_v63 = vadd.f32 %v4582_v15, %v6334_v40 }
 0x106   : > { %v4584_v48 = vpop.f32.mrf.mxu0  ;;  %v4692_v25 = vpop.f32.mrf.mxu1 }
 0x107   : > { %v4585_v42 = vadd.f32 %v4584_v48, %v4583_v61  ;;  %v6367_v58 = vadd.f32 %v4691_v29, %v1358_v13  ;;  %v676_v13 = vld [vmem:[#allocation2 + $0x32] sm:$0xff]  ;;  %v677_v48 = vld [vmem:[#allocation2 + $0x3a] sm:$0xff] }
 0x108   : > { %v4586_v41 = vpop.f32.mrf.mxu0  ;;  %v4693_v7 = vpop.f32.mrf.mxu1  ;;  %v658_v29 = vld [vmem:[#allocation2 + $0x199] sm:$0xff] }
 0x109   : > { %v4694_v9 = vadd.f32 %v4693_v7, %v4692_v25  ;;  %v1366_v38 = vadd.f32 %v4585_v42, %v6334_v40 }
 0x10a   : > { %v4587_v31 = vpop.f32.mrf.mxu0  ;;  %v4695_v28 = vpop.f32.mrf.mxu1  ;;  %1911 = vmatmul.mubr.bf16.gmra.mxu1 %v6233_v39 }
 0x10b   : > { %v4588_v17 = vadd.f32 %v4587_v31, %v4586_v41  ;;  %v6373_v37 = vadd.f32 %v4694_v9, %v1361_v63  ;;  %1918 = vmatprep.mubr.bf16.mxu1 %v6243_v43  ;;  %v659_v41 = vld [vmem:[#allocation2 + $0x1a1] sm:$0xff]  ;;  %v708_v31 = vpack.c.bf16 %v677_v48, %v676_v13 }
 0x10c   : > { %v4589_v26 = vpop.f32.mrf.mxu0  ;;  %1758 = vmatmul.mubr.bf16.gmra.mxu0 %v6231_v36  ;;  %v4696_v54 = vpop.f32.mrf.mxu1  ;;  %v5672_v36 = vld [vmem:[%s7731_s1 + $0x2b0] sm:$0xff]  }
 0x10d   : > { %1765 = vmatprep.mubr.bf16.mxu0 %v6259_v27  ;;  %v4697_v5 = vadd.f32 %v4696_v54, %v4695_v28  ;;  %v1369_v39 = vadd.f32 %v4588_v17, %v6334_v40  ;;  %5023 = vmatprep.subr.bf16.mxu1 %v5672_v36 }
 0x10e   : > { %v4590_v53 = vpop.f32.mrf.mxu0  ;;  %v4698_v14 = vpop.f32.mrf.mxu1  ;;  %5024 = vmatpush3.bf16.msra.mxu1 %v5673_v60 }
 0x10f   : > { %v4591_v55 = vadd.f32 %v4590_v53, %v4589_v26  ;;  %v6380_v34 = vadd.f32 %v4697_v5, %v1366_v38  ;;  %v675_v26 = vpack.c.bf16 %v659_v41, %v658_v29 }
 0x110   : > { %v4592_v8 = vpop.f32.mrf.mxu0  ;;  %v4699_v35 = vpop.f32.mrf.mxu1 }
 0x111   : > { %v4700_v56 = vadd.f32 %v4699_v35, %v4698_v14  ;;  %v1374_v4 = vadd.f32 %v4591_v55, %v6334_v40  ;;  %v5675_v55 = vld [vmem:[%s7731_s1 + $0x268] sm:$0xff]   ;;  %v679_v14 = vld [vmem:[#allocation2 + $0x52] sm:$0xff] }
 0x112   : > { %v4593_v27 = vpop.f32.mrf.mxu0  ;;  %v4701_v62 = vpop.f32.mrf.mxu1  ;;  %1919 = vmatmul.mubr.bf16.gmra.mxu1 %v6245_v44  ;;  %v680_v35 = vld [vmem:[#allocation2 + $0x62] sm:$0xff] }
 0x113   : > { %v4594_v45 = vadd.f32 %v4593_v27, %v4592_v8  ;;  %v6389_v3 = vadd.f32 %v4700_v56, %v1369_v39  ;;  %1926 = vmatprep.mubr.bf16.mxu1 %v6123_v21  ;;  %v678_v8 = vld [vmem:[#allocation2 + $0x4a] sm:$0xff] }
 0x114   : > { %v4595_v59 = vpop.f32.mrf.mxu0  ;;  %1766 = vmatmul.mubr.bf16.gmra.mxu0 %v6243_v43  ;;  %v4702_v43 = vpop.f32.mrf.mxu1 }
 0x115   : > { %1773 = vmatprep.mubr.bf16.mxu0 %v6271_v16  ;;  %v4703_v51 = vadd.f32 %v4702_v43, %v4701_v62  ;;  %v1377_v16 = vadd.f32 %v4594_v45, %v6334_v40  ;;  %v681_v45 = vld [vmem:[#allocation2 + $0x6a] sm:$0xff]  ;;  %v709_v62 = vpack.c.bf16 %v679_v14, %v678_v8 }
 0x116   : > { %v4596_v12 = vpop.f32.mrf.mxu0  ;;  %v4704_v0 = vpop.f32.mrf.mxu1  ;;  %v710_v33 = vpack.c.bf16 %v681_v45, %v680_v35 }
 0x117   : > { %v4597_v50 = vadd.f32 %v4596_v12, %v4595_v59  ;;  %v6395_v44 = vadd.f32 %v4703_v51, %v1374_v4  ;;  %v5742_v12 = vld [vmem:[#allocation2] sm:$0xff] }
 0x118   : > { %v4598_v52 = vpop.f32.mrf.mxu0  ;;  %v4705_v24 = vpop.f32.mrf.mxu1 }
 0x119   : > { %v4706_v19 = vadd.f32 %v4705_v24, %v4704_v0  ;;  %v1382_v10 = vadd.f32 %v4597_v50, %v6334_v40  ;;  %v682_v24 = vld [vmem:[#allocation2 + $0x7a] sm:$0xff] }
 0x11a   : > { %v4599_v23 = vpop.f32.mrf.mxu0  ;;  %v4707_v57 = vpop.f32.mrf.mxu1  ;;  %1927 = vmatmul.mubr.bf16.gmra.mxu1 %v6253_v20  ;;  %v5674_v20 = vld [vmem:[%s7731_s1 + $0x2a8] sm:$0xff]  }
 0x11b   : > { %v4600_v1 = vadd.f32 %v4599_v23, %v4598_v52  ;;  %v6401_v61 = vadd.f32 %v4706_v19, %v1377_v16  ;;  %1934 = vmatprep.mubr.bf16.mxu1 %v6265_v32  ;;  %5025 = vmatprep.subr.bf16.mxu1 %v5674_v20 }
 0x11c   : > { %v4601_v15 = vpop.f32.mrf.mxu0  ;;  %1774 = vmatmul.mubr.bf16.gmra.mxu0 %v6123_v21  ;;  %v4708_v6 = vpop.f32.mrf.mxu1  ;;  %5026 = vmatpush3.bf16.msra.mxu1 %v5675_v55  ;;  %v687_v55 = vld [vmem:[#allocation2 + $0xb2] sm:$0xff] }
 0x11d   : > { %1781 = vmatprep.mubr.bf16.mxu0 %v6393_v2  ;;  %v4709_v25 = vadd.f32 %v4708_v6, %v4707_v57  ;;  %v1385_v17 = vadd.f32 %v4600_v1, %v6334_v40  ;;  %v683_v1 = vld [vmem:[#allocation2 + $0x82] sm:$0xff] }
 0x11e   : > { %v4602_v22 = vpop.f32.mrf.mxu0  ;;  %v4710_v63 = vpop.f32.mrf.mxu1  ;;  %v711_v29 = vpack.c.bf16 %v683_v1, %v682_v24 }
 0x11f   : > { %v4603_v42 = vadd.f32 %v4602_v22, %v4601_v15  ;;  %v6408_v7 = vadd.f32 %v4709_v25, %v1382_v10  ;;  %v684_v10 = vld [vmem:[#allocation2 + $0x92] sm:$0xff]  ;;  %v685_v22 = vld [vmem:[#allocation2 + $0x9a] sm:$0xff] }
 0x120   : > { %v4604_v21 = vpop.f32.mrf.mxu0  ;;  %v4711_v28 = vpop.f32.mrf.mxu1  ;;  %v712_v25 = vpack.c.bf16 %v685_v22, %v684_v10  ;;  %v693_v10 = vld [vmem:[#allocation2 + $0xfa] sm:$0xff] }
 0x121   : > { %v4712_v53 = vadd.f32 %v4711_v28, %v4710_v63  ;;  %v1390_v39 = vadd.f32 %v4603_v42, %v6334_v40 }
 0x122   : > { %v4605_v9 = vpop.f32.mrf.mxu0  ;;  %v4713_v5 = vpop.f32.mrf.mxu1  ;;  %1935 = vmatmul.mubr.bf16.gmra.mxu1 %v6261_v30  ;;  %v6419_v30 = vpack.c.bf16 %v5742_v12, %v5742_v12 }
 0x123   : > { %v4606_v38 = vadd.f32 %v4605_v9, %v4604_v21  ;;  %v6416_v36 = vadd.f32 %v4712_v53, %v1385_v17  ;;  %1942 = vmatprep.mubr.bf16.mxu1 %v675_v26  ;;  %v5676_v21 = vld [vmem:[%s7731_s1 + $0x2a0] sm:$0xff]  }
 0x124   : > { %v4607_v54 = vpop.f32.mrf.mxu0  ;;  %1782 = vmatmul.mubr.bf16.gmra.mxu0 %v6265_v32  ;;  %v4714_v32 = vpop.f32.mrf.mxu1  ;;  %5027 = vmatprep.subr.bf16.mxu1 %v5676_v21 }
 0x125   : > { %5509 = vmatprep.mubr.bf16.mxu0 %v708_v31  ;;  %v4715_v59 = vadd.f32 %v4714_v32, %v4713_v5  ;;  %v1393_v43 = vadd.f32 %v4606_v38, %v6334_v40  ;;  %v5677_v38 = vld [vmem:[%s7731_s1 + $0x260] sm:$0xff]  }
 0x126   : > { %v4608_v27 = vpop.f32.mrf.mxu0  ;;  %v4716_v4 = vpop.f32.mrf.mxu1  ;;  %5028 = vmatpush3.bf16.msra.mxu1 %v5677_v38  ;;  %v5679_v38 = vld [vmem:[%s7731_s1 + $0x258] sm:$0xff]  }
 0x127   : > { %v4609_v56 = vadd.f32 %v4608_v27, %v4607_v54  ;;  %v6421_v49 = vadd.f32 %v4715_v59, %v1390_v39  ;;  %v686_v54 = vld [vmem:[#allocation2 + $0xaa] sm:$0xff]  ;;  %v688_v39 = vld [vmem:[#allocation2 + $0xc2] sm:$0xff] }
 0x128   : > { %v4610_v60 = vpop.f32.mrf.mxu0  ;;  %v4717_v51 = vpop.f32.mrf.mxu1  ;;  %v689_v27 = vld [vmem:[#allocation2 + $0xca] sm:$0xff]  ;;  %v713_v59 = vpack.c.bf16 %v687_v55, %v686_v54  ;;  %v695_v55 = vld [vmem:[#allocation2 + $0x112] sm:$0xff] }
 0x129   : > { %v4718_v0 = vadd.f32 %v4717_v51, %v4716_v4  ;;  %v1398_v15 = vadd.f32 %v4609_v56, %v6334_v40  ;;  %v694_v54 = vld [vmem:[#allocation2 + $0x10a] sm:$0xff] }
 0x12a   : > { %v4611_v50 = vpop.f32.mrf.mxu0  ;;  %v4719_v23 = vpop.f32.mrf.mxu1  ;;  %1943 = vmatmul.mubr.bf16.gmra.mxu1 %v6419_v30 }
 0x12b   : > { %v4612_v52 = vadd.f32 %v4611_v50, %v4610_v60  ;;  %v6425_v19 = vadd.f32 %v4718_v0, %v1393_v43 }
 0x12c   : > { %v4613_v16 = vpop.f32.mrf.mxu0  ;;  %5510 = vmatmul.mubr.bf16.vlgmr.msra.gmra.mxu0 %v709_v62  ;;  %v4720_v13 = vpop.f32.mrf.mxu1  ;;  %v714_v62 = vpack.c.bf16 %v689_v27, %v688_v39  ;;  %v696_v27 = vld [vmem:[#allocation2 + $0x122] sm:$0xff] }
 0x12d   : > { %5513 = vmatprep.mubr.bf16.mxu0 %v710_v33  ;;  %v4721_v6 = vadd.f32 %v4720_v13, %v4719_v23  ;;  %v1401_v31 = vadd.f32 %v4612_v52, %v6334_v40  ;;  %v691_v23 = vld [vmem:[#allocation2 + $0xe2] sm:$0xff] }
 0x12e   : > { %v4614_v57 = vpop.f32.mrf.mxu0  ;;  %v4722_v41 = vpop.f32.mrf.mxu1 }
 0x12f   : > { %v4615_v48 = vadd.f32 %v4614_v57, %v4613_v16  ;;  %v6431_v63 = vadd.f32 %v4721_v6, %v1398_v15  ;;  %v690_v16 = vld [vmem:[#allocation2 + $0xda] sm:$0xff]  ;;  %v692_v57 = vld [vmem:[#allocation2 + $0xf2] sm:$0xff] }
 0x130   : > { %v4616_v42 = vpop.f32.mrf.mxu0  ;;  %v4723_v17 = vpop.f32.mrf.mxu1 }
 0x131   : > { %v4724_v26 = vadd.f32 %v4723_v17, %v4722_v41  ;;  %v1406_v8 = vadd.f32 %v4615_v48, %v6334_v40  ;;  %v716_v41 = vpack.c.bf16 %v693_v10, %v692_v57 }
 0x132   : > { %v4617_v20 = vpop.f32.mrf.mxu0  ;;  %v4725_v53 = vpop.f32.mrf.mxu1 }
 0x133   : > { %v4618_v9 = vadd.f32 %v4617_v20, %v4616_v42  ;;  %v6437_v5 = vadd.f32 %v4724_v26, %v1401_v31  ;;  %v715_v42 = vpack.c.bf16 %v691_v23, %v690_v16 }
 0x134   : > { %v4619_v28 = vpop.f32.mrf.mxu0  ;;  %5514 = vmatmul.mubr.bf16.gmra.mxu0 %v711_v29  ;;  %v4726_v35 = vpop.f32.mrf.mxu1 }
 0x135   : > { %5517 = vmatprep.mubr.bf16.mxu0 %v712_v25  ;;  %v4727_v32 = vadd.f32 %v4726_v35, %v4725_v53  ;;  %v1409_v12 = vadd.f32 %v4618_v9, %v6334_v40  ;;  %v5678_v25 = vld [vmem:[%s7731_s1 + $0x298] sm:$0xff]   ;;  %v697_v35 = vld [vmem:[#allocation2 + $0x12a] sm:$0xff] }
 0x136   : > { %v4620_v14 = vpop.f32.mrf.mxu0  ;;  %v4728_v60 = vpop.f32.mrf.mxu1  ;;  %5029 = vmatprep.subr.bf16.mxu1 %v5678_v25 }
 0x137   : > { %v4621_v45 = vadd.f32 %v4620_v14, %v4619_v28  ;;  %v6440_v4 = vadd.f32 %v4727_v32, %v1406_v8  ;;  %5030 = vmatpush3.bf16.msra.mxu1 %v5679_v38 }
 0x138   : > { %v4622_v56 = vpop.f32.mrf.mxu0  ;;  %v4729_v43 = vpop.f32.mrf.mxu1 }
 0x139   : > { %v4730_v51 = vadd.f32 %v4729_v43, %v4728_v60  ;;  %v1414_v1 = vadd.f32 %v4621_v45, %v6334_v40  ;;  %v717_v60 = vpack.c.bf16 %v695_v55, %v694_v54  ;;  %v5681_v55 = vld [vmem:[%s7731_s1 + $0x250] sm:$0xff]  }
 0x13a   : > { %v4623_v33 = vpop.f32.mrf.mxu0  ;;  %v4731_v0 = vpop.f32.mrf.mxu1 }
 0x13b   : > { %v4624_v50 = vadd.f32 %v4623_v33, %v4622_v56  ;;  %v6443_v24 = vadd.f32 %v4730_v51, %v1409_v12  ;;  %v718_v12 = vpack.c.bf16 %v697_v35, %v696_v27  ;;  %v703_v27 = vld [vmem:[#allocation2 + $0x172] sm:$0xff] }
 0x13c   : > { %v4625_v52 = vpop.f32.mrf.mxu0  ;;  %5518 = vmatmul.mubr.bf16.gmra.mxu0 %v713_v59  ;;  %v4732_v22 = vpop.f32.mrf.mxu1 }
 0x13d   : > { %5521 = vmatprep.mubr.bf16.mxu0 %v714_v62  ;;  %v4733_v48 = vadd.f32 %v4732_v22, %v4731_v0  ;;  %v1417_v31 = vadd.f32 %v4624_v50, %v6334_v40 }
 0x13e   : > { %v4626_v15 = vpop.f32.mrf.mxu0  ;;  %v4734_v29 = vpop.f32.mrf.mxu1 }
 0x13f   : > { %v4627_v13 = vadd.f32 %v4626_v15, %v4625_v52  ;;  %v6449_v21 = vadd.f32 %v4733_v48, %v1414_v1  ;;  %v698_v1 = vld [vmem:[#allocation2 + $0x13a] sm:$0xff]  ;;  %v699_v15 = vld [vmem:[#allocation2 + $0x142] sm:$0xff] }
 0x140   : > { %v4628_v6 = vpop.f32.mrf.mxu0  ;;  %v4735_v17 = vpop.f32.mrf.mxu1  ;;  %v701_v48 = vld [vmem:[#allocation2 + $0x15a] sm:$0xff]  ;;  %v719_v25 = vpack.c.bf16 %v699_v15, %v698_v1 }
 0x141   : > { %v4736_v26 = vadd.f32 %v4735_v17, %v4734_v29  ;;  %v1422_v14 = vadd.f32 %v4627_v13, %v6334_v40  ;;  %v700_v13 = vld [vmem:[#allocation2 + $0x152] sm:$0xff] }
 0x142   : > { %v4629_v20 = vpop.f32.mrf.mxu0  ;;  %v4737_v53 = vpop.f32.mrf.mxu1  ;;  %v5680_v17 = vld [vmem:[%s7731_s1 + $0x290] sm:$0xff]  }
 0x143   : > { %v4630_v9 = vadd.f32 %v4629_v20, %v4628_v6  ;;  %v6455_v8 = vadd.f32 %v4736_v26, %v1417_v31  ;;  %v720_v20 = vpack.c.bf16 %v701_v48, %v700_v13  ;;  %5031 = vmatprep.subr.bf16.mxu1 %v5680_v17 }
 0x144   : > { %v4631_v28 = vpop.f32.mrf.mxu0  ;;  %5522 = vmatmul.mubr.bf16.gmra.mxu0 %v715_v42  ;;  %v4738_v45 = vpop.f32.mrf.mxu1  ;;  %5032 = vmatpush3.bf16.msra.mxu1 %v5681_v55 }
 0x145   : > { %5525 = vmatprep.mubr.bf16.mxu0 %v716_v41  ;;  %v4739_v56 = vadd.f32 %v4738_v45, %v4737_v53  ;;  %v1425_v43 = vadd.f32 %v4630_v9, %v6334_v40 }
 0x146   : > { %v4632_v39 = vpop.f32.mrf.mxu0  ;;  %v4740_v62 = vpop.f32.mrf.mxu1 }
 0x147   : > { %v4633_v32 = vadd.f32 %v4632_v39, %v4631_v28  ;;  %v6458_v33 = vadd.f32 %v4739_v56, %v1422_v14  ;;  %v702_v39 = vld [vmem:[#allocation2 + $0x16a] sm:$0xff] }
 0x148   : > { %v4634_v59 = vpop.f32.mrf.mxu0  ;;  %v4741_v51 = vpop.f32.mrf.mxu1 }
 0x149   : > { %v4742_v0 = vadd.f32 %v4741_v51, %v4740_v62  ;;  %v1430_v10 = vadd.f32 %v4633_v32, %v6334_v40 }
 0x14a   : > { %v4635_v50 = vpop.f32.mrf.mxu0  ;;  %v4743_v23 = vpop.f32.mrf.mxu1 }
 0x14b   : > { %v4636_v52 = vadd.f32 %v4635_v50, %v4634_v59  ;;  %v6461_v57 = vadd.f32 %v4742_v0, %v1425_v43  ;;  %v721_v43 = vpack.c.bf16 %v703_v27, %v702_v39 }
 0x14c   : > { %v4637_v16 = vpop.f32.mrf.mxu0  ;;  %5526 = vmatmul.mubr.bf16.gmra.mxu0 %v717_v60  ;;  %v4744_v6 = vpop.f32.mrf.mxu1 }
 0x14d   : > { %5529 = vmatprep.mubr.bf16.mxu0 %v718_v12  ;;  %v4745_v29 = vadd.f32 %v4744_v6, %v4743_v23  ;;  %v1433_v26 = vadd.f32 %v4636_v52, %v6334_v40 }
 0x14e   : > { %v4638_v22 = vpop.f32.mrf.mxu0  ;;  %v4746_v31 = vpop.f32.mrf.mxu1 }
 0x14f   : > { %v4639_v42 = vadd.f32 %v4638_v22, %v4637_v16  ;;  %v6467_v9 = vadd.f32 %v4745_v29, %v1430_v10  ;;  %v706_v10 = vld [vmem:[#allocation2 + $0x19a] sm:$0xff]  ;;  %v707_v22 = vld [vmem:[#allocation2 + $0x1a2] sm:$0xff] }
 0x150   : > { %v4640_v41 = vpop.f32.mrf.mxu0  ;;  %v4747_v38 = vpop.f32.mrf.mxu1 }
 0x151   : > { %v4748_v53 = vadd.f32 %v4747_v38, %v4746_v31  ;;  %v1438_v45 = vadd.f32 %v4639_v42, %v6334_v40 }
 0x152   : > { %v4641_v28 = vpop.f32.mrf.mxu0  ;;  %v4749_v14 = vpop.f32.mrf.mxu1 }
 0x153   : > { %v6473_v35 = vadd.f32 %v4748_v53, %v1433_v26  ;;  %v4642_v32 = vadd.f32 %v4641_v28, %v4640_v41  ;;  %v5682_v26 = vld [vmem:[%s7731_s1 + $0x288] sm:$0xff]  }
 0x154   : > { %v4643_v54 = vpop.f32.mrf.mxu0  ;;  %5530 = vmatmul.mubr.bf16.gmra.mxu0 %v719_v25  ;;  %v4750_v59 = vpop.f32.mrf.mxu1  ;;  %5033 = vmatprep.subr.bf16.mxu1 %v5682_v26 }
 0x155   : > { %5533 = vmatprep.mubr.bf16.mxu0 %v720_v20  ;;  %v4751_v62 = vadd.f32 %v4750_v59, %v4749_v14  ;;  %v1441_v52 = vadd.f32 %v4642_v32, %v6334_v40  ;;  %v723_v20 = vpack.c.bf16 %v707_v22, %v706_v10  ;;  %v5683_v14 = vld [vmem:[%s7731_s1 + $0x248] sm:$0xff]   ;;  %v5686_v22 = vld [vmem:[%s7731_s1 + $0x330] sm:$0xff]  }
 0x156   : > { %v4644_v56 = vpop.f32.mrf.mxu0  ;;  %v4752_v50 = vpop.f32.mrf.mxu1  ;;  %5034 = vmatpush3.bf16.msra.mxu1 %v5683_v14 }
 0x157   : > { %v4645_v60 = vadd.f32 %v4644_v56, %v4643_v54  ;;  %v6476_v51 = vadd.f32 %v4751_v62, %v1438_v45 }
 0x158   : > { %v4646_v12 = vpop.f32.mrf.mxu0  ;;  %v4753_v16 = vpop.f32.mrf.mxu1 }
 0x159   : > { %v4754_v23 = vadd.f32 %v4753_v16, %v4752_v50  ;;  %v1446_v48 = vadd.f32 %v4645_v60, %v6334_v40 }
 0x15a   : > { %v4647_v0 = vpop.f32.mrf.mxu0  ;;  %v4755_v15 = vpop.f32.mrf.mxu1 }
 0x15b   : > { %v6480_v13 = vadd.f32 %v4754_v23, %v1441_v52  ;;  %v4648_v6 = vadd.f32 %v4647_v0, %v4646_v12  ;;  %v5685_v52 = vld [vmem:[%s7731_s1 + $0x2f8] sm:$0xff]  }
 0x15c   : > { %v4649_v1 = vpop.f32.mrf.mxu0  ;;  %5534 = vmatmul.mubr.bf16.gmra.mxu0 %v721_v43  ;;  %v4756_v29 = vpop.f32.mrf.mxu1  ;;  %v5684_v43 = vld [vmem:[%s7731_s1 + $0x338] sm:$0xff]  }
 0x15d   : > { %5537 = vmatprep.mubr.bf16.mxu0 %v6393_v2  ;;  %v4757_v25 = vadd.f32 %v4756_v29, %v4755_v15  ;;  %v1449_v2 = vadd.f32 %v4648_v6, %v6334_v40  ;;  %5133 = vmatprep.subr.bf16.mxu0 %v5684_v43  ;;  %v5687_v6 = vld [vmem:[%s7731_s1 + $0x2f0] sm:$0xff]  }
 0x15e   : > { %v4650_v42 = vpop.f32.mrf.mxu0  ;;  %v4758_v17 = vpop.f32.mrf.mxu1  ;;  %5134 = vmatpush3.bf16.msra.mxu0 %v5685_v52 }
 0x15f   : > { %v4651_v41 = vadd.f32 %v4650_v42, %v4649_v1  ;;  %v6486_v28 = vadd.f32 %v4757_v25, %v1446_v48  ;;  %5135 = vmatprep.subr.bf16.mxu0 %v5686_v22 }
 0x160   : > { %v4652_v31 = vpop.f32.mrf.mxu0  ;;  %v4759_v53 = vpop.f32.mrf.mxu1 }
 0x161   : > { %v4760_v54 = vadd.f32 %v4759_v53, %v4758_v17  ;;  %v1454_v45 = vadd.f32 %v4651_v41, %v6334_v40 }
 0x162   : > { %v4653_v38 = vpop.f32.mrf.mxu0  ;;  %v4761_v39 = vpop.f32.mrf.mxu1  ;;  %5136 = vmatpush3.bf16.msra.mxu0 %v5687_v6 }
 0x163   : > { %v6492_v27 = vadd.f32 %v4760_v54, %v1449_v2  ;;  %v4654_v32 = vadd.f32 %v4653_v38, %v4652_v31  ;;  %v5689_v2 = vld [vmem:[%s7731_s1 + $0x328] sm:$0xff]   ;;  %v5688_v54 = vld [vmem:[%s7731_s1 + $0x280] sm:$0xff]  }
 0x164   : > { %v4655_v55 = vpop.f32.mrf.mxu0  ;;  %5538 = vmatmul.mubr.bf16.gmra.mxu0 %v723_v20  ;;  %v4762_v59 = vpop.f32.mrf.mxu1  ;;  %5137 = vmatprep.subr.bf16.mxu0 %v5689_v2 }
 0x165   : > { %v4763_v62 = vadd.f32 %v4762_v59, %v4761_v39  ;;  %v1457_v16 = vadd.f32 %v4654_v32, %v6334_v40  ;;  %5035 = vmatprep.subr.bf16.mxu1 %v5688_v54 }
 0x166   : > { %v4656_v56 = vpop.f32.mrf.mxu0  ;;  %v4764_v50 = vpop.f32.mrf.mxu1 }
 0x167   : > { %v4657_v60 = vadd.f32 %v4656_v56, %v4655_v55  ;;  %v6501_v0 = vadd.f32 %v4763_v62, %v1454_v45  ;;  %v5691_v55 = vld [vmem:[%s7731_s1 + $0x2e8] sm:$0xff]   ;;  %v5692_v62 = vld [vmem:[%s7731_s1 + $0x320] sm:$0xff]  }
 0x168   : > { %v4658_v12 = vpop.f32.mrf.mxu0  ;;  %v4765_v1 = vpop.f32.mrf.mxu1  ;;  %5138 = vmatpush3.bf16.msra.mxu0 %v5691_v55 }
 0x169   : > { %v4766_v15 = vadd.f32 %v4765_v1, %v4764_v50  ;;  %v1462_v29 = vadd.f32 %v4657_v60, %v6334_v40  ;;  %v5690_v60 = vld [vmem:[%s7731_s1 + $0x240] sm:$0xff]   ;;  %5139 = vmatprep.subr.bf16.mxu0 %v5692_v62 }
 0x16a   : > { %v4659_v23 = vpop.f32.mrf.mxu0  ;;  %v4767_v48 = vpop.f32.mrf.mxu1  ;;  %5036 = vmatpush3.bf16.msra.mxu1 %v5690_v60  ;;  %v2288_v1 = vld [vmem:[#allocation2 + $0x1] sm:$0xff] }
 0x16b   : > { %v6510_v42 = vadd.f32 %v4766_v15, %v1457_v16  ;;  %v4660_v41 = vadd.f32 %v4659_v23, %v4658_v12  ;;  %v2289_v15 = vld [vmem:[#allocation2 + $0x9] sm:$0xff] }
 0x16c   : > { %v4789_v10 = vpop.f32.mrf.mxu0  ;;  %v4768_v31 = vpop.f32.mrf.mxu1  ;;  %v5700_v60 = vld [vmem:[%s7731_s1 + $0x2c8] sm:$0xff]  }
 0x16d   : > { %v4769_v17 = vadd.f32 %v4768_v31, %v4767_v48  ;;  %v1465_v39 = vadd.f32 %v4660_v41, %v6334_v40  ;;  %v5693_v40 = vld [vmem:[%s7731_s1 + $0x2e0] sm:$0xff]   ;;  %v2320_v48 = vpack.c.bf16 %v2289_v15, %v2288_v1  ;;  %v5695_v41 = vld [vmem:[%s7731_s1 + $0x2d8] sm:$0xff]  }
 0x16e   : > { %v4790_v25 = vpop.f32.mrf.mxu0  ;;  %v4770_v38 = vpop.f32.mrf.mxu1  ;;  %5140 = vmatpush3.bf16.msra.mxu0 %v5693_v40  ;;  %v5703_v1 = vld [vmem:[%s7731_s1 + $0x2c0] sm:$0xff]  }
 0x16f   : > { %v4791_v20 = vadd.f32 %v4790_v25, %v4789_v10  ;;  %v6523_v14 = vadd.f32 %v4769_v17, %v1462_v29  ;;  %3289 = vmatprep.mubr.bf16.mxu1 %v2320_v48 }
 0x170   : > { %v4792_v26 = vpop.f32.mrf.mxu0  ;;  %v4771_v32 = vpop.f32.mrf.mxu1  ;;  %3290 = vmatmul.mubr.bf16.vlgmr.msra.gmra.mxu1 %v6419_v30 }
 0x171   : > { %v1664_v53 = vadd.f32 %v4791_v20, %v6341_v46  ;;  %7734 = vst [vmem:[#allocation3_spill] sm:$0xff] %v6523_v14  ;;  %v4772_v59 = vadd.f32 %v4771_v32, %v4770_v38 }
 0x172   : > { %v4793_v45 = vpop.f32.mrf.mxu0  ;;  %v4901_v12 = vpop.f32.mrf.mxu1 }
 0x173   : > { %v4794_v56 = vadd.f32 %v4793_v45, %v4792_v26  ;;  %v6536_v50 = vadd.f32 %v4772_v59, %v1465_v39 }
 0x174   : > { %v4795_v46 = vpop.f32.mrf.mxu0  ;;  %v4902_v16 = vpop.f32.mrf.mxu1 }
 0x175   : > { %v1667_v43 = vadd.f32 %v4794_v56, %v6347_v11  ;;  %7735 = vst [vmem:[#allocation4_spill] sm:$0xff] %v6536_v50  ;;  %v4903_v10 = vadd.f32 %v4902_v16, %v4901_v12  ;;  %v5694_v11 = vld [vmem:[%s7731_s1 + $0x318] sm:$0xff]   ;;  %v5698_v56 = vld [vmem:[%s7731_s1 + $0x308] sm:$0xff]  }
 0x176   : > { %v4796_v52 = vpop.f32.mrf.mxu0  ;;  %v4904_v6 = vpop.f32.mrf.mxu1  ;;  %5141 = vmatprep.subr.bf16.mxu0 %v5694_v11  ;;  %v5701_v12 = vld [vmem:[%s7731_s1 + $0x378] sm:$0xff]  }
 0x177   : > { %v4797_v23 = vadd.f32 %v4796_v52, %v4795_v46  ;;  %v6547_v31 = vadd.f32 %v4903_v10, %v1664_v53  ;;  %5142 = vmatpush3.bf16.msra.mxu0 %v5695_v41  ;;  %v5697_v53 = vld [vmem:[%s7731_s1 + $0x2d0] sm:$0xff]  }
 0x178   : > { %v4798_v22 = vpop.f32.mrf.mxu0  ;;  %v4905_v20 = vpop.f32.mrf.mxu1 }
 0x179   : > { %v6542_v29 = vadd.f32 %v4797_v23, %v6354_v18  ;;  %v4906_v26 = vadd.f32 %v4905_v20, %v4904_v6  ;;  %v5696_v18 = vld [vmem:[%s7731_s1 + $0x310] sm:$0xff]  }
 0x17a   : > { %v4799_v25 = vpop.f32.mrf.mxu0  ;;  %v6553_v38 = vpop.f32.mrf.mxu1  ;;  %5143 = vmatprep.subr.bf16.mxu0 %v5696_v18 }
 0x17b   : > { %v4800_v17 = vadd.f32 %v4799_v25, %v4798_v22  ;;  %v6561_v39 = vadd.f32 %v4906_v26, %v1667_v43  ;;  %5144 = vmatpush3.bf16.msra.mxu0 %v5697_v53 }
 0x17c   : > { %v4801_v2 = vpop.f32.mrf.mxu0  ;;  %v6563_v30 = vpop.f32.mrf.mxu1  ;;  %5145 = vmatprep.subr.bf16.mxu0 %v5698_v56 }
 0x17d   : > { %v6556_v54 = vadd.f32 %v4800_v17, %v6363_v47  ;;  %v5699_v47 = vld [vmem:[%s7731_s1 + $0x3b8] sm:$0xff]  }
 0x17e   : > { %v4802_v55 = vpop.f32.mrf.mxu0  ;;  %v6571_v59 = vpop.f32.mrf.mxu1  ;;  %5245 = vmatprep.subr.bf16.mxu1 %v5699_v47 }
 0x17f   : > { %v4803_v45 = vadd.f32 %v4802_v55, %v4801_v2  ;;  %5146 = vmatpush3.bf16.msra.mxu0 %v5700_v60  ;;  %5246 = vmatpush3.bf16.msra.mxu1 %v5701_v12 }
 0x180   : > { %v4804_v32 = vpop.f32.mrf.mxu0  ;;  %v6582_v43 = vpop.f32.mrf.mxu1 }
 0x181   : > { %v6574_v46 = vadd.f32 %v4803_v45, %v6367_v58  ;;  %v5702_v58 = vld [vmem:[%s7731_s1 + $0x300] sm:$0xff]  }
 0x182   : > { %v4805_v62 = vpop.f32.mrf.mxu0  ;;  %v6587_v16 = vpop.f32.mrf.mxu1  ;;  %5147 = vmatprep.subr.bf16.mxu0 %v5702_v58 }
 0x183   : > { %v4806_v40 = vadd.f32 %v4805_v62, %v4804_v32  ;;  %5148 = vmatpush3.bf16.msra.mxu0 %v5703_v1 }
 0x184   : > { %v4807_v52 = vpop.f32.mrf.mxu0  ;;  %v6595_v10 = vpop.f32.mrf.mxu1 }
 0x185   : > { %v6590_v23 = vadd.f32 %v4806_v40, %v6373_v37 }
 0x186   : > { %v4808_v15 = vpop.f32.mrf.mxu0  ;;  %v6597_v48 = vpop.f32.mrf.mxu1 }
 0x187   : > { %v4809_v22 = vadd.f32 %v4808_v15, %v4807_v52 }
 0x188   : > { %v4810_v11 = vpop.f32.mrf.mxu0  ;;  %v6602_v25 = vpop.f32.mrf.mxu1 }
 0x189   : > { %v6600_v6 = vadd.f32 %v4809_v22, %v6380_v34  ;;  %v5704_v34 = vld [vmem:[%s7731_s1 + $0x3b0] sm:$0xff]  }
 0x18a   : > { %v4811_v41 = vpop.f32.mrf.mxu0  ;;  %v6604_v17 = vpop.f32.mrf.mxu1  ;;  %5247 = vmatprep.subr.bf16.mxu1 %v5704_v34 }
 0x18b   : > { %v4812_v37 = vadd.f32 %v4811_v41, %v4810_v11 }
 0x18c   : > { %v4813_v20 = vpop.f32.mrf.mxu0  ;;  %v6609_v18 = vpop.f32.mrf.mxu1 }
 0x18d   : > { %v6607_v26 = vadd.f32 %v4812_v37, %v6389_v3  ;;  %v5705_v3 = vld [vmem:[%s7731_s1 + $0x370] sm:$0xff]  }
 0x18e   : > { %v4814_v2 = vpop.f32.mrf.mxu0  ;;  %v6614_v45 = vpop.f32.mrf.mxu1  ;;  %5248 = vmatpush3.bf16.msra.mxu1 %v5705_v3 }
 0x18f   : > { %v4815_v53 = vadd.f32 %v4814_v2, %v4813_v20 }
 0x190   : > { %v4816_v55 = vpop.f32.mrf.mxu0  ;;  %v6622_v47 = vpop.f32.mrf.mxu1 }
 0x191   : > { %v6617_v32 = vadd.f32 %v4815_v53, %v6395_v44 }
 0x192   : > { %v4817_v56 = vpop.f32.mrf.mxu0  ;;  %v6624_v12 = vpop.f32.mrf.mxu1 }
 0x193   : > { %v4818_v60 = vadd.f32 %v4817_v56, %v4816_v55 }
 0x194   : > { %v4819_v62 = vpop.f32.mrf.mxu0  ;;  %v6629_v58 = vpop.f32.mrf.mxu1 }
 0x195   : > { %v6627_v40 = vadd.f32 %v4818_v60, %v6401_v61 }
 0x196   : > { %v4820_v52 = vpop.f32.mrf.mxu0  ;;  %v6631_v15 = vpop.f32.mrf.mxu1 }
 0x197   : > { %v4821_v44 = vadd.f32 %v4820_v52, %v4819_v62 }
 0x198   : > { %v4822_v1 = vpop.f32.mrf.mxu0  ;;  %v6636_v41 = vpop.f32.mrf.mxu1 }
 0x199   : > { %v6634_v22 = vadd.f32 %v4821_v44, %v6408_v7  ;;  %v5706_v7 = vld [vmem:[%s7731_s1 + $0x3a8] sm:$0xff]  }
 0x19a   : > { %v4823_v11 = vpop.f32.mrf.mxu0  ;;  %v6638_v2 = vpop.f32.mrf.mxu1  ;;  %5249 = vmatprep.subr.bf16.mxu1 %v5706_v7 }
 0x19b   : > { %v4824_v37 = vadd.f32 %v4823_v11, %v4822_v1 }
 0x19c   : > { %v4825_v20 = vpop.f32.mrf.mxu0  ;;  %v6643_v55 = vpop.f32.mrf.mxu1 }
 0x19d   : > { %v6641_v61 = vadd.f32 %v4824_v37, %v6416_v36  ;;  %v5707_v36 = vld [vmem:[%s7731_s1 + $0x368] sm:$0xff]  }
 0x19e   : > { %v4826_v53 = vpop.f32.mrf.mxu0  ;;  %v6648_v3 = vpop.f32.mrf.mxu1  ;;  %5250 = vmatpush3.bf16.msra.mxu1 %v5707_v36 }
 0x19f   : > { %v4827_v34 = vadd.f32 %v4826_v53, %v4825_v20 }
 0x1a0   : > { %v4828_v56 = vpop.f32.mrf.mxu0  ;;  %v6656_v52 = vpop.f32.mrf.mxu1 }
 0x1a1   : > { %v6651_v60 = vadd.f32 %v4827_v34, %v6421_v49 }
 0x1a2   : > { %v4829_v62 = vpop.f32.mrf.mxu0  ;;  %v6658_v11 = vpop.f32.mrf.mxu1 }
 0x1a3   : > { %7736 = vst [vmem:[#allocation5_spill] sm:$0xff] %v6651_v60  ;;  %v4830_v44 = vadd.f32 %v4829_v62, %v4828_v56 }
 0x1a4   : > { %v4831_v1 = vpop.f32.mrf.mxu0  ;;  %v6663_v53 = vpop.f32.mrf.mxu1 }
 0x1a5   : > { %v6661_v37 = vadd.f32 %v4830_v44, %v6425_v19 }
 0x1a6   : > { %v4832_v20 = vpop.f32.mrf.mxu0  ;;  %v6665_v7 = vpop.f32.mrf.mxu1 }
 0x1a7   : > { %7737 = vst [vmem:[#allocation6_spill] sm:$0xff] %v6661_v37  ;;  %v4833_v49 = vadd.f32 %v4832_v20, %v4831_v1  ;;  %7738 = vst [vmem:[#allocation7_spill] sm:$0xff] %v6665_v7 }
 0x1a8   : > { %v4834_v34 = vpop.f32.mrf.mxu0  ;;  %v6670_v60 = vpop.f32.mrf.mxu1 }
 0x1a9   : > { %v6668_v50 = vadd.f32 %v4833_v49, %v6431_v63  ;;  %7740 = vst [vmem:[#allocation9_spill] sm:$0xff] %v6670_v60  ;;  %v5708_v63 = vld [vmem:[%s7731_s1 + $0x3a0] sm:$0xff]  }
 0x1aa   : > { %v4835_v14 = vpop.f32.mrf.mxu0  ;;  %v6672_v36 = vpop.f32.mrf.mxu1  ;;  %v5709_v49 = vld [vmem:[%s7731_s1 + $0x360] sm:$0xff]   ;;  %5251 = vmatprep.subr.bf16.mxu1 %v5708_v63 }
 0x1ab   : > { %7739 = vst [vmem:[#allocation8_spill] sm:$0xff] %v6668_v50  ;;  %v4836_v56 = vadd.f32 %v4835_v14, %v4834_v34  ;;  %5252 = vmatpush3.bf16.msra.mxu1 %v5709_v49 }
 0x1ac   : > { %v4837_v62 = vpop.f32.mrf.mxu0  ;;  %v6677_v37 = vpop.f32.mrf.mxu1 }
 0x1ad   : > { %v6675_v19 = vadd.f32 %v4836_v56, %v6437_v5 }
 0x1ae   : > { %v4838_v44 = vpop.f32.mrf.mxu0  ;;  %v6685_v14 = vpop.f32.mrf.mxu1 }
 0x1af   : > { %7741 = vst [vmem:[#allocation10_spill] sm:$0xff] %v6675_v19  ;;  %v4839_v1 = vadd.f32 %v4838_v44, %v4837_v62  ;;  %v5710_v44 = vld [vmem:[%s7731_s1 + $0x438] sm:$0xff]  }
 0x1b0   : > { %v4840_v20 = vpop.f32.mrf.mxu0  ;;  %v6690_v56 = vpop.f32.mrf.mxu1  ;;  %5357 = vmatprep.subr.bf16.mxu0 %v5710_v44  ;;  %v5713_v44 = vld [vmem:[%s7731_s1 + $0x358] sm:$0xff]  }
 0x1b1   : > { %v6688_v34 = vadd.f32 %v4839_v1, %v6440_v4  ;;  %7743 = vst [vmem:[#allocation12_spill] sm:$0xff] %v6690_v56 }
 0x1b2   : > { %v4841_v5 = vpop.f32.mrf.mxu0  ;;  %v6695_v60 = vpop.f32.mrf.mxu1 }
 0x1b3   : > { %7742 = vst [vmem:[#allocation11_spill] sm:$0xff] %v6688_v34  ;;  %v4842_v19 = vadd.f32 %v4841_v5, %v4840_v20  ;;  %7744 = vst [vmem:[#allocation13_spill] sm:$0xff] %v6695_v60 }
 0x1b4   : > { %v4843_v62 = vpop.f32.mrf.mxu0  ;;  %v6700_v4 = vpop.f32.mrf.mxu1 }
 0x1b5   : > { %v6698_v7 = vadd.f32 %v4842_v19, %v6443_v24  ;;  %7746 = vst [vmem:[#allocation15_spill] sm:$0xff] %v6700_v4  ;;  %v5712_v24 = vld [vmem:[%s7731_s1 + $0x398] sm:$0xff]  }
 0x1b6   : > { %v4844_v50 = vpop.f32.mrf.mxu0  ;;  %v6702_v34 = vpop.f32.mrf.mxu1  ;;  %5253 = vmatprep.subr.bf16.mxu1 %v5712_v24 }
 0x1b7   : > { %7745 = vst [vmem:[#allocation14_spill] sm:$0xff] %v6698_v7  ;;  %v4845_v1 = vadd.f32 %v4844_v50, %v4843_v62  ;;  %7747 = vst [vmem:[#allocation16_spill] sm:$0xff] %v6702_v34  ;;  %5254 = vmatpush3.bf16.msra.mxu1 %v5713_v44 }
 0x1b8   : > { %v4846_v63 = vpop.f32.mrf.mxu0  ;;  %v6707_v5 = vpop.f32.mrf.mxu1 }
 0x1b9   : > { %v6705_v20 = vadd.f32 %v4845_v1, %v6449_v21  ;;  %7749 = vst [vmem:[#allocation18_spill] sm:$0xff] %v6707_v5 }
 0x1ba   : > { %v4847_v49 = vpop.f32.mrf.mxu0  ;;  %v6715_v50 = vpop.f32.mrf.mxu1 }
 0x1bb   : > { %7748 = vst [vmem:[#allocation17_spill] sm:$0xff] %v6705_v20  ;;  %v4848_v56 = vadd.f32 %v4847_v49, %v4846_v63  ;;  %7750 = vst [vmem:[#allocation19_spill] sm:$0xff] %v6715_v50 }
 0x1bc   : > { %v4849_v19 = vpop.f32.mrf.mxu0  ;;  %v6720_v1 = vpop.f32.mrf.mxu1 }
 0x1bd   : > { %v6718_v62 = vadd.f32 %v4848_v56, %v6455_v8 }
 0x1be   : > { %v4850_v21 = vpop.f32.mrf.mxu0  ;;  %v6722_v7 = vpop.f32.mrf.mxu1 }
 0x1bf   : > { %v4851_v63 = vadd.f32 %v4850_v21, %v4849_v19 }
 0x1c0   : > { %v4852_v49 = vpop.f32.mrf.mxu0  ;;  %v6727_v20 = vpop.f32.mrf.mxu1 }
 0x1c1   : > { %v6725_v5 = vadd.f32 %v4851_v63, %v6458_v33 }
 0x1c2   : > { %v4853_v34 = vpop.f32.mrf.mxu0  ;;  %v6729_v50 = vpop.f32.mrf.mxu1 }
 0x1c3   : > { %7751 = vst [vmem:[#allocation20_spill] sm:$0xff] %v6725_v5  ;;  %v4854_v4 = vadd.f32 %v4853_v34, %v4852_v49  ;;  %v5716_v34 = vld [vmem:[%s7731_s1 + $0x390] sm:$0xff]  }
 0x1c4   : > { %v4855_v60 = vpop.f32.mrf.mxu0  ;;  %v6734_v24 = vpop.f32.mrf.mxu1  ;;  %5255 = vmatprep.subr.bf16.mxu1 %v5716_v34 }
 0x1c5   : > { %v6732_v8 = vadd.f32 %v4854_v4, %v6461_v57  ;;  %7753 = vst [vmem:[#allocation22_spill] sm:$0xff] %v6734_v24  ;;  %v5717_v57 = vld [vmem:[%s7731_s1 + $0x350] sm:$0xff]  }
 0x1c6   : > { %v4856_v56 = vpop.f32.mrf.mxu0  ;;  %v6739_v63 = vpop.f32.mrf.mxu1  ;;  %5256 = vmatpush3.bf16.msra.mxu1 %v5717_v57 }
 0x1c7   : > { %7752 = vst [vmem:[#allocation21_spill] sm:$0xff] %v6732_v8  ;;  %v4857_v19 = vadd.f32 %v4856_v56, %v4855_v60  ;;  %7755 = vst [vmem:[#allocation24_spill] sm:$0xff] %v6739_v63 }
 0x1c8   : > { %v4858_v44 = vpop.f32.mrf.mxu0 }
 0x1c9   : > { %v6737_v21 = vadd.f32 %v4857_v19, %v6467_v9  ;;  %v6750_v9 = vpop.f32.mrf.mxu1 }
 0x1ca   : > { %v4859_v33 = vpop.f32.mrf.mxu0 }
 0x1cb   : > { %7754 = vst [vmem:[#allocation23_spill] sm:$0xff] %v6737_v21  ;;  %v4860_v5 = vadd.f32 %v4859_v33, %v4858_v44  ;;  %v6755_v8 = vpop.f32.mrf.mxu1 }
 0x1cc   : > { %v4861_v49 = vpop.f32.mrf.mxu0 }
 0x1cd   : > { %v6748_v4 = vadd.f32 %v4860_v5, %v6473_v35  ;;  %v6760_v5 = vpop.f32.mrf.mxu1 }
 0x1ce   : > { %v4862_v60 = vpop.f32.mrf.mxu0 }
 0x1cf   : > { %7756 = vst [vmem:[#allocation25_spill] sm:$0xff] %v6748_v4  ;;  %v4863_v56 = vadd.f32 %v4862_v60, %v4861_v49  ;;  %v6765_v60 = vpop.f32.mrf.mxu1 }
 0x1d0   : > { %v4864_v19 = vpop.f32.mrf.mxu0 }
 0x1d1   : > { %v6753_v44 = vadd.f32 %v4863_v56, %v6476_v51  ;;  %v5720_v56 = vld [vmem:[%s7731_s1 + $0x388] sm:$0xff]  }
 0x1d2   : > { %v4865_v33 = vpop.f32.mrf.mxu0  ;;  %5257 = vmatprep.subr.bf16.mxu1 %v5720_v56 }
 0x1d3   : > { %7757 = vst [vmem:[#allocation26_spill] sm:$0xff] %v6753_v44  ;;  %v4866_v21 = vadd.f32 %v4865_v33, %v4864_v19 }
 0x1d4   : > { %v4867_v63 = vpop.f32.mrf.mxu0 }
 0x1d5   : > { %v6758_v24 = vadd.f32 %v4866_v21, %v6480_v13  ;;  %v5721_v13 = vld [vmem:[%s7731_s1 + $0x348] sm:$0xff]  }
 0x1d6   : > { %v4868_v35 = vpop.f32.mrf.mxu0  ;;  %5258 = vmatpush3.bf16.msra.mxu1 %v5721_v13  ;;  %v4912_v13 = vadd.f32 %v6582_v43, %v6571_v59 }
 0x1d7   : > { %7758 = vst [vmem:[#allocation27_spill] sm:$0xff] %v6758_v24  ;;  %v4869_v34 = vadd.f32 %v4868_v35, %v4867_v63 }
 0x1d8   : > { %v4870_v57 = vpop.f32.mrf.mxu0 }
 0x1d9   : > { %v6763_v4 = vadd.f32 %v4869_v34, %v6486_v28  ;;  %v6776_v28 = vpop.f32.mrf.mxu1 }
 0x1da   : > { %v4871_v49 = vpop.f32.mrf.mxu0 }
 0x1db   : > { %7759 = vst [vmem:[#allocation28_spill] sm:$0xff] %v6763_v4  ;;  %v4872_v51 = vadd.f32 %v4871_v49, %v4870_v57  ;;  %v6781_v49 = vpop.f32.mrf.mxu1 }
 0x1dc   : > { %v4873_v19 = vpop.f32.mrf.mxu0 }
 0x1dd   : > { %v6774_v21 = vadd.f32 %v4872_v51, %v6492_v27  ;;  %v4909_v51 = vadd.f32 %v6563_v30, %v6553_v38  ;;  %v6792_v56 = vpop.f32.mrf.mxu1  ;;  %v5725_v38 = vld [vmem:[%s7731_s1 + $0x340] sm:$0xff]  }
 0x1de   : > { %v4874_v63 = vpop.f32.mrf.mxu0 }
 0x1df   : > { %v4875_v33 = vadd.f32 %v4874_v63, %v4873_v19  ;;  %v6800_v63 = vpop.f32.mrf.mxu1 }
 0x1e0   : > { %v4876_v35 = vpop.f32.mrf.mxu0 }
 0x1e1   : > { %v6779_v34 = vadd.f32 %v4875_v33, %v6501_v0  ;;  %v1833_v33 = vadd.f32 %v4909_v51, %v6542_v29  ;;  %v6811_v59 = vpop.f32.mrf.mxu1  ;;  %v1836_v51 = vadd.f32 %v4912_v13, %v6556_v54 }
 0x1e2   : > { %v4877_v57 = vpop.f32.mrf.mxu0 }
 0x1e3   : > { %7760 = vst [vmem:[#allocation29_spill] sm:$0xff] %v6779_v34  ;;  %v4878_v24 = vadd.f32 %v4877_v57, %v4876_v35  ;;  %v4921_v35 = vadd.f32 %v6609_v18, %v6604_v17  ;;  %v4924_v17 = vadd.f32 %v6622_v47, %v6614_v45 }
 0x1e4   : > { %v6783_v44 = vpop.f32.mrf.mxu0 }
 0x1e5   : > { %v6786_v4 = vadd.f32 %v4878_v24, %v6510_v42  ;;  %v5724_v42 = vld [vmem:[%s7731_s1 + $0x380] sm:$0xff]  }
 0x1e6   : > { %v6788_v27 = vpop.f32.mrf.mxu0  ;;  %5259 = vmatprep.subr.bf16.mxu1 %v5724_v42 }
 0x1e7   : > { %7761 = vst [vmem:[#allocation30_spill] sm:$0xff] %v6786_v4  ;;  %5260 = vmatpush3.bf16.msra.mxu1 %v5725_v38  ;;  %v4915_v4 = vadd.f32 %v6595_v10, %v6587_v16  ;;  %v4918_v10 = vadd.f32 %v6602_v25, %v6597_v48 }
 0x1e8   : > { %v6794_v19 = vpop.f32.mrf.mxu0 }
 0x1e9   : > { %v1841_v38 = vadd.f32 %v4915_v4, %v6574_v46 }
 0x1ea   : > { %v6796_v0 = vpop.f32.mrf.mxu0 }
 0x1eb   : > { %7762 = vst [vmem:[#allocation31_spill] sm:$0xff] %v6796_v0 }
 0x1ec   : > { %v5511_v24 = vpop.f32.mrf.mxu0 }
 0x1ed   : > { %v1994_v30 = vadd.f32 %v5511_v24, %v1833_v33  ;;  %v1849_v24 = vadd.f32 %v4921_v35, %v6600_v6  ;;  %v4933_v6 = vadd.f32 %v6643_v55, %v6638_v2  ;;  %v1844_v2 = vadd.f32 %v4918_v10, %v6590_v23 }
 0x1ee   : > { %v1985_v57 = vpop.f32.mrf.mxu0 }
 0x1ef   : > { %vm2114_vm0 = vcmp.ge.f32.partialorder %v1994_v30, 0.0  ;;  %v2146_v29 = vmul.f32 0.01, %v1994_v30  ;;  %v1986_v43 = vadd.f32 %v1985_v57, %v6547_v31  ;;  %v6823_v31 = vpop.f32.mrf.mxu1 }
 0x1f0   : > { %v5512_v34 = vpop.f32.mrf.mxu0 }
 0x1f1   : > { %v6817_v0 = vsel %vm2114_vm0, %v1994_v30, %v2146_v29  ;;  %vm2112_vm1 = vcmp.ge.f32.partialorder %v1986_v43, 0.0  ;;  %v2144_v33 = vmul.f32 0.01, %v1986_v43  ;;  %v1997_v42 = vadd.f32 %v5512_v34, %v1836_v51  ;;  %v6837_v25 = vpop.f32.mrf.mxu1 }
 0x1f2   : > { %2210 = vst [vmem:[#allocation2 + $0x31] sm:$0xff] %v6817_v0  ;;  %v1988_v18 = vpop.f32.mrf.mxu0  ;;  %v4927_v29 = vadd.f32 %v6629_v58, %v6624_v12 }
 0x1f3   : > { %v2176_v54 = vsel %vm2112_vm1, %v1986_v43, %v2144_v33  ;;  %vm2115_vm2 = vcmp.ge.f32.partialorder %v1997_v42, 0.0  ;;  %v2147_v13 = vmul.f32 0.01, %v1997_v42  ;;  %v1989_v16 = vadd.f32 %v1988_v18, %v6561_v39  ;;  %v6848_v12 = vpop.f32.mrf.mxu1 }
 0x1f4   : > { %2208 = vst [vmem:[#allocation2 + $0x19] sm:$0xff] %v2176_v54  ;;  %v5515_v34 = vpop.f32.mrf.mxu0  ;;  %v1852_v39 = vadd.f32 %v4924_v17, %v6607_v26  ;;  %v1865_v18 = vadd.f32 %v4933_v6, %v6634_v22  ;;  %v6859_v22 = vld [vmem:[%s7731_s1 + $0x478] sm:$0xff]  }
 0x1f5   : > { %v6829_v45 = vsel %vm2115_vm2, %v1997_v42, %v2147_v13  ;;  %vm2113_vm3 = vcmp.ge.f32.partialorder %v1989_v16, 0.0  ;;  %v2145_v47 = vmul.f32 0.01, %v1989_v16  ;;  %v2010_v30 = vadd.f32 %v5515_v34, %v1849_v24  ;;  %v2337_v13 = vld [vmem:[#allocation2 + $0xa] sm:$0xff]  ;;  %5541 = vmatprep.subr.bf16.mxu1 %v6859_v22  ;;  %v6870_v6 = vpop.f32.mrf.mxu1 }
 0x1f6   : > { %2211 = vst [vmem:[#allocation2 + $0x39] sm:$0xff] %v6829_v45  ;;  %v2001_v35 = vpop.f32.mrf.mxu0  ;;  %v2322_v48 = vpack.c.bf16 %v6829_v45, %v6817_v0  ;;  %v4936_v42 = vadd.f32 %v6656_v52, %v6648_v3  ;;  %v1857_v52 = vadd.f32 %v4927_v29, %v6617_v32 }
 0x1f7   : > { %v2177_v57 = vsel %vm2113_vm3, %v1989_v16, %v2145_v47  ;;  %vm2118_vm4 = vcmp.ge.f32.partialorder %v2010_v30, 0.0  ;;  %v2150_v46 = vmul.f32 0.01, %v2010_v30  ;;  %v2002_v4 = vadd.f32 %v2001_v35, %v1841_v38 }
 0x1f8   : > { %2209 = vst [vmem:[#allocation2 + $0x21] sm:$0xff] %v2177_v57  ;;  %v5516_v43 = vpop.f32.mrf.mxu0  ;;  %v2321_v55 = vpack.c.bf16 %v2177_v57, %v2176_v54  ;;  %v2336_v54 = vld [vmem:[#allocation2 + $0x2] sm:$0xff]  ;;  %v4930_v16 = vadd.f32 %v6636_v41, %v6631_v15  ;;  %v4945_v47 = vadd.f32 %v6677_v37, %v6672_v36  ;;  %v1868_v41 = vadd.f32 %v4936_v42, %v6641_v61 }
 0x1f9   : > { %v6842_v51 = vsel %vm2118_vm4, %v2010_v30, %v2150_v46  ;;  %vm2116_vm5 = vcmp.ge.f32.partialorder %v2002_v4, 0.0  ;;  %v2148_v26 = vmul.f32 0.01, %v2002_v4  ;;  %v2013_v33 = vadd.f32 %v5516_v43, %v1852_v39 }
 0x1fa   : > { %2214 = vst [vmem:[#allocation2 + $0x61] sm:$0xff] %v6842_v51  ;;  %v2004_v17 = vpop.f32.mrf.mxu0  ;;  %3297 = vmatprep.mubr.bf16.mxu1 %v2321_v55  ;;  %v2368_v30 = vpack.c.bf16 %v2337_v13, %v2336_v54  ;;  %v1860_v29 = vadd.f32 %v4930_v16, %v6627_v40  ;;  %v5711_v55 = vld [vmem:[%s7731_s1 + $0x3f8] sm:$0xff]   ;;  %v6894_v13 = vpop.f32.mrf.mxu1 }
 0x1fb   : > { %v6850_v58 = vsel %vm2116_vm5, %v2002_v4, %v2148_v26  ;;  %vm2119_vm6 = vcmp.ge.f32.partialorder %v2013_v33, 0.0  ;;  %v2151_v23 = vmul.f32 0.01, %v2013_v33  ;;  %v2005_v24 = vadd.f32 %v2004_v17, %v1844_v2  ;;  %v2384_v46 = vld [vmem:[#allocation2 + $0x18] sm:$0xff]  ;;  %v2386_v17 = vld [vmem:[#allocation2 + $0x30] sm:$0xff] }
 0x1fc   : > { %2212 = vst [vmem:[#allocation2 + $0x49] sm:$0xff] %v6850_v58  ;;  %v5519_v3 = vpop.f32.mrf.mxu0  ;;  %v4939_v4 = vadd.f32 %v6663_v53, %v6658_v11  ;;  %v5714_v11 = vld [vmem:[%s7731_s1 + $0x430] sm:$0xff]   ;;  %v7763_v40 = vld [vmem:[#allocation12_spill] sm:$0xff] }
 0x1fd   : > { %v6861_v10 = vsel %vm2119_vm6, %v2013_v33, %v2151_v23  ;;  %vm2117_vm7 = vcmp.ge.f32.partialorder %v2005_v24, 0.0  ;;  %v2149_v34 = vmul.f32 0.01, %v2005_v24  ;;  %v2026_v38 = vadd.f32 %v5519_v3, %v1865_v18  ;;  %v2387_v36 = vld [vmem:[#allocation2 + $0x38] sm:$0xff] }
 0x1fe   : > { %2215 = vst [vmem:[#allocation2 + $0x69] sm:$0xff] %v6861_v10  ;;  %v2017_v15 = vpop.f32.mrf.mxu0  ;;  %v2324_v32 = vpack.c.bf16 %v6861_v10, %v6842_v51  ;;  %v4948_v53 = vadd.f32 %v7763_v40, %v6685_v14  ;;  %v7764_v23 = vld [vmem:[#allocation8_spill] sm:$0xff]  ;;  %v6892_v54 = vpack.c.bf16 %v2387_v36, %v2386_v17  ;;  %v7765_v14 = vld [vmem:[#allocation7_spill] sm:$0xff]  ;;  %v7770_v40 = vld [vmem:[#allocation13_spill] sm:$0xff] }
 0x1ff   : > { %v6872_v35 = vsel %vm2117_vm7, %v2005_v24, %v2149_v34  ;;  %vm2122_vm8 = vcmp.ge.f32.partialorder %v2026_v38, 0.0  ;;  %v2154_v39 = vmul.f32 0.01, %v2026_v38  ;;  %v2018_v57 = vadd.f32 %v2017_v15, %v1857_v52  ;;  %v2385_v37 = vld [vmem:[#allocation2 + $0x20] sm:$0xff]  ;;  %v5730_v10 = vld [vmem:[%s7731_s1 + $0x408] sm:$0xff]  }
 0x200   : > { %2213 = vst [vmem:[#allocation2 + $0x51] sm:$0xff] %v6872_v35  ;;  %v5520_v61 = vpop.f32.mrf.mxu0  ;;  %v2416_v43 = vpack.c.bf16 %v2385_v37, %v2384_v46  ;;  %v2323_v2 = vpack.c.bf16 %v6872_v35, %v6850_v58  ;;  %v1881_v24 = vadd.f32 %v4945_v47, %v7764_v23  ;;  %v7766_v34 = vld [vmem:[#allocation9_spill] sm:$0xff]  ;;  %v5718_v46 = vld [vmem:[%s7731_s1 + $0x428] sm:$0xff]   ;;  %v7768_v37 = vld [vmem:[#allocation19_spill] sm:$0xff] }
 0x201   : > { %v6883_v26 = vsel %vm2122_vm8, %v2026_v38, %v2154_v39  ;;  %vm2120_vm9 = vcmp.ge.f32.partialorder %v2018_v57, 0.0  ;;  %v2152_v33 = vmul.f32 0.01, %v2018_v57  ;;  %v2029_v42 = vadd.f32 %v5520_v61, %v1868_v41  ;;  %v7767_v15 = vld [vmem:[#allocation5_spill] sm:$0xff]  ;;  %v5715_v39 = vld [vmem:[%s7731_s1 + $0x3f0] sm:$0xff]   ;;  %v7769_v61 = vld [vmem:[#allocation10_spill] sm:$0xff] }
 0x202   : > { %2218 = vst [vmem:[#allocation2 + $0x91] sm:$0xff] %v6883_v26  ;;  %v2020_v18 = vpop.f32.mrf.mxu0  ;;  %3450 = vmatprep.mubr.bf16.mxu0 %v2416_v43  ;;  %3298 = vmatmul.mubr.bf16.gmra.mxu1 %v2416_v43  ;;  %v4942_v38 = vadd.f32 %v7766_v34, %v7765_v14  ;;  %v1873_v41 = vadd.f32 %v4939_v4, %v7767_v15 }
 0x203   : > { %v6896_v16 = vsel %vm2120_vm9, %v2018_v57, %v2152_v33  ;;  %vm2123_vm10 = vcmp.ge.f32.partialorder %v2029_v42, 0.0  ;;  %v2155_v3 = vmul.f32 0.01, %v2029_v42  ;;  %v2021_v52 = vadd.f32 %v2020_v18, %v1860_v29  ;;  %3451 = vmatmul.mubr.bf16.vlgmr.msra.gmra.mxu0 %v2368_v30  ;;  %3305 = vmatprep.mubr.bf16.mxu1 %v2322_v48  ;;  %v2338_v48 = vld [vmem:[#allocation2 + $0x1a] sm:$0xff]  ;;  %v2339_v57 = vld [vmem:[#allocation2 + $0x22] sm:$0xff]  ;;  %v7771_v18 = vld [vmem:[#allocation15_spill] sm:$0xff] }
 0x204   : > { %2216 = vst [vmem:[#allocation2 + $0x79] sm:$0xff] %v6896_v16  ;;  %v5523_v47 = vpop.f32.mrf.mxu0  ;;  %3458 = vmatprep.mubr.bf16.mxu0 %v6892_v54  ;;  %5358 = vmatpush3.bf16.msra.mxu0 %v5711_v55  ;;  %v4957_v36 = vadd.f32 %v6720_v1, %v7768_v37  ;;  %v1884_v29 = vadd.f32 %v4948_v53, %v7769_v61  ;;  %v6920_v55 = vpop.f32.mrf.mxu1 }
 0x205   : > { %v6909_v30 = vsel %vm2123_vm10, %v2029_v42, %v2155_v3  ;;  %vm2121_vm11 = vcmp.ge.f32.partialorder %v2021_v52, 0.0  ;;  %v2153_v0 = vmul.f32 0.01, %v2021_v52  ;;  %v2042_v45 = vadd.f32 %v5523_v47, %v1881_v24  ;;  %5359 = vmatprep.subr.bf16.mxu0 %v5714_v11  ;;  %v7772_v24 = vld [vmem:[#allocation6_spill] sm:$0xff] }
 0x206   : > { %2219 = vst [vmem:[#allocation2 + $0x99] sm:$0xff] %v6909_v30  ;;  %v2033_v4 = vpop.f32.mrf.mxu0  ;;  %v2326_v43 = vpack.c.bf16 %v6909_v30, %v6883_v26  ;;  %v4951_v23 = vadd.f32 %v7771_v18, %v7770_v40  ;;  %v1876_v3 = vadd.f32 %v4942_v38, %v7772_v24  ;;  %v6928_v53 = vpack.c.bf16 %v2339_v57, %v2338_v48  ;;  %v5722_v38 = vld [vmem:[%s7731_s1 + $0x420] sm:$0xff]   ;;  %v6947_v37 = vpop.f32.mrf.mxu1 }
 0x207   : > { %v6922_v33 = vsel %vm2121_vm11, %v2021_v52, %v2153_v0  ;;  %vm2126_vm12 = vcmp.ge.f32.partialorder %v2042_v45, 0.0  ;;  %v2158_v42 = vmul.f32 0.01, %v2042_v45  ;;  %v2034_v17 = vadd.f32 %v2033_v4, %v1873_v41  ;;  %v2389_v11 = vld [vmem:[#allocation2 + $0x50] sm:$0xff]  ;;  %v5719_v52 = vld [vmem:[%s7731_s1 + $0x3e8] sm:$0xff]   ;;  %v7773_v48 = vld [vmem:[#allocation17_spill] sm:$0xff] }
 0x208   : > { %2217 = vst [vmem:[#allocation2 + $0x81] sm:$0xff] %v6922_v33  ;;  %v5524_v1 = vpop.f32.mrf.mxu0  ;;  %v2325_v14 = vpack.c.bf16 %v6922_v33, %v6896_v16  ;;  %5360 = vmatpush3.bf16.msra.mxu0 %v5715_v39  ;;  %v2388_v41 = vld [vmem:[#allocation2 + $0x48] sm:$0xff]  ;;  %v4960_v0 = vadd.f32 %v6727_v20, %v6722_v7  ;;  %v7774_v7 = vld [vmem:[#allocation16_spill] sm:$0xff] }
 0x209   : > { %v6935_v34 = vsel %vm2126_vm12, %v2042_v45, %v2158_v42  ;;  %vm2124_vm13 = vcmp.ge.f32.partialorder %v2034_v17, 0.0  ;;  %v2156_v47 = vmul.f32 0.01, %v2034_v17  ;;  %v2045_v15 = vadd.f32 %v5524_v1, %v1884_v29  ;;  %5361 = vmatprep.subr.bf16.mxu0 %v5718_v46  ;;  %v7775_v20 = vld [vmem:[#allocation18_spill] sm:$0xff]  ;;  %v7776_v42 = vld [vmem:[#allocation11_spill] sm:$0xff]  ;;  %v2341_v18 = vld [vmem:[#allocation2 + $0x3a] sm:$0xff] }
 0x20a   : > { %2222 = vst [vmem:[#allocation2 + $0xc1] sm:$0xff] %v6935_v34  ;;  %v2036_v39 = vpop.f32.mrf.mxu0  ;;  %3306 = vmatmul.mubr.bf16.gmra.mxu1 %v6892_v54  ;;  %v1897_v45 = vadd.f32 %v4957_v36, %v7773_v48  ;;  %v6945_v57 = vpack.c.bf16 %v2389_v11, %v2388_v41  ;;  %v4954_v29 = vadd.f32 %v7775_v20, %v7774_v7  ;;  %v5723_v11 = vld [vmem:[%s7731_s1 + $0x3e0] sm:$0xff]   ;;  %v5726_v1 = vld [vmem:[%s7731_s1 + $0x418] sm:$0xff]   ;;  %v7777_v48 = vld [vmem:[#allocation22_spill] sm:$0xff] }
 0x20b   : > { %v6949_v4 = vsel %vm2124_vm13, %v2034_v17, %v2156_v47  ;;  %vm2127_vm14 = vcmp.ge.f32.partialorder %v2045_v15, 0.0  ;;  %v2159_v46 = vmul.f32 0.01, %v2045_v15  ;;  %v2037_v61 = vadd.f32 %v2036_v39, %v1876_v3  ;;  %3459 = vmatmul.mubr.bf16.gmra.mxu0 %v6928_v53  ;;  %3313 = vmatprep.mubr.bf16.mxu1 %v2323_v2  ;;  %v2340_v2 = vld [vmem:[#allocation2 + $0x32] sm:$0xff]  ;;  %v6974_v47 = vpop.f32.mrf.mxu1  ;;  %v2391_v39 = vld [vmem:[#allocation2 + $0x68] sm:$0xff] }
 0x20c   : > { %2220 = vst [vmem:[#allocation2 + $0xa9] sm:$0xff] %v6949_v4  ;;  %v5527_v36 = vpop.f32.mrf.mxu0  ;;  %3466 = vmatprep.mubr.bf16.mxu0 %v6945_v57  ;;  %v1889_v17 = vadd.f32 %v4951_v23, %v7776_v42  ;;  %5362 = vmatpush3.bf16.msra.mxu0 %v5719_v52  ;;  %v4969_v23 = vadd.f32 %v6760_v5, %v6755_v8  ;;  %v7778_v5 = vld [vmem:[#allocation14_spill] sm:$0xff]  ;;  %v7779_v42 = vld [vmem:[#allocation24_spill] sm:$0xff] }
 0x20d   : > { %v6963_v40 = vsel %vm2127_vm14, %v2045_v15, %v2159_v46  ;;  %vm2125_vm15 = vcmp.ge.f32.partialorder %v2037_v61, 0.0  ;;  %v2157_v58 = vmul.f32 0.01, %v2037_v61  ;;  %v2058_v35 = vadd.f32 %v5527_v36, %v1897_v45  ;;  %5363 = vmatprep.subr.bf16.mxu0 %v5722_v38  ;;  %v2390_v36 = vld [vmem:[#allocation2 + $0x60] sm:$0xff]  ;;  %v2343_v51 = vld [vmem:[#allocation2 + $0x52] sm:$0xff] }
 0x20e   : > { %2223 = vst [vmem:[#allocation2 + $0xc9] sm:$0xff] %v6963_v40  ;;  %v2049_v24 = vpop.f32.mrf.mxu0  ;;  %v1900_v3 = vadd.f32 %v4960_v0, %v6718_v62  ;;  %v2328_v52 = vpack.c.bf16 %v6963_v40, %v6935_v34  ;;  %v4963_v45 = vadd.f32 %v7777_v48, %v6729_v50  ;;  %v1892_v46 = vadd.f32 %v4954_v29, %v7778_v5  ;;  %v5728_v29 = vld [vmem:[%s7731_s1 + $0x410] sm:$0xff]   ;;  %v7782_v5 = vld [vmem:[#allocation25_spill] sm:$0xff] }
 0x20f   : > { %v6976_v15 = vsel %vm2125_vm15, %v2037_v61, %v2157_v58  ;;  %vm2130_vm0 = vcmp.ge.f32.partialorder %v2058_v35, 0.0  ;;  %v2162_v41 = vmul.f32 0.01, %v2058_v35  ;;  %v2050_v38 = vadd.f32 %v2049_v24, %v1889_v17  ;;  %v5727_v61 = vld [vmem:[%s7731_s1 + $0x3d8] sm:$0xff]  }
 0x210   : > { %2221 = vst [vmem:[#allocation2 + $0xb1] sm:$0xff] %v6976_v15  ;;  %v5528_v8 = vpop.f32.mrf.mxu0  ;;  %v6982_v62 = vpack.c.bf16 %v2341_v18, %v2340_v2  ;;  %v2327_v0 = vpack.c.bf16 %v6976_v15, %v6949_v4  ;;  %5364 = vmatpush3.bf16.msra.mxu0 %v5723_v11  ;;  %v4966_v17 = vadd.f32 %v6750_v9, %v7779_v42 }
 0x211   : > { %v6989_v7 = vsel %vm2130_vm0, %v2058_v35, %v2162_v41  ;;  %vm2128_vm1 = vcmp.ge.f32.partialorder %v2050_v38, 0.0  ;;  %v2160_v20 = vmul.f32 0.01, %v2050_v38  ;;  %v2061_v50 = vadd.f32 %v5528_v8, %v1900_v3  ;;  %5365 = vmatprep.subr.bf16.mxu0 %v5726_v1  ;;  %v7780_v35 = vld [vmem:[#allocation23_spill] sm:$0xff]  ;;  %v7003_v1 = vpop.f32.mrf.mxu1  ;;  %v2398_v15 = vld [vmem:[#allocation2 + $0xc0] sm:$0xff] }
 0x212   : > { %v4972_v11 = vadd.f32 %v6776_v28, %v6765_v60  ;;  %2226 = vst [vmem:[#allocation2 + $0xf1] sm:$0xff] %v6989_v7  ;;  %v2052_v58 = vpop.f32.mrf.mxu0  ;;  %3314 = vmatmul.mubr.bf16.gmra.mxu1 %v6945_v57  ;;  %v1913_v2 = vadd.f32 %v4969_v23, %v7780_v35  ;;  %v7001_v18 = vpack.c.bf16 %v2391_v39, %v2390_v36  ;;  %v7781_v60 = vld [vmem:[#allocation20_spill] sm:$0xff]  ;;  %v5729_v23 = vld [vmem:[%s7731_s1 + $0x3d0] sm:$0xff]   ;;  %v2393_v35 = vld [vmem:[#allocation2 + $0x80] sm:$0xff] }
 0x213   : > { %v7005_v24 = vsel %vm2128_vm1, %v2050_v38, %v2160_v20  ;;  %vm2131_vm2 = vcmp.ge.f32.partialorder %v2061_v50, 0.0  ;;  %v2163_v3 = vmul.f32 0.01, %v2061_v50  ;;  %v2053_v41 = vadd.f32 %v2052_v58, %v1892_v46  ;;  %3467 = vmatmul.mubr.bf16.gmra.mxu0 %v6982_v62  ;;  %3321 = vmatprep.mubr.bf16.mxu1 %v2324_v32  ;;  %v2342_v8 = vld [vmem:[#allocation2 + $0x4a] sm:$0xff]  ;;  %v4992_v36 = vpop.f32.mrf.mxu1 }
 0x214   : > { %2224 = vst [vmem:[#allocation2 + $0xd9] sm:$0xff] %v7005_v24  ;;  %v5531_v9 = vpop.f32.mrf.mxu0  ;;  %3474 = vmatprep.mubr.bf16.mxu0 %v7001_v18  ;;  %v1905_v28 = vadd.f32 %v4963_v45, %v7781_v60  ;;  %5366 = vmatpush3.bf16.msra.mxu0 %v5727_v61  ;;  %v4981_v32 = vadd.f32 %v6837_v25, %v6823_v31  ;;  %v7783_v61 = vld [vmem:[#allocation21_spill] sm:$0xff] }
 0x215   : > { %v7017_v38 = vsel %vm2131_vm2, %v2061_v50, %v2163_v3  ;;  %vm2129_vm3 = vcmp.ge.f32.partialorder %v2053_v41, 0.0  ;;  %v2161_v39 = vmul.f32 0.01, %v2053_v41  ;;  %v2074_v48 = vadd.f32 %v5531_v9, %v1913_v2  ;;  %5367 = vmatprep.subr.bf16.mxu0 %v5728_v29  ;;  %v5732_v3 = vld [vmem:[%s7731_s1 + $0x3c8] sm:$0xff]   ;;  %v2392_v9 = vld [vmem:[#allocation2 + $0x78] sm:$0xff] }
 0x216   : > { %2227 = vst [vmem:[#allocation2 + $0xf9] sm:$0xff] %v7017_v38  ;;  %v2065_v45 = vpop.f32.mrf.mxu0  ;;  %v1916_v46 = vadd.f32 %v4972_v11, %v7782_v5  ;;  %v1908_v20 = vadd.f32 %v4966_v17, %v7783_v61  ;;  %v2330_v50 = vpack.c.bf16 %v7017_v38, %v6989_v7  ;;  %v4975_v31 = vadd.f32 %v6792_v56, %v6781_v49 }
 0x217   : > { %v7029_v42 = vsel %vm2129_vm3, %v2053_v41, %v2161_v39  ;;  %vm2134_vm4 = vcmp.ge.f32.partialorder %v2074_v48, 0.0  ;;  %v2166_v29 = vmul.f32 0.01, %v2074_v48  ;;  %v2066_v58 = vadd.f32 %v2065_v45, %v1905_v28  ;;  %v7784_v28 = vld [vmem:[#allocation28_spill] sm:$0xff] }
 0x218   : > { %v4984_v25 = vadd.f32 %v6870_v6, %v6848_v12  ;;  %2225 = vst [vmem:[#allocation2 + $0xe1] sm:$0xff] %v7029_v42  ;;  %v5532_v11 = vpop.f32.mrf.mxu0  ;;  %v7036_v17 = vpack.c.bf16 %v2343_v51, %v2342_v8  ;;  %v2329_v2 = vpack.c.bf16 %v7029_v42, %v7005_v24  ;;  %5368 = vmatpush3.bf16.msra.mxu0 %v5729_v23  ;;  %v5733_v12 = vld [vmem:[%s7731_s1 + $0x400] sm:$0xff]  }
 0x219   : > { %v7043_v41 = vsel %vm2134_vm4, %v2074_v48, %v2166_v29  ;;  %vm2132_vm5 = vcmp.ge.f32.partialorder %v2066_v58, 0.0  ;;  %v2164_v49 = vmul.f32 0.01, %v2066_v58  ;;  %v2077_v56 = vadd.f32 %v5532_v11, %v1916_v46  ;;  %5369 = vmatprep.subr.bf16.mxu0 %v5730_v10  ;;  %v4994_v48 = vpop.f32.mrf.mxu1  ;;  %v5734_v46 = vld [vmem:[%s7731_s1 + $0x3c0] sm:$0xff]  }
 0x21a   : > { %v4881_v6 = vadd.f32 %v6788_v27, %v6783_v44  ;;  %2230 = vst [vmem:[#allocation2 + $0x121] sm:$0xff] %v7043_v41  ;;  %v2068_v60 = vpop.f32.mrf.mxu0  ;;  %3322 = vmatmul.mubr.bf16.gmra.mxu1 %v7001_v18  ;;  %v1929_v23 = vadd.f32 %v4981_v32, %v7784_v28  ;;  %v7053_v39 = vpack.c.bf16 %v2393_v35, %v2392_v9  ;;  %v7785_v32 = vld [vmem:[#allocation26_spill] sm:$0xff] }
 0x21b   : > { %v7055_v8 = vsel %vm2132_vm5, %v2066_v58, %v2164_v49  ;;  %vm2135_vm6 = vcmp.ge.f32.partialorder %v2077_v56, 0.0  ;;  %v2167_v51 = vmul.f32 0.01, %v2077_v56  ;;  %v2069_v10 = vadd.f32 %v2068_v60, %v1908_v20  ;;  %3475 = vmatmul.mubr.bf16.gmra.mxu0 %v7036_v17  ;;  %3329 = vmatprep.mubr.bf16.mxu1 %v2325_v14  ;;  %v7786_v14 = vld [vmem:[#allocation3_spill] sm:$0xff] }
 0x21c   : > { %v4978_v44 = vadd.f32 %v6811_v59, %v6800_v63  ;;  %2228 = vst [vmem:[#allocation2 + $0x109] sm:$0xff] %v7055_v8  ;;  %v5535_v27 = vpop.f32.mrf.mxu0  ;;  %3482 = vmatprep.mubr.bf16.mxu0 %v7053_v39  ;;  %v1921_v45 = vadd.f32 %v4975_v31, %v7785_v32  ;;  %v1932_v5 = vadd.f32 %v4984_v25, %v6774_v21  ;;  %v2344_v63 = vld [vmem:[#allocation2 + $0x62] sm:$0xff]  ;;  %v2345_v59 = vld [vmem:[#allocation2 + $0x6a] sm:$0xff]  ;;  %v4995_v25 = vpop.f32.mrf.mxu1 }
 0x21d   : > { %5370 = vmatpush3.bf16.msra.mxu0 %v5732_v3  ;;  %v7070_v61 = vsel %vm2135_vm6, %v2077_v56, %v2167_v51  ;;  %vm2133_vm7 = vcmp.ge.f32.partialorder %v2069_v10, 0.0  ;;  %v2165_v16 = vmul.f32 0.01, %v2069_v10  ;;  %v2090_v33 = vadd.f32 %v5535_v27, %v1929_v23  ;;  %v7787_v58 = vld [vmem:[#allocation31_spill] sm:$0xff]  ;;  %v2395_v56 = vld [vmem:[#allocation2 + $0x98] sm:$0xff] }
 0x21e   : > { %5371 = vmatprep.subr.bf16.mxu0 %v5733_v12  ;;  %v1784_v20 = vadd.f32 %v4881_v6, %v7786_v14  ;;  %v4993_v29 = vadd.f32 %v4992_v36, %v7003_v1  ;;  %v4884_v21 = vadd.f32 %v7787_v58, %v6794_v19  ;;  %2231 = vst [vmem:[#allocation2 + $0x129] sm:$0xff] %v7070_v61  ;;  %v2081_v35 = vpop.f32.mrf.mxu0  ;;  %v7788_v19 = vld [vmem:[#allocation27_spill] sm:$0xff]  ;;  %v2347_v58 = vld [vmem:[#allocation2 + $0x82] sm:$0xff]  ;;  %v2357_v38 = vld [vmem:[#allocation2 + $0xfa] sm:$0xff] }
 0x21f   : > { %v2332_v31 = vpack.c.bf16 %v7070_v61, %v7043_v41  ;;  %v7079_v11 = vsel %vm2133_vm7, %v2069_v10, %v2165_v16  ;;  %vm2138_vm8 = vcmp.ge.f32.partialorder %v2090_v33, 0.0  ;;  %v2170_v3 = vmul.f32 0.01, %v2090_v33  ;;  %v2394_v51 = vld [vmem:[#allocation2 + $0x90] sm:$0xff]  ;;  %v7789_v10 = vld [vmem:[#allocation4_spill] sm:$0xff]  ;;  %v2355_v42 = vld [vmem:[#allocation2 + $0xe2] sm:$0xff] }
 0x220   : > { %v2082_v49 = vadd.f32 %v2081_v35, %v1921_v45  ;;  %v4987_v9 = vadd.f32 %v6920_v55, %v6894_v13  ;;  %2229 = vst [vmem:[#allocation2 + $0x111] sm:$0xff] %v7079_v11  ;;  %v5536_v1 = vpop.f32.mrf.mxu0  ;;  %v1924_v36 = vadd.f32 %v4978_v44, %v7788_v19  ;;  %v7085_v12 = vpack.c.bf16 %v2345_v59, %v2344_v63  ;;  %v2397_v35 = vld [vmem:[#allocation2 + $0xb0] sm:$0xff]  ;;  %v2354_v24 = vld [vmem:[#allocation2 + $0xda] sm:$0xff] }
 0x221   : > { %v2331_v6 = vpack.c.bf16 %v7079_v11, %v7055_v8  ;;  %5372 = vmatpush3.bf16.msra.mxu0 %v5734_v46  ;;  %v7089_v60 = vsel %vm2138_vm8, %v2090_v33, %v2170_v3  ;;  %v2093_v23 = vadd.f32 %v5536_v1, %v1932_v5  ;;  %v1787_v27 = vadd.f32 %v4884_v21, %v7789_v10  ;;  %v7790_v33 = vld [vmem:[#allocation29_spill] sm:$0xff]  ;;  %v7791_v3 = vld [vmem:[#allocation30_spill] sm:$0xff]  ;;  %v2356_v7 = vld [vmem:[#allocation2 + $0xf2] sm:$0xff] }
 0x222   : > { %vm2136_vm9 = vcmp.ge.f32.partialorder %v2082_v49, 0.0  ;;  %v2168_v28 = vmul.f32 0.01, %v2082_v49  ;;  %v4996_v13 = vadd.f32 %v4995_v25, %v4994_v48  ;;  %2234 = vst [vmem:[#allocation2 + $0x151] sm:$0xff] %v7089_v60  ;;  %v2084_v55 = vpop.f32.mrf.mxu0  ;;  %3330 = vmatmul.mubr.bf16.gmra.mxu1 %v7053_v39  ;;  %v1945_v44 = vadd.f32 %v4993_v29, %v1784_v20  ;;  %v2346_v29 = vld [vmem:[#allocation2 + $0x7a] sm:$0xff] }
 0x223   : > { %v7094_v32 = vpack.c.bf16 %v2395_v56, %v2394_v51  ;;  %vm2139_vm10 = vcmp.ge.f32.partialorder %v2093_v23, 0.0  ;;  %v2171_v46 = vmul.f32 0.01, %v2093_v23  ;;  %v2085_v16 = vadd.f32 %v2084_v55, %v1924_v36  ;;  %3483 = vmatmul.mubr.bf16.gmra.mxu0 %v7085_v12  ;;  %3337 = vmatprep.mubr.bf16.mxu1 %v2326_v43 }
 0x224   : > { %v7096_v45 = vsel %vm2136_vm9, %v2082_v49, %v2168_v28  ;;  %v4990_v48 = vadd.f32 %v6974_v47, %v6947_v37  ;;  %v5539_v5 = vpop.f32.mrf.mxu0  ;;  %v1937_v63 = vadd.f32 %v4987_v9, %v7790_v33  ;;  %v1948_v30 = vadd.f32 %v4996_v13, %v1787_v27  ;;  %v2396_v28 = vld [vmem:[#allocation2 + $0xa8] sm:$0xff] }
 0x225   : > { %2232 = vst [vmem:[#allocation2 + $0x139] sm:$0xff] %v7096_v45  ;;  %3490 = vmatprep.mubr.bf16.mxu0 %v7094_v32  ;;  %v7107_v59 = vsel %vm2139_vm10, %v2093_v23, %v2171_v46  ;;  %vm2137_vm11 = vcmp.ge.f32.partialorder %v2085_v16, 0.0  ;;  %v2169_v14 = vmul.f32 0.01, %v2085_v16  ;;  %v2106_v20 = vadd.f32 %v5539_v5, %v1945_v44  ;;  %v2348_v46 = vld [vmem:[#allocation2 + $0x92] sm:$0xff]  ;;  %v2399_v5 = vld [vmem:[#allocation2 + $0xc8] sm:$0xff] }
 0x226   : > { %2235 = vst [vmem:[#allocation2 + $0x159] sm:$0xff] %v7107_v59  ;;  %v2097_v26 = vpop.f32.mrf.mxu0  ;;  %v2334_v43 = vpack.c.bf16 %v7107_v59, %v7089_v60  ;;  %v1940_v49 = vadd.f32 %v4990_v48, %v7791_v3  ;;  %v7116_v56 = vpack.c.bf16 %v2347_v58, %v2346_v29  ;;  %v7121_v51 = vpack.c.bf16 %v2397_v35, %v2396_v28  ;;  %v2400_v58 = vld [vmem:[#allocation2 + $0xd8] sm:$0xff]  ;;  %v2406_v28 = vld [vmem:[#allocation2 + $0x120] sm:$0xff]  ;;  %v2361_v61 = vld [vmem:[#allocation2 + $0x12a] sm:$0xff] }
 0x227   : > { %v7112_v37 = vsel %vm2137_vm11, %v2085_v16, %v2169_v14  ;;  %vm2142_vm12 = vcmp.ge.f32.partialorder %v2106_v20, 0.0  ;;  %v2174_v47 = vmul.f32 0.01, %v2106_v20  ;;  %v2098_v21 = vadd.f32 %v2097_v26, %v1937_v63  ;;  %v2349_v16 = vld [vmem:[#allocation2 + $0x9a] sm:$0xff]  ;;  %v2350_v63 = vld [vmem:[#allocation2 + $0xaa] sm:$0xff]  ;;  %v2351_v14 = vld [vmem:[#allocation2 + $0xb2] sm:$0xff] }
 0x228   : > { %2233 = vst [vmem:[#allocation2 + $0x141] sm:$0xff] %v7112_v37  ;;  %v5540_v25 = vpop.f32.mrf.mxu0  ;;  %v2333_v9 = vpack.c.bf16 %v7112_v37, %v7096_v45  ;;  %v7136_v4 = vpack.c.bf16 %v2349_v16, %v2348_v46  ;;  %v7146_v29 = vpack.c.bf16 %v2351_v14, %v2350_v63  ;;  %v2358_v8 = vld [vmem:[#allocation2 + $0x10a] sm:$0xff]  ;;  %v2359_v11 = vld [vmem:[#allocation2 + $0x112] sm:$0xff]  ;;  %v2360_v41 = vld [vmem:[#allocation2 + $0x122] sm:$0xff] }
 0x229   : > { %v2206_v1 = vsel %vm2142_vm12, %v2106_v20, %v2174_v47  ;;  %vm2140_vm13 = vcmp.ge.f32.partialorder %v2098_v21, 0.0  ;;  %v2172_v19 = vmul.f32 0.01, %v2098_v21  ;;  %v2109_v36 = vadd.f32 %v5540_v25, %v1948_v30  ;;  %v2401_v20 = vld [vmem:[#allocation2 + $0xe0] sm:$0xff]  ;;  %v2353_v30 = vld [vmem:[#allocation2 + $0xca] sm:$0xff] }
 0x22a   : > { %2238 = vst [vmem:[#allocation2 + $0x181] sm:$0xff] %v2206_v1  ;;  %v2100_v23 = vpop.f32.mrf.mxu0  ;;  %3338 = vmatmul.mubr.bf16.gmra.mxu1 %v7094_v32  ;;  %v7149_v26 = vpack.c.bf16 %v2401_v20, %v2400_v58  ;;  %v2402_v25 = vld [vmem:[#allocation2 + $0xf0] sm:$0xff]  ;;  %v2404_v1 = vld [vmem:[#allocation2 + $0x108] sm:$0xff] }
 0x22b   : > { %v7123_v10 = vsel %vm2140_vm13, %v2098_v21, %v2172_v19  ;;  %vm2143_vm14 = vcmp.ge.f32.partialorder %v2109_v36, 0.0  ;;  %v2175_v27 = vmul.f32 0.01, %v2109_v36  ;;  %v2101_v13 = vadd.f32 %v2100_v23, %v1940_v49  ;;  %3491 = vmatmul.mubr.bf16.gmra.mxu0 %v7116_v56  ;;  %3345 = vmatprep.mubr.bf16.mxu1 %v2327_v0  ;;  %v2403_v21 = vld [vmem:[#allocation2 + $0xf8] sm:$0xff]  ;;  %v2410_v46 = vld [vmem:[#allocation2 + $0x150] sm:$0xff] }
 0x22c   : > { %2236 = vst [vmem:[#allocation2 + $0x169] sm:$0xff] %v7123_v10  ;;  %3498 = vmatprep.mubr.bf16.mxu0 %v7121_v51  ;;  %v7139_v0 = vpack.c.bf16 %v2399_v5, %v2398_v15  ;;  %v7161_v3 = vpack.c.bf16 %v2403_v21, %v2402_v25  ;;  %v7168_v49 = vpack.c.bf16 %v2355_v42, %v2354_v24  ;;  %v2576_v21 = vld [vmem:[#allocation2 + $0x31] sm:$0xff] }
 0x22d   : > { %v2207_v55 = vsel %vm2143_vm14, %v2109_v36, %v2175_v27  ;;  %vm2141_vm15 = vcmp.ge.f32.partialorder %v2101_v13, 0.0  ;;  %v2173_v44 = vmul.f32 0.01, %v2101_v13  ;;  %v7178_v36 = vpack.c.bf16 %v2357_v38, %v2356_v7  ;;  %v2364_v60 = vld [vmem:[#allocation2 + $0x152] sm:$0xff]  ;;  %v2365_v59 = vld [vmem:[#allocation2 + $0x15a] sm:$0xff] }
 0x22e   : > { %2239 = vst [vmem:[#allocation2 + $0x189] sm:$0xff] %v2207_v55  ;;  %v7188_v27 = vpack.c.bf16 %v2359_v11, %v2358_v8  ;;  %v7218_v14 = vpack.c.bf16 %v2365_v59, %v2364_v60  ;;  %v5735_v25 = vld [vmem:[%s7731_s1 + $0x470] sm:$0xff]   ;;  %v2580_v38 = vld [vmem:[#allocation2 + $0x61] sm:$0xff]  ;;  %v2582_v8 = vld [vmem:[#allocation2 + $0x79] sm:$0xff] }
 0x22f   : > { %v7131_v48 = vsel %vm2141_vm15, %v2101_v13, %v2173_v44  ;;  %v2408_v13 = vld [vmem:[#allocation2 + $0x138] sm:$0xff]  ;;  %v7198_v44 = vpack.c.bf16 %v2361_v61, %v2360_v41  ;;  %v2363_v37 = vld [vmem:[#allocation2 + $0x142] sm:$0xff] }
 0x230   : > { %2237 = vst [vmem:[#allocation2 + $0x171] sm:$0xff] %v7131_v48  ;;  %v2335_v33 = vpack.c.bf16 %v7131_v48, %v7123_v10  ;;  %v5037_v34 = vpop.f32.mrf.mxu1  ;;  %v2362_v45 = vld [vmem:[#allocation2 + $0x13a] sm:$0xff]  ;;  %v2579_v42 = vld [vmem:[#allocation2 + $0x51] sm:$0xff]  ;;  %v2586_v61 = vld [vmem:[#allocation2 + $0xa9] sm:$0xff] }
 0x231   : > { %v7208_v5 = vpack.c.bf16 %v2363_v37, %v2362_v45  ;;  %v2414_v20 = vld [vmem:[#allocation2 + $0x180] sm:$0xff]  ;;  %v2587_v41 = vld [vmem:[#allocation2 + $0xb1] sm:$0xff] }
 0x232   : > { %3346 = vmatmul.mubr.bf16.gmra.mxu1 %v7121_v51  ;;  %v5038_v40 = vpop.f32.mrf.mxu1  ;;  %v2433_v10 = vld [vmem:[#allocation2 + $0x21] sm:$0xff] }
 0x233   : > { %3499 = vmatmul.mubr.bf16.gmra.mxu0 %v7136_v4  ;;  %3353 = vmatprep.mubr.bf16.mxu1 %v2328_v52  ;;  %v2352_v52 = vld [vmem:[#allocation2 + $0xc2] sm:$0xff]  ;;  %v7156_v47 = vadd.f32 %v5038_v40, %v5037_v34  ;;  %v2432_v34 = vld [vmem:[#allocation2 + $0x19] sm:$0xff] }
 0x234   : > { %3506 = vmatprep.mubr.bf16.mxu0 %v7139_v0  ;;  %v7158_v35 = vpack.c.bf16 %v2353_v30, %v2352_v52  ;;  %v2412_v15 = vld [vmem:[#allocation2 + $0x168] sm:$0xff]  ;;  %v2577_v40 = vld [vmem:[#allocation2 + $0x39] sm:$0xff]  ;;  %v2464_v52 = vpack.c.bf16 %v2433_v10, %v2432_v34 }
 0x235   : > { %v2608_v24 = vpack.c.bf16 %v2577_v40, %v2576_v21  ;;  %v5741_v11 = vld [vmem:[%s7731_s1 + $0x440] sm:$0xff]   ;;  %v2597_v40 = vld [vmem:[#allocation2 + $0x129] sm:$0xff] }
 0x237   : > { %v2366_v48 = vld [vmem:[#allocation2 + $0x16a] sm:$0xff] }
 0x23a   : > { %3354 = vmatmul.mubr.bf16.gmra.mxu1 %v7139_v0 }
 0x23b   : > { %3507 = vmatmul.mubr.bf16.gmra.mxu0 %v7146_v29  ;;  %3361 = vmatprep.mubr.bf16.mxu1 %v2329_v2  ;;  %v2405_v2 = vld [vmem:[#allocation2 + $0x110] sm:$0xff] }
 0x23c   : > { %3514 = vmatprep.mubr.bf16.mxu0 %v7149_v26  ;;  %v7171_v19 = vpack.c.bf16 %v2405_v2, %v2404_v1  ;;  %v2578_v2 = vld [vmem:[#allocation2 + $0x49] sm:$0xff]  ;;  %v5737_v1 = vld [vmem:[%s7731_s1 + $0x460] sm:$0xff]  }
 0x23d   : > { %v2609_v7 = vpack.c.bf16 %v2579_v42, %v2578_v2 }
 0x242   : > { %3362 = vmatmul.mubr.bf16.gmra.mxu1 %v7149_v26 }
 0x243   : > { %3515 = vmatmul.mubr.bf16.gmra.mxu0 %v7158_v35  ;;  %3369 = vmatprep.mubr.bf16.mxu1 %v2330_v50  ;;  %v2407_v50 = vld [vmem:[#allocation2 + $0x128] sm:$0xff] }
 0x244   : > { %3522 = vmatprep.mubr.bf16.mxu0 %v7161_v3  ;;  %v7181_v23 = vpack.c.bf16 %v2407_v50, %v2406_v28  ;;  %v5739_v50 = vld [vmem:[%s7731_s1 + $0x450] sm:$0xff]  }
 0x24a   : > { %3370 = vmatmul.mubr.bf16.gmra.mxu1 %v7161_v3 }
 0x24b   : > { %3523 = vmatmul.mubr.bf16.gmra.mxu0 %v7168_v49  ;;  %3377 = vmatprep.mubr.bf16.mxu1 %v2331_v6  ;;  %v2409_v6 = vld [vmem:[#allocation2 + $0x140] sm:$0xff] }
 0x24c   : > { %3530 = vmatprep.mubr.bf16.mxu0 %v7171_v19  ;;  %v7191_v55 = vpack.c.bf16 %v2409_v6, %v2408_v13 }
 0x252   : > { %3378 = vmatmul.mubr.bf16.gmra.mxu1 %v7171_v19 }
 0x253   : > { %3531 = vmatmul.mubr.bf16.gmra.mxu0 %v7178_v36  ;;  %3385 = vmatprep.mubr.bf16.mxu1 %v2332_v31  ;;  %v2411_v31 = vld [vmem:[#allocation2 + $0x158] sm:$0xff] }
 0x254   : > { %3538 = vmatprep.mubr.bf16.mxu0 %v7181_v23  ;;  %v7201_v16 = vpack.c.bf16 %v2411_v31, %v2410_v46  ;;  %v2613_v31 = vpack.c.bf16 %v2587_v41, %v2586_v61 }
 0x25a   : > { %3386 = vmatmul.mubr.bf16.gmra.mxu1 %v7181_v23 }
 0x25b   : > { %3539 = vmatmul.mubr.bf16.gmra.mxu0 %v7188_v27  ;;  %3393 = vmatprep.mubr.bf16.mxu1 %v2333_v9  ;;  %v2413_v9 = vld [vmem:[#allocation2 + $0x170] sm:$0xff] }
 0x25c   : > { %3546 = vmatprep.mubr.bf16.mxu0 %v7191_v55  ;;  %v7211_v63 = vpack.c.bf16 %v2413_v9, %v2412_v15  ;;  %v2594_v15 = vld [vmem:[#allocation2 + $0x109] sm:$0xff] }
 0x262   : > { %3394 = vmatmul.mubr.bf16.gmra.mxu1 %v7191_v55 }
 0x263   : > { %3547 = vmatmul.mubr.bf16.gmra.mxu0 %v7198_v44  ;;  %3401 = vmatprep.mubr.bf16.mxu1 %v2334_v43  ;;  %v2415_v43 = vld [vmem:[#allocation2 + $0x188] sm:$0xff] }
 0x264   : > { %3554 = vmatprep.mubr.bf16.mxu0 %v7201_v16  ;;  %v7221_v58 = vpack.c.bf16 %v2415_v43, %v2414_v20 }
 0x26a   : > { %3402 = vmatmul.mubr.bf16.gmra.mxu1 %v7201_v16 }
 0x26b   : > { %3555 = vmatmul.mubr.bf16.gmra.mxu0 %v7208_v5  ;;  %3409 = vmatprep.mubr.bf16.mxu1 %v2335_v33  ;;  %v2367_v33 = vld [vmem:[#allocation2 + $0x172] sm:$0xff] }
 0x26c   : > { %3562 = vmatprep.mubr.bf16.mxu0 %v7211_v63  ;;  %v7226_v30 = vpack.c.bf16 %v2367_v33, %v2366_v48 }
 0x272   : > { %3410 = vmatmul.mubr.bf16.gmra.mxu1 %v7211_v63 }
 0x273   : > { %3563 = vmatmul.mubr.bf16.gmra.mxu0 %v7218_v14  ;;  %3611 = vmatprep.mubr.bf16.mxu1 %v6928_v53  ;;  %v5736_v53 = vld [vmem:[%s7731_s1 + $0x468] sm:$0xff]  }
 0x274   : > { %3570 = vmatprep.mubr.bf16.mxu0 %v7221_v58 }
 0x27a   : > { %3612 = vmatmul.mubr.bf16.vlgmr.msra.gmra.mxu1 %v2464_v52 }
 0x27b   : > { %3571 = vmatmul.mubr.bf16.gmra.mxu0 %v7226_v30  ;;  %3619 = vmatprep.mubr.bf16.mxu1 %v6982_v62  ;;  %v2581_v62 = vld [vmem:[#allocation2 + $0x69] sm:$0xff] }
 0x27c   : > { %3772 = vmatprep.mubr.bf16.mxu0 %v2608_v24  ;;  %5542 = vmatpush3.bf16.msra.mxu1 %v6859_v22  ;;  %v5738_v22 = vld [vmem:[%s7731_s1 + $0x458] sm:$0xff]   ;;  %v2610_v28 = vpack.c.bf16 %v2581_v62, %v2580_v38 }
 0x27d   : > { %5543 = vmatprep.subr.bf16.mxu1 %v5735_v25 }
 0x280   : > { %5544 = vmatpush3.bf16.msra.mxu1 %v5735_v25 }
 0x281   : > { %5545 = vmatprep.subr.bf16.mxu1 %v5736_v53 }
 0x282   : > { %3620 = vmatmul.mubr.bf16.gmra.mxu1 %v2608_v24 }
 0x283   : > { %3773 = vmatmul.mubr.bf16.vlgmr.msra.gmra.mxu0 %v6892_v54  ;;  %3627 = vmatprep.mubr.bf16.mxu1 %v7036_v17  ;;  %v5740_v54 = vld [vmem:[%s7731_s1 + $0x448] sm:$0xff]  }
 0x284   : > { %3780 = vmatprep.mubr.bf16.mxu0 %v2609_v7  ;;  %5546 = vmatpush3.bf16.msra.mxu1 %v5736_v53  ;;  %v2583_v17 = vld [vmem:[#allocation2 + $0x81] sm:$0xff] }
 0x285   : > { %5547 = vmatprep.subr.bf16.mxu1 %v5737_v1  ;;  %v2611_v6 = vpack.c.bf16 %v2583_v17, %v2582_v8  ;;  %v2599_v17 = vld [vmem:[#allocation2 + $0x141] sm:$0xff] }
 0x288   : > { %5548 = vmatpush3.bf16.msra.mxu1 %v5737_v1 }
 0x289   : > { %5549 = vmatprep.subr.bf16.mxu1 %v5738_v22 }
 0x28a   : > { %3628 = vmatmul.mubr.bf16.gmra.mxu1 %v2609_v7 }
 0x28b   : > { %3781 = vmatmul.mubr.bf16.gmra.mxu0 %v6945_v57  ;;  %3635 = vmatprep.mubr.bf16.mxu1 %v7085_v12  ;;  %v2585_v57 = vld [vmem:[#allocation2 + $0x99] sm:$0xff]  ;;  %v2584_v12 = vld [vmem:[#allocation2 + $0x91] sm:$0xff] }
 0x28c   : > { %3788 = vmatprep.mubr.bf16.mxu0 %v2610_v28  ;;  %5550 = vmatpush3.bf16.msra.mxu1 %v5738_v22  ;;  %v2612_v13 = vpack.c.bf16 %v2585_v57, %v2584_v12 }
 0x28d   : > { %5551 = vmatprep.subr.bf16.mxu1 %v5739_v50 }
 0x290   : > { %5552 = vmatpush3.bf16.msra.mxu1 %v5739_v50 }
 0x291   : > { %5553 = vmatprep.subr.bf16.mxu1 %v5740_v54 }
 0x292   : > { %3636 = vmatmul.mubr.bf16.gmra.mxu1 %v2610_v28 }
 0x293   : > { %3789 = vmatmul.mubr.bf16.gmra.mxu0 %v7001_v18  ;;  %3643 = vmatprep.mubr.bf16.mxu1 %v7116_v56  ;;  %v2589_v18 = vld [vmem:[#allocation2 + $0xc9] sm:$0xff]  ;;  %v2588_v56 = vld [vmem:[#allocation2 + $0xc1] sm:$0xff] }
 0x294   : > { %3796 = vmatprep.mubr.bf16.mxu0 %v2611_v6  ;;  %5554 = vmatpush3.bf16.msra.mxu1 %v5740_v54  ;;  %v2614_v46 = vpack.c.bf16 %v2589_v18, %v2588_v56 }
 0x295   : > { %5555 = vmatprep.subr.bf16.mxu1 %v5741_v11 }
 0x298   : > { %5556 = vmatpush3.bf16.msra.mxu1 %v5741_v11 }
 0x29a   : > { %3644 = vmatmul.mubr.bf16.gmra.mxu1 %v2611_v6 }
 0x29b   : > { %3797 = vmatmul.mubr.bf16.gmra.mxu0 %v7053_v39  ;;  %3651 = vmatprep.mubr.bf16.mxu1 %v7136_v4  ;;  %v2591_v39 = vld [vmem:[#allocation2 + $0xe1] sm:$0xff]  ;;  %v2590_v4 = vld [vmem:[#allocation2 + $0xd9] sm:$0xff] }
 0x29c   : > { %3804 = vmatprep.mubr.bf16.mxu0 %v2612_v13  ;;  %v2615_v45 = vpack.c.bf16 %v2591_v39, %v2590_v4 }
 0x2a2   : > { %3652 = vmatmul.mubr.bf16.gmra.mxu1 %v2612_v13 }
 0x2a3   : > { %3805 = vmatmul.mubr.bf16.gmra.mxu0 %v7094_v32  ;;  %3659 = vmatprep.mubr.bf16.mxu1 %v7146_v29  ;;  %v2593_v32 = vld [vmem:[#allocation2 + $0xf9] sm:$0xff]  ;;  %v2592_v29 = vld [vmem:[#allocation2 + $0xf1] sm:$0xff] }
 0x2a4   : > { %3812 = vmatprep.mubr.bf16.mxu0 %v2613_v31  ;;  %v2616_v37 = vpack.c.bf16 %v2593_v32, %v2592_v29  ;;  %v2601_v29 = vld [vmem:[#allocation2 + $0x159] sm:$0xff] }
 0x2aa   : > { %3660 = vmatmul.mubr.bf16.gmra.mxu1 %v2613_v31 }
 0x2ab   : > { %3813 = vmatmul.mubr.bf16.gmra.mxu0 %v7121_v51  ;;  %3667 = vmatprep.mubr.bf16.mxu1 %v7158_v35  ;;  %v5040_v51 = vpop.f32.mrf.mxu1  ;;  %v2595_v35 = vld [vmem:[#allocation2 + $0x111] sm:$0xff] }
 0x2ac   : > { %3820 = vmatprep.mubr.bf16.mxu0 %v2614_v46  ;;  %v2617_v59 = vpack.c.bf16 %v2595_v35, %v2594_v15 }
 0x2ad   : > { %v5041_v9 = vpop.f32.mrf.mxu1 }
 0x2ae   : > { %v5042_v10 = vadd.f32 %v5041_v9, %v5040_v51 }
 0x2b2   : > { %3668 = vmatmul.mubr.bf16.gmra.mxu1 %v2614_v46 }
 0x2b3   : > { %3821 = vmatmul.mubr.bf16.gmra.mxu0 %v7139_v0  ;;  %3675 = vmatprep.mubr.bf16.mxu1 %v7168_v49  ;;  %v7271_v0 = vld [vmem:[%s7732_s2 + $0x1] ss:$0 sm:$0xff] }
 0x2b4   : > { %3828 = vmatprep.mubr.bf16.mxu0 %v2615_v45  ;;  %v3292_v20 = vadd.f32 %v7156_v47, %v7271_v0 }
 0x2ba   : > { %3676 = vmatmul.mubr.bf16.gmra.mxu1 %v2615_v45 }
 0x2bb   : > { %3829 = vmatmul.mubr.bf16.gmra.mxu0 %v7149_v26  ;;  %3683 = vmatprep.mubr.bf16.mxu1 %v7178_v36 }
 0x2bc   : > { %3836 = vmatprep.mubr.bf16.mxu0 %v2616_v37 }
 0x2c2   : > { %v5043_v60 = vpop.f32.mrf.mxu1  ;;  %3684 = vmatmul.mubr.bf16.gmra.mxu1 %v2616_v37 }
 0x2c3   : > { %v5149_v49 = vpop.f32.mrf.mxu0  ;;  %3837 = vmatmul.mubr.bf16.gmra.mxu0 %v7161_v3  ;;  %3691 = vmatprep.mubr.bf16.mxu1 %v7188_v27  ;;  %v2596_v3 = vld [vmem:[#allocation2 + $0x121] sm:$0xff]  ;;  %v3295_v27 = vadd.f32 %v5042_v10, %v7271_v0 }
 0x2c4   : > { %3844 = vmatprep.mubr.bf16.mxu0 %v2617_v59  ;;  %v5044_v26 = vpop.f32.mrf.mxu1  ;;  %v2618_v2 = vpack.c.bf16 %v2597_v40, %v2596_v3  ;;  %v2603_v40 = vld [vmem:[#allocation2 + $0x171] sm:$0xff] }
 0x2c5   : > { %v5045_v36 = vadd.f32 %v5044_v26, %v5043_v60  ;;  %v5150_v43 = vpop.f32.mrf.mxu0 }
 0x2c6   : > { %v5151_v48 = vadd.f32 %v5150_v43, %v5149_v49  ;;  %v5046_v33 = vpop.f32.mrf.mxu1 }
 0x2c7   : > { %v5152_v34 = vpop.f32.mrf.mxu0  ;;  %v3300_v38 = vadd.f32 %v5045_v36, %v7271_v0 }
 0x2c8   : > { %v7277_v52 = vadd.f32 %v5151_v48, %v3292_v20  ;;  %v5047_v21 = vpop.f32.mrf.mxu1 }
 0x2c9   : > { %v5048_v25 = vadd.f32 %v5047_v21, %v5046_v33  ;;  %v5153_v24 = vpop.f32.mrf.mxu0 }
 0x2ca   : > { %v5154_v53 = vadd.f32 %v5153_v24, %v5152_v34  ;;  %v5049_v42 = vpop.f32.mrf.mxu1  ;;  %3692 = vmatmul.mubr.bf16.gmra.mxu1 %v2617_v59 }
 0x2cb   : > { %v5155_v1 = vpop.f32.mrf.mxu0  ;;  %3845 = vmatmul.mubr.bf16.gmra.mxu0 %v7171_v19  ;;  %3699 = vmatprep.mubr.bf16.mxu1 %v7198_v44  ;;  %v2598_v19 = vld [vmem:[#allocation2 + $0x139] sm:$0xff]  ;;  %v3303_v44 = vadd.f32 %v5048_v25, %v7271_v0 }
 0x2cc   : > { %v7282_v47 = vadd.f32 %v5154_v53, %v3295_v27  ;;  %3852 = vmatprep.mubr.bf16.mxu0 %v2618_v2  ;;  %v5050_v7 = vpop.f32.mrf.mxu1  ;;  %v2619_v41 = vpack.c.bf16 %v2599_v17, %v2598_v19  ;;  %v2511_v17 = vld [vmem:[#allocation2 + $0x18a] sm:$0xff] }
 0x2cd   : > { %v5051_v22 = vadd.f32 %v5050_v7, %v5049_v42  ;;  %v5156_v62 = vpop.f32.mrf.mxu0 }
 0x2ce   : > { %v5157_v50 = vadd.f32 %v5156_v62, %v5155_v1  ;;  %v5052_v28 = vpop.f32.mrf.mxu1 }
 0x2cf   : > { %v5158_v54 = vpop.f32.mrf.mxu0  ;;  %v3308_v39 = vadd.f32 %v5051_v22, %v7271_v0 }
 0x2d0   : > { %v7285_v8 = vadd.f32 %v5157_v50, %v3300_v38  ;;  %v5053_v11 = vpop.f32.mrf.mxu1 }
 0x2d1   : > { %v5054_v6 = vadd.f32 %v5053_v11, %v5052_v28  ;;  %v5159_v57 = vpop.f32.mrf.mxu0 }
 0x2d2   : > { %v5160_v12 = vadd.f32 %v5159_v57, %v5158_v54  ;;  %v5055_v13 = vpop.f32.mrf.mxu1  ;;  %3700 = vmatmul.mubr.bf16.gmra.mxu1 %v2618_v2  ;;  %v2510_v54 = vld [vmem:[#allocation2 + $0x182] sm:$0xff] }
 0x2d3   : > { %v5161_v61 = vpop.f32.mrf.mxu0  ;;  %3853 = vmatmul.mubr.bf16.gmra.mxu0 %v7181_v23  ;;  %3707 = vmatprep.mubr.bf16.mxu1 %v7208_v5  ;;  %v2600_v23 = vld [vmem:[#allocation2 + $0x151] sm:$0xff]  ;;  %v3311_v5 = vadd.f32 %v5054_v6, %v7271_v0  ;;  %v2605_v6 = vld [vmem:[#allocation2 + $0x189] sm:$0xff] }
 0x2d4   : > { %v7290_v31 = vadd.f32 %v5160_v12, %v3303_v44  ;;  %3860 = vmatprep.mubr.bf16.mxu0 %v2619_v41  ;;  %v5056_v18 = vpop.f32.mrf.mxu1  ;;  %v2620_v59 = vpack.c.bf16 %v2601_v29, %v2600_v23  ;;  %v2604_v12 = vld [vmem:[#allocation2 + $0x181] sm:$0xff]  ;;  %v2624_v23 = vld [vmem:[#allocation2 + $0x32] sm:$0xff] }
 0x2d5   : > { %v5057_v56 = vadd.f32 %v5056_v18, %v5055_v13  ;;  %v5162_v46 = vpop.f32.mrf.mxu0  ;;  %v2622_v18 = vpack.c.bf16 %v2605_v6, %v2604_v12  ;;  %v2607_v29 = vld [vmem:[#allocation2 + $0x1a1] sm:$0xff] }
 0x2d6   : > { %v5163_v4 = vadd.f32 %v5162_v46, %v5161_v61  ;;  %v5058_v45 = vpop.f32.mrf.mxu1 }
 0x2d7   : > { %v5164_v32 = vpop.f32.mrf.mxu0  ;;  %v3316_v10 = vadd.f32 %v5057_v56, %v7271_v0 }
 0x2d8   : > { %v7293_v37 = vadd.f32 %v5163_v4, %v3308_v39  ;;  %v5059_v51 = vpop.f32.mrf.mxu1 }
 0x2d9   : > { %v5060_v35 = vadd.f32 %v5059_v51, %v5058_v45  ;;  %v5165_v9 = vpop.f32.mrf.mxu0 }
 0x2da   : > { %v5166_v15 = vadd.f32 %v5165_v9, %v5164_v32  ;;  %v5061_v60 = vpop.f32.mrf.mxu1  ;;  %3708 = vmatmul.mubr.bf16.gmra.mxu1 %v2619_v41  ;;  %v2606_v32 = vld [vmem:[#allocation2 + $0x199] sm:$0xff] }
 0x2db   : > { %v5167_v49 = vpop.f32.mrf.mxu0  ;;  %3861 = vmatmul.mubr.bf16.gmra.mxu0 %v7191_v55  ;;  %3715 = vmatprep.mubr.bf16.mxu1 %v7218_v14  ;;  %v2602_v55 = vld [vmem:[#allocation2 + $0x169] sm:$0xff]  ;;  %v3319_v14 = vadd.f32 %v5060_v35, %v7271_v0 }
 0x2dc   : > { %v7298_v26 = vadd.f32 %v5166_v15, %v3311_v5  ;;  %3868 = vmatprep.mubr.bf16.mxu0 %v2620_v59  ;;  %v5062_v36 = vpop.f32.mrf.mxu1  ;;  %v2621_v42 = vpack.c.bf16 %v2603_v40, %v2602_v55  ;;  %v2625_v5 = vld [vmem:[#allocation2 + $0x3a] sm:$0xff]  ;;  %v2627_v55 = vld [vmem:[#allocation2 + $0x52] sm:$0xff] }
 0x2dd   : > { %v5063_v43 = vadd.f32 %v5062_v36, %v5061_v60  ;;  %v5168_v20 = vpop.f32.mrf.mxu0 }
 0x2de   : > { %v5169_v48 = vadd.f32 %v5168_v20, %v5167_v49  ;;  %v5064_v33 = vpop.f32.mrf.mxu1 }
 0x2df   : > { %v5170_v34 = vpop.f32.mrf.mxu0  ;;  %v3324_v38 = vadd.f32 %v5063_v43, %v7271_v0  ;;  %v2656_v43 = vpack.c.bf16 %v2625_v5, %v2624_v23 }
 0x2e0   : > { %v7301_v21 = vadd.f32 %v5169_v48, %v3316_v10  ;;  %v5065_v25 = vpop.f32.mrf.mxu1 }
 0x2e1   : > { %v5066_v24 = vadd.f32 %v5065_v25, %v5064_v33  ;;  %v5171_v3 = vpop.f32.mrf.mxu0 }
 0x2e2   : > { %v5172_v27 = vadd.f32 %v5171_v3, %v5170_v34  ;;  %v5067_v53 = vpop.f32.mrf.mxu1  ;;  %3716 = vmatmul.mubr.bf16.gmra.mxu1 %v2620_v59  ;;  %v2623_v59 = vpack.c.bf16 %v2607_v29, %v2606_v32  ;;  %v2626_v3 = vld [vmem:[#allocation2 + $0x4a] sm:$0xff]  ;;  %v2633_v32 = vld [vmem:[#allocation2 + $0x9a] sm:$0xff] }
 0x2e3   : > { %v5173_v2 = vpop.f32.mrf.mxu0  ;;  %3869 = vmatmul.mubr.bf16.gmra.mxu0 %v7201_v16  ;;  %3723 = vmatprep.mubr.bf16.mxu1 %v7226_v30  ;;  %v7311_v30 = vpack.c.bf16 %v2511_v17, %v2510_v54  ;;  %v3327_v13 = vadd.f32 %v5066_v24, %v7271_v0 }
 0x2e4   : > { %v7306_v1 = vadd.f32 %v5172_v27, %v3319_v14  ;;  %3876 = vmatprep.mubr.bf16.mxu0 %v2621_v42  ;;  %v5068_v7 = vpop.f32.mrf.mxu1 }
 0x2e5   : > { %v5069_v22 = vadd.f32 %v5068_v7, %v5067_v53  ;;  %v5174_v62 = vpop.f32.mrf.mxu0 }
 0x2e6   : > { %v5175_v50 = vadd.f32 %v5174_v62, %v5173_v2  ;;  %v5070_v28 = vpop.f32.mrf.mxu1  ;;  %v2629_v2 = vld [vmem:[#allocation2 + $0x6a] sm:$0xff] }
 0x2e7   : > { %v5176_v11 = vpop.f32.mrf.mxu0  ;;  %v3332_v51 = vadd.f32 %v5069_v22, %v7271_v0  ;;  %v5743_v22 = vld [vmem:[#allocation2] sm:$0xff] }
 0x2e8   : > { %v7309_v57 = vadd.f32 %v5175_v50, %v3324_v38  ;;  %v5071_v19 = vpop.f32.mrf.mxu1  ;;  %v2575_v62 = vpack.c.bf16 %v5743_v22, %v5743_v22  ;;  %v2657_v50 = vpack.c.bf16 %v2627_v55, %v2626_v3  ;;  %v2636_v55 = vld [vmem:[#allocation2 + $0xc2] sm:$0xff] }
 0x2e9   : > { %v5072_v16 = vadd.f32 %v5071_v19, %v5070_v28  ;;  %v5177_v44 = vpop.f32.mrf.mxu0 }
 0x2ea   : > { %v5178_v41 = vadd.f32 %v5177_v44, %v5176_v11  ;;  %v5073_v61 = vpop.f32.mrf.mxu1  ;;  %3724 = vmatmul.mubr.bf16.gmra.mxu1 %v2621_v42  ;;  %v2628_v42 = vld [vmem:[#allocation2 + $0x62] sm:$0xff] }
 0x2eb   : > { %v5179_v56 = vpop.f32.mrf.mxu0  ;;  %3877 = vmatmul.mubr.bf16.gmra.mxu0 %v7211_v63  ;;  %3731 = vmatprep.mubr.bf16.mxu1 %v7311_v30  ;;  %v3335_v20 = vadd.f32 %v5072_v16, %v7271_v0  ;;  %v2658_v17 = vpack.c.bf16 %v2629_v2, %v2628_v42 }
 0x2ec   : > { %v7316_v46 = vadd.f32 %v5178_v41, %v3327_v13  ;;  %3884 = vmatprep.mubr.bf16.mxu0 %v2622_v18  ;;  %v5074_v39 = vpop.f32.mrf.mxu1 }
 0x2ed   : > { %v5075_v4 = vadd.f32 %v5074_v39, %v5073_v61  ;;  %v5180_v45 = vpop.f32.mrf.mxu0  ;;  %v2630_v61 = vld [vmem:[#allocation2 + $0x7a] sm:$0xff] }
 0x2ee   : > { %v5181_v35 = vadd.f32 %v5180_v45, %v5179_v56  ;;  %v5076_v9 = vpop.f32.mrf.mxu1  ;;  %v2632_v45 = vld [vmem:[#allocation2 + $0x92] sm:$0xff] }
 0x2ef   : > { %v5182_v15 = vpop.f32.mrf.mxu0  ;;  %v3340_v14 = vadd.f32 %v5075_v4, %v7271_v0 }
 0x2f0   : > { %v7319_v60 = vadd.f32 %v5181_v35, %v3332_v51  ;;  %v5077_v63 = vpop.f32.mrf.mxu1 }
 0x2f1   : > { %v5078_v49 = vadd.f32 %v5077_v63, %v5076_v9  ;;  %v5183_v36 = vpop.f32.mrf.mxu0 }
 0x2f2   : > { %v5184_v10 = vadd.f32 %v5183_v36, %v5182_v15  ;;  %v5079_v48 = vpop.f32.mrf.mxu1  ;;  %3732 = vmatmul.mubr.bf16.gmra.mxu1 %v2622_v18  ;;  %v2631_v18 = vld [vmem:[#allocation2 + $0x82] sm:$0xff]  ;;  %v2660_v15 = vpack.c.bf16 %v2633_v32, %v2632_v45 }
 0x2f3   : > { %v5185_v33 = vpop.f32.mrf.mxu0  ;;  %3885 = vmatmul.mubr.bf16.gmra.mxu0 %v7221_v58  ;;  %5557 = vmatprep.mubr.bf16.mxu1 %v2656_v43  ;;  %v3343_v11 = vadd.f32 %v5078_v49, %v7271_v0  ;;  %v2659_v9 = vpack.c.bf16 %v2631_v18, %v2630_v61  ;;  %v2640_v18 = vld [vmem:[#allocation2 + $0xf2] sm:$0xff] }
 0x2f4   : > { %v7323_v34 = vadd.f32 %v5184_v10, %v3335_v20  ;;  %v5080_v40 = vpop.f32.mrf.mxu1  ;;  %3892 = vmatprep.mubr.bf16.mxu0 %v2623_v59 }
 0x2f5   : > { %v5081_v25 = vadd.f32 %v5080_v40, %v5079_v48  ;;  %v5186_v24 = vpop.f32.mrf.mxu0  ;;  %v2635_v40 = vld [vmem:[#allocation2 + $0xb2] sm:$0xff] }
 0x2f6   : > { %v5187_v27 = vadd.f32 %v5186_v24, %v5185_v33  ;;  %v5082_v53 = vpop.f32.mrf.mxu1  ;;  %v2634_v33 = vld [vmem:[#allocation2 + $0xaa] sm:$0xff] }
 0x2f7   : > { %v5188_v7 = vpop.f32.mrf.mxu0  ;;  %v3348_v56 = vadd.f32 %v5081_v25, %v7271_v0  ;;  %v2661_v2 = vpack.c.bf16 %v2635_v40, %v2634_v33 }
 0x2f8   : > { %v7326_v38 = vadd.f32 %v5187_v27, %v3340_v14  ;;  %v5083_v58 = vpop.f32.mrf.mxu1  ;;  %v2637_v14 = vld [vmem:[#allocation2 + $0xca] sm:$0xff] }
 0x2f9   : > { %v5084_v28 = vadd.f32 %v5083_v58, %v5082_v53  ;;  %v5189_v54 = vpop.f32.mrf.mxu0 }
 0x2fa   : > { %v5190_v6 = vadd.f32 %v5189_v54, %v5188_v7  ;;  %v5085_v19 = vpop.f32.mrf.mxu1  ;;  %5558 = vmatmul.mubr.bf16.vlgmr.msra.gmra.mxu1 %v2657_v50 }
 0x2fb   : > { %v5191_v16 = vpop.f32.mrf.mxu0  ;;  %3893 = vmatmul.mubr.bf16.gmra.mxu0 %v2575_v62  ;;  %5561 = vmatprep.mubr.bf16.mxu1 %v2658_v17  ;;  %v3351_v63 = vadd.f32 %v5084_v28, %v7271_v0  ;;  %v2662_v62 = vpack.c.bf16 %v2637_v14, %v2636_v55 }
 0x2fc   : > { %v7329_v44 = vadd.f32 %v5190_v6, %v3343_v11  ;;  %v5086_v12 = vpop.f32.mrf.mxu1 }
 0x2fd   : > { %v5087_v13 = vadd.f32 %v5086_v12, %v5085_v19  ;;  %v5192_v41 = vpop.f32.mrf.mxu0  ;;  %v2639_v12 = vld [vmem:[#allocation2 + $0xe2] sm:$0xff] }
 0x2fe   : > { %v5193_v39 = vadd.f32 %v5192_v41, %v5191_v16  ;;  %v5088_v4 = vpop.f32.mrf.mxu1  ;;  %v2638_v16 = vld [vmem:[#allocation2 + $0xda] sm:$0xff] }
 0x2ff   : > { %v5194_v29 = vpop.f32.mrf.mxu0  ;;  %v3356_v25 = vadd.f32 %v5087_v13, %v7271_v0  ;;  %v2663_v32 = vpack.c.bf16 %v2639_v12, %v2638_v16  ;;  %v2646_v16 = vld [vmem:[#allocation2 + $0x13a] sm:$0xff]  ;;  %v2647_v12 = vld [vmem:[#allocation2 + $0x142] sm:$0xff] }
 0x300   : > { %v7332_v51 = vadd.f32 %v5193_v39, %v3348_v56  ;;  %v5089_v35 = vpop.f32.mrf.mxu1  ;;  %v2641_v56 = vld [vmem:[#allocation2 + $0xfa] sm:$0xff] }
 0x301   : > { %v5090_v23 = vadd.f32 %v5089_v35, %v5088_v4  ;;  %v5195_v5 = vpop.f32.mrf.mxu0 }
 0x302   : > { %v5196_v59 = vadd.f32 %v5195_v5, %v5194_v29  ;;  %v5091_v49 = vpop.f32.mrf.mxu1  ;;  %5562 = vmatmul.mubr.bf16.gmra.mxu1 %v2659_v9  ;;  %v2664_v9 = vpack.c.bf16 %v2641_v56, %v2640_v18  ;;  %v2648_v18 = vld [vmem:[#allocation2 + $0x152] sm:$0xff]  ;;  %v2649_v56 = vld [vmem:[#allocation2 + $0x15a] sm:$0xff] }
 0x303   : > { %v5197_v36 = vpop.f32.mrf.mxu0  ;;  %5565 = vmatprep.mubr.bf16.mxu1 %v2660_v15  ;;  %v3359_v58 = vadd.f32 %v5090_v23, %v7271_v0 }
 0x304   : > { %v7335_v43 = vadd.f32 %v5196_v59, %v3351_v63  ;;  %v5092_v20 = vpop.f32.mrf.mxu1 }
 0x305   : > { %v5093_v10 = vadd.f32 %v5092_v20, %v5091_v49  ;;  %v5198_v48 = vpop.f32.mrf.mxu0 }
 0x306   : > { %v5199_v24 = vadd.f32 %v5198_v48, %v5197_v36  ;;  %v5094_v3 = vpop.f32.mrf.mxu1  ;;  %v2643_v48 = vld [vmem:[#allocation2 + $0x112] sm:$0xff] }
 0x307   : > { %v5200_v27 = vpop.f32.mrf.mxu0  ;;  %v3364_v13 = vadd.f32 %v5093_v10, %v7271_v0  ;;  %v2642_v10 = vld [vmem:[#allocation2 + $0x10a] sm:$0xff] }
 0x308   : > { %v7338_v53 = vadd.f32 %v5199_v24, %v3356_v25  ;;  %v5095_v42 = vpop.f32.mrf.mxu1  ;;  %v2644_v24 = vld [vmem:[#allocation2 + $0x122] sm:$0xff] }
 0x309   : > { %v5096_v7 = vadd.f32 %v5095_v42, %v5094_v3  ;;  %v5201_v22 = vpop.f32.mrf.mxu0  ;;  %v2645_v3 = vld [vmem:[#allocation2 + $0x12a] sm:$0xff]  ;;  %v2665_v42 = vpack.c.bf16 %v2643_v48, %v2642_v10 }
 0x30a   : > { %v5202_v50 = vadd.f32 %v5201_v22, %v5200_v27  ;;  %v5097_v28 = vpop.f32.mrf.mxu1  ;;  %5566 = vmatmul.mubr.bf16.gmra.mxu1 %v2661_v2  ;;  %v2666_v22 = vpack.c.bf16 %v2645_v3, %v2644_v24 }
 0x30b   : > { %v5203_v54 = vpop.f32.mrf.mxu0  ;;  %5569 = vmatprep.mubr.bf16.mxu1 %v2662_v62  ;;  %v3367_v23 = vadd.f32 %v5096_v7, %v7271_v0 }
 0x30c   : > { %v7341_v17 = vadd.f32 %v5202_v50, %v3359_v58  ;;  %v5098_v11 = vpop.f32.mrf.mxu1 }
 0x30d   : > { %v5099_v6 = vadd.f32 %v5098_v11, %v5097_v28  ;;  %v5204_v19 = vpop.f32.mrf.mxu0 }
 0x30e   : > { %v5205_v41 = vadd.f32 %v5204_v19, %v5203_v54  ;;  %v5100_v61 = vpop.f32.mrf.mxu1 }
 0x30f   : > { %v5206_v39 = vpop.f32.mrf.mxu0  ;;  %v3372_v33 = vadd.f32 %v5099_v6, %v7271_v0 }
 0x310   : > { %v7344_v4 = vadd.f32 %v5205_v41, %v3364_v13  ;;  %v5101_v45 = vpop.f32.mrf.mxu1 }
 0x311   : > { %v5102_v29 = vadd.f32 %v5101_v45, %v5100_v61  ;;  %v5207_v35 = vpop.f32.mrf.mxu0 }
 0x312   : > { %v5208_v5 = vadd.f32 %v5207_v35, %v5206_v39  ;;  %v5103_v15 = vpop.f32.mrf.mxu1  ;;  %5570 = vmatmul.mubr.bf16.gmra.mxu1 %v2663_v32 }
 0x313   : > { %v5209_v63 = vpop.f32.mrf.mxu0  ;;  %5573 = vmatprep.mubr.bf16.mxu1 %v2664_v9  ;;  %v3375_v62 = vadd.f32 %v5102_v29, %v7271_v0  ;;  %v2667_v29 = vpack.c.bf16 %v2647_v12, %v2646_v16 }
 0x314   : > { %v7347_v59 = vadd.f32 %v5208_v5, %v3367_v23  ;;  %v5104_v49 = vpop.f32.mrf.mxu1  ;;  %v2668_v23 = vpack.c.bf16 %v2649_v56, %v2648_v18 }
 0x315   : > { %v5105_v36 = vadd.f32 %v5104_v49, %v5103_v15  ;;  %v5210_v20 = vpop.f32.mrf.mxu0 }
 0x316   : > { %v5211_v40 = vadd.f32 %v5210_v20, %v5209_v63  ;;  %v5106_v25 = vpop.f32.mrf.mxu1 }
 0x317   : > { %v5212_v55 = vpop.f32.mrf.mxu0  ;;  %v3380_v13 = vadd.f32 %v5105_v36, %v7271_v0 }
 0x318   : > { %v7350_v14 = vadd.f32 %v5211_v40, %v3372_v33  ;;  %v5107_v27 = vpop.f32.mrf.mxu1  ;;  %v2650_v33 = vld [vmem:[#allocation2 + $0x16a] sm:$0xff]  ;;  %v2651_v40 = vld [vmem:[#allocation2 + $0x172] sm:$0xff] }
 0x319   : > { %v5108_v2 = vadd.f32 %v5107_v27, %v5106_v25  ;;  %v5213_v7 = vpop.f32.mrf.mxu0 }
 0x31a   : > { %v5214_v58 = vadd.f32 %v5213_v7, %v5212_v55  ;;  %v5109_v50 = vpop.f32.mrf.mxu1  ;;  %5574 = vmatmul.mubr.bf16.gmra.mxu1 %v2665_v42 }
 0x31b   : > { %v5215_v28 = vpop.f32.mrf.mxu0  ;;  %5577 = vmatprep.mubr.bf16.mxu1 %v2666_v22  ;;  %v3383_v5 = vadd.f32 %v5108_v2, %v7271_v0  ;;  %v2669_v2 = vpack.c.bf16 %v2651_v40, %v2650_v33 }
 0x31c   : > { %v7353_v54 = vadd.f32 %v5214_v58, %v3375_v62  ;;  %v5110_v11 = vpop.f32.mrf.mxu1 }
 0x31d   : > { %v5111_v6 = vadd.f32 %v5110_v11, %v5109_v50  ;;  %v5216_v19 = vpop.f32.mrf.mxu0  ;;  %v2654_v11 = vld [vmem:[#allocation2 + $0x19a] sm:$0xff] }
 0x31e   : > { %v5217_v41 = vadd.f32 %v5216_v19, %v5215_v28  ;;  %v5112_v61 = vpop.f32.mrf.mxu1  ;;  %v2655_v19 = vld [vmem:[#allocation2 + $0x1a2] sm:$0xff] }
 0x31f   : > { %v5218_v39 = vpop.f32.mrf.mxu0  ;;  %v3388_v25 = vadd.f32 %v5111_v6, %v7271_v0  ;;  %v2671_v56 = vpack.c.bf16 %v2655_v19, %v2654_v11 }
 0x320   : > { %v7356_v45 = vadd.f32 %v5217_v41, %v3380_v13  ;;  %v5113_v32 = vpop.f32.mrf.mxu1 }
 0x321   : > { %v5114_v35 = vadd.f32 %v5113_v32, %v5112_v61  ;;  %v5219_v9 = vpop.f32.mrf.mxu0 }
 0x322   : > { %v5220_v15 = vadd.f32 %v5219_v9, %v5218_v39  ;;  %v5115_v63 = vpop.f32.mrf.mxu1  ;;  %5578 = vmatmul.mubr.bf16.gmra.mxu1 %v2667_v29 }
 0x323   : > { %v5221_v49 = vpop.f32.mrf.mxu0  ;;  %5581 = vmatprep.mubr.bf16.mxu1 %v2668_v23  ;;  %v3391_v62 = vadd.f32 %v5114_v35, %v7271_v0 }
 0x324   : > { %v7359_v36 = vadd.f32 %v5220_v15, %v3383_v5  ;;  %v5116_v20 = vpop.f32.mrf.mxu1 }
 0x325   : > { %v5117_v10 = vadd.f32 %v5116_v20, %v5115_v63  ;;  %v5222_v48 = vpop.f32.mrf.mxu0 }
 0x326   : > { %v5223_v24 = vadd.f32 %v5222_v48, %v5221_v49  ;;  %v5118_v3 = vpop.f32.mrf.mxu1 }
 0x327   : > { %v5224_v55 = vpop.f32.mrf.mxu0  ;;  %v3396_v41 = vadd.f32 %v5117_v10, %v7271_v0 }
 0x328   : > { %v7362_v27 = vadd.f32 %v5223_v24, %v3388_v25  ;;  %v5119_v42 = vpop.f32.mrf.mxu1 }
 0x329   : > { %v5120_v7 = vadd.f32 %v5119_v42, %v5118_v3  ;;  %v5225_v22 = vpop.f32.mrf.mxu0 }
 0x32a   : > { %v5226_v58 = vadd.f32 %v5225_v22, %v5224_v55  ;;  %v5121_v50 = vpop.f32.mrf.mxu1  ;;  %5582 = vmatmul.mubr.bf16.gmra.mxu1 %v2669_v2 }
 0x32b   : > { %v5227_v28 = vpop.f32.mrf.mxu0  ;;  %5585 = vmatprep.mubr.bf16.mxu1 %v7311_v30  ;;  %v3399_v30 = vadd.f32 %v5120_v7, %v7271_v0 }
 0x32c   : > { %v7366_v6 = vadd.f32 %v5226_v58, %v3391_v62  ;;  %v5122_v16 = vpop.f32.mrf.mxu1 }
 0x32d   : > { %v5123_v12 = vadd.f32 %v5122_v16, %v5121_v50  ;;  %v5228_v13 = vpop.f32.mrf.mxu0 }
 0x32e   : > { %v5229_v61 = vadd.f32 %v5228_v13, %v5227_v28  ;;  %v5124_v18 = vpop.f32.mrf.mxu1 }
 0x32f   : > { %v5230_v39 = vpop.f32.mrf.mxu0  ;;  %v3404_v48 = vadd.f32 %v5123_v12, %v7271_v0 }
 0x330   : > { %v7369_v32 = vadd.f32 %v5229_v61, %v3396_v41  ;;  %v5125_v29 = vpop.f32.mrf.mxu1 }
 0x331   : > { %v5126_v35 = vadd.f32 %v5125_v29, %v5124_v18  ;;  %v5231_v9 = vpop.f32.mrf.mxu0 }
 0x332   : > { %v5232_v23 = vadd.f32 %v5231_v9, %v5230_v39  ;;  %v5127_v5 = vpop.f32.mrf.mxu1  ;;  %5586 = vmatmul.mubr.bf16.gmra.mxu1 %v2671_v56 }
 0x333   : > { %v5233_v15 = vpop.f32.mrf.mxu0  ;;  %v3407_v2 = vadd.f32 %v5126_v35, %v7271_v0 }
 0x334   : > { %v7372_v63 = vadd.f32 %v5232_v23, %v3399_v30  ;;  %v5128_v49 = vpop.f32.mrf.mxu1 }
 0x335   : > { %v5129_v20 = vadd.f32 %v5128_v49, %v5127_v5  ;;  %v5234_v10 = vpop.f32.mrf.mxu0 }
 0x336   : > { %v5235_v33 = vadd.f32 %v5234_v10, %v5233_v15  ;;  %v5130_v40 = vpop.f32.mrf.mxu1 }
 0x337   : > { %v5236_v25 = vpop.f32.mrf.mxu0  ;;  %v3412_v19 = vadd.f32 %v5129_v20, %v7271_v0 }
 0x338   : > { %v7375_v24 = vadd.f32 %v5235_v33, %v3404_v48  ;;  %v5131_v3 = vpop.f32.mrf.mxu1 }
 0x339   : > { %v5132_v55 = vadd.f32 %v5131_v3, %v5130_v40  ;;  %v5237_v42 = vpop.f32.mrf.mxu0 }
 0x33a   : > { %v5238_v7 = vadd.f32 %v5237_v42, %v5236_v25  ;;  %v5261_v22 = vpop.f32.mrf.mxu1 }
 0x33b   : > { %v5239_v62 = vpop.f32.mrf.mxu0  ;;  %v3415_v29 = vadd.f32 %v5132_v55, %v7271_v0 }
 0x33c   : > { %v7378_v58 = vadd.f32 %v5238_v7, %v3407_v2  ;;  %v5262_v50 = vpop.f32.mrf.mxu1 }
 0x33d   : > { %v5240_v28 = vpop.f32.mrf.mxu0  ;;  %v5263_v11 = vadd.f32 %v5262_v50, %v5261_v22 }
 0x33e   : > { %v5241_v16 = vadd.f32 %v5240_v28, %v5239_v62  ;;  %v5264_v12 = vpop.f32.mrf.mxu1 }
 0x33f   : > { %v3614_v13 = vadd.f32 %v5263_v11, %v7277_v52  ;;  %v5242_v41 = vpop.f32.mrf.mxu0 }
 0x340   : > { %v7382_v61 = vadd.f32 %v5241_v16, %v3412_v19  ;;  %v5265_v18 = vpop.f32.mrf.mxu1 }
 0x341   : > { %v5243_v56 = vpop.f32.mrf.mxu0  ;;  %v5266_v39 = vadd.f32 %v5265_v18, %v5264_v12 }
 0x342   : > { %7792 = vst [vmem:[#allocation12_spill] sm:$0xff] %v7382_v61  ;;  %v5244_v35 = vadd.f32 %v5243_v56, %v5242_v41  ;;  %v5267_v9 = vpop.f32.mrf.mxu1 }
 0x343   : > { %v3617_v30 = vadd.f32 %v5266_v39, %v7282_v47  ;;  %v5373_v23 = vpop.f32.mrf.mxu0 }
 0x344   : > { %v7386_v5 = vadd.f32 %v5244_v35, %v3415_v29  ;;  %v5268_v15 = vpop.f32.mrf.mxu1 }
 0x345   : > { %v5269_v49 = vadd.f32 %v5268_v15, %v5267_v9  ;;  %v5374_v20 = vpop.f32.mrf.mxu0 }
 0x346   : > { %7793 = vst [vmem:[#allocation8_spill] sm:$0xff] %v7386_v5  ;;  %v5375_v10 = vadd.f32 %v5374_v20, %v5373_v23  ;;  %v5270_v52 = vpop.f32.mrf.mxu1 }
 0x347   : > { %v7389_v48 = vadd.f32 %v5269_v49, %v7285_v8  ;;  %v5376_v33 = vpop.f32.mrf.mxu0 }
 0x348   : > { %v5271_v40 = vpop.f32.mrf.mxu1  ;;  %v7391_v25 = vadd.f32 %v5375_v10, %v3614_v13 }
 0x349   : > { %v5272_v0 = vadd.f32 %v5271_v40, %v5270_v52  ;;  %v5377_v3 = vpop.f32.mrf.mxu0 }
 0x34a   : > { %v5378_v55 = vadd.f32 %v5377_v3, %v5376_v33  ;;  %v5273_v42 = vpop.f32.mrf.mxu1 }
 0x34b   : > { %v7394_v47 = vadd.f32 %v5272_v0, %v7290_v31  ;;  %v7396_v2 = vpop.f32.mrf.mxu0 }
 0x34c   : > { %v5274_v7 = vpop.f32.mrf.mxu1  ;;  %v7398_v22 = vadd.f32 %v5378_v55, %v3617_v30 }
 0x34d   : > { %v5275_v62 = vadd.f32 %v5274_v7, %v5273_v42  ;;  %v7400_v50 = vpop.f32.mrf.mxu0 }
 0x34e   : > { %v5276_v8 = vpop.f32.mrf.mxu1 }
 0x34f   : > { %v7403_v28 = vadd.f32 %v5275_v62, %v7293_v37  ;;  %v7405_v11 = vpop.f32.mrf.mxu0 }
 0x350   : > { %v5277_v19 = vpop.f32.mrf.mxu1 }
 0x351   : > { %v5278_v16 = vadd.f32 %v5277_v19, %v5276_v8  ;;  %v7407_v12 = vpop.f32.mrf.mxu0 }
 0x352   : > { %v5279_v31 = vpop.f32.mrf.mxu1 }
 0x353   : > { %v7410_v13 = vadd.f32 %v5278_v16, %v7298_v26  ;;  %v7412_v41 = vpop.f32.mrf.mxu0 }
 0x354   : > { %v5280_v18 = vpop.f32.mrf.mxu1 }
 0x355   : > { %v5281_v56 = vadd.f32 %v5280_v18, %v5279_v31  ;;  %v7414_v39 = vpop.f32.mrf.mxu0 }
 0x356   : > { %v5282_v29 = vpop.f32.mrf.mxu1 }
 0x357   : > { %v7417_v37 = vadd.f32 %v5281_v56, %v7301_v21  ;;  %v7419_v35 = vpop.f32.mrf.mxu0 }
 0x358   : > { %v5283_v9 = vpop.f32.mrf.mxu1 }
 0x359   : > { %v5284_v30 = vadd.f32 %v5283_v9, %v5282_v29  ;;  %v7421_v23 = vpop.f32.mrf.mxu0 }
 0x35a   : > { %v5285_v15 = vpop.f32.mrf.mxu1 }
 0x35b   : > { %v7424_v26 = vadd.f32 %v5284_v30, %v7306_v1  ;;  %v7426_v49 = vpop.f32.mrf.mxu0 }
 0x35c   : > { %v5286_v20 = vpop.f32.mrf.mxu1 }
 0x35d   : > { %v5287_v10 = vadd.f32 %v5286_v20, %v5285_v15  ;;  %v7428_v52 = vpop.f32.mrf.mxu0 }
 0x35e   : > { %v5288_v33 = vpop.f32.mrf.mxu1 }
 0x35f   : > { %v7431_v21 = vadd.f32 %v5287_v10, %v7309_v57  ;;  %v7433_v40 = vpop.f32.mrf.mxu0 }
 0x360   : > { %v5289_v0 = vpop.f32.mrf.mxu1 }
 0x361   : > { %v5290_v3 = vadd.f32 %v5289_v0, %v5288_v33  ;;  %v7435_v55 = vpop.f32.mrf.mxu0 }
 0x362   : > { %v5291_v42 = vpop.f32.mrf.mxu1 }
 0x363   : > { %v7438_v1 = vadd.f32 %v5290_v3, %v7316_v46  ;;  %v7440_v7 = vpop.f32.mrf.mxu0 }
 0x364   : > { %v5292_v62 = vpop.f32.mrf.mxu1 }
 0x365   : > { %v5293_v8 = vadd.f32 %v5292_v62, %v5291_v42  ;;  %v7442_v19 = vpop.f32.mrf.mxu0 }
 0x366   : > { %v5294_v16 = vpop.f32.mrf.mxu1 }
 0x367   : > { %v7445_v57 = vadd.f32 %v5293_v8, %v7319_v60  ;;  %v7447_v31 = vpop.f32.mrf.mxu0 }
 0x368   : > { %v5295_v18 = vpop.f32.mrf.mxu1 }
 0x369   : > { %v5296_v56 = vadd.f32 %v5295_v18, %v5294_v16  ;;  %v7449_v29 = vpop.f32.mrf.mxu0 }
 0x36a   : > { %v5297_v9 = vpop.f32.mrf.mxu1 }
 0x36b   : > { %v7452_v46 = vadd.f32 %v5296_v56, %v7323_v34  ;;  %v7454_v30 = vpop.f32.mrf.mxu0 }
 0x36c   : > { %v5298_v15 = vpop.f32.mrf.mxu1 }
 0x36d   : > { %v5299_v20 = vadd.f32 %v5298_v15, %v5297_v9  ;;  %v7456_v10 = vpop.f32.mrf.mxu0 }
 0x36e   : > { %v5300_v33 = vpop.f32.mrf.mxu1 }
 0x36f   : > { %v7459_v60 = vadd.f32 %v5299_v20, %v7326_v38  ;;  %v7461_v0 = vpop.f32.mrf.mxu0 }
 0x370   : > { %v5301_v3 = vpop.f32.mrf.mxu1 }
 0x371   : > { %7794 = vst [vmem:[#allocation7_spill] sm:$0xff] %v7459_v60  ;;  %v5302_v42 = vadd.f32 %v5301_v3, %v5300_v33  ;;  %v7463_v62 = vpop.f32.mrf.mxu0 }
 0x372   : > { %v5303_v8 = vpop.f32.mrf.mxu1 }
 0x373   : > { %v7466_v34 = vadd.f32 %v5302_v42, %v7329_v44  ;;  %v7468_v16 = vpop.f32.mrf.mxu0 }
 0x374   : > { %v5304_v18 = vpop.f32.mrf.mxu1 }
 0x375   : > { %7795 = vst [vmem:[#allocation9_spill] sm:$0xff] %v7466_v34  ;;  %v5305_v56 = vadd.f32 %v5304_v18, %v5303_v8  ;;  %v7470_v9 = vpop.f32.mrf.mxu0 }
 0x376   : > { %v5306_v15 = vpop.f32.mrf.mxu1 }
 0x377   : > { %v7473_v38 = vadd.f32 %v5305_v56, %v7332_v51  ;;  %v7475_v20 = vpop.f32.mrf.mxu0 }
 0x378   : > { %7797 = vst [vmem:[#allocation19_spill] sm:$0xff] %v7475_v20  ;;  %v5307_v5 = vpop.f32.mrf.mxu1 }
 0x379   : > { %7796 = vst [vmem:[#allocation5_spill] sm:$0xff] %v7473_v38  ;;  %v5308_v33 = vadd.f32 %v5307_v5, %v5306_v15  ;;  %v7477_v3 = vpop.f32.mrf.mxu0 }
 0x37a   : > { %7798 = vst [vmem:[#allocation10_spill] sm:$0xff] %v7477_v3  ;;  %v5309_v61 = vpop.f32.mrf.mxu1 }
 0x37b   : > { %v7480_v44 = vadd.f32 %v5308_v33, %v7335_v43  ;;  %v7482_v42 = vpop.f32.mrf.mxu0 }
 0x37c   : > { %v5310_v34 = vpop.f32.mrf.mxu1 }
 0x37d   : > { %7799 = vst [vmem:[#allocation13_spill] sm:$0xff] %v7480_v44  ;;  %v5311_v8 = vadd.f32 %v5310_v34, %v5309_v61  ;;  %v7484_v18 = vpop.f32.mrf.mxu0 }
 0x37e   : > { %v5312_v60 = vpop.f32.mrf.mxu1 }
 0x37f   : > { %v7487_v51 = vadd.f32 %v5311_v8, %v7338_v53  ;;  %v7489_v56 = vpop.f32.mrf.mxu0 }
 0x380   : > { %v5313_v20 = vpop.f32.mrf.mxu1 }
 0x381   : > { %7800 = vst [vmem:[#allocation15_spill] sm:$0xff] %v7487_v51  ;;  %v5314_v5 = vadd.f32 %v5313_v20, %v5312_v60  ;;  %v7491_v15 = vpop.f32.mrf.mxu0 }
 0x382   : > { %7801 = vst [vmem:[#allocation6_spill] sm:$0xff] %v7491_v15  ;;  %v5315_v3 = vpop.f32.mrf.mxu1 }
 0x383   : > { %v7494_v43 = vadd.f32 %v5314_v5, %v7341_v17  ;;  %v7496_v33 = vpop.f32.mrf.mxu0 }
 0x384   : > { %v5316_v44 = vpop.f32.mrf.mxu1 }
 0x385   : > { %7802 = vst [vmem:[#allocation17_spill] sm:$0xff] %v7494_v43  ;;  %v5317_v61 = vadd.f32 %v5316_v44, %v5315_v3  ;;  %v7498_v34 = vpop.f32.mrf.mxu0 }
 0x386   : > { %7803 = vst [vmem:[#allocation16_spill] sm:$0xff] %v7498_v34  ;;  %v5318_v38 = vpop.f32.mrf.mxu1 }
 0x387   : > { %v7501_v53 = vadd.f32 %v5317_v61, %v7344_v4  ;;  %v7503_v8 = vpop.f32.mrf.mxu0 }
 0x388   : > { %7805 = vst [vmem:[#allocation11_spill] sm:$0xff] %v7503_v8  ;;  %v5319_v51 = vpop.f32.mrf.mxu1 }
 0x389   : > { %7804 = vst [vmem:[#allocation18_spill] sm:$0xff] %v7501_v53  ;;  %v5320_v60 = vadd.f32 %v5319_v51, %v5318_v38  ;;  %v7505_v20 = vpop.f32.mrf.mxu0 }
 0x38a   : > { %7806 = vst [vmem:[#allocation22_spill] sm:$0xff] %v7505_v20  ;;  %v5321_v15 = vpop.f32.mrf.mxu1 }
 0x38b   : > { %v7508_v17 = vadd.f32 %v5320_v60, %v7347_v59  ;;  %v7510_v5 = vpop.f32.mrf.mxu0 }
 0x38c   : > { %v5322_v43 = vpop.f32.mrf.mxu1 }
 0x38d   : > { %7807 = vst [vmem:[#allocation14_spill] sm:$0xff] %v7508_v17  ;;  %v5323_v3 = vadd.f32 %v5322_v43, %v5321_v15  ;;  %v7512_v44 = vpop.f32.mrf.mxu0 }
 0x38e   : > { %v5324_v34 = vpop.f32.mrf.mxu1 }
 0x38f   : > { %v7515_v4 = vadd.f32 %v5323_v3, %v7350_v14  ;;  %v7517_v61 = vpop.f32.mrf.mxu0 }
 0x390   : > { %v5325_v8 = vpop.f32.mrf.mxu1 }
 0x391   : > { %7808 = vst [vmem:[#allocation24_spill] sm:$0xff] %v7515_v4  ;;  %v5326_v38 = vadd.f32 %v5325_v8, %v5324_v34  ;;  %v7519_v51 = vpop.f32.mrf.mxu0 }
 0x392   : > { %7809 = vst [vmem:[#allocation23_spill] sm:$0xff] %v7519_v51  ;;  %v5327_v20 = vpop.f32.mrf.mxu1 }
 0x393   : > { %v7522_v59 = vadd.f32 %v5326_v38, %v7353_v54  ;;  %v7524_v60 = vpop.f32.mrf.mxu0 }
 0x394   : > { %7811 = vst [vmem:[#allocation25_spill] sm:$0xff] %v7524_v60  ;;  %v5328_v17 = vpop.f32.mrf.mxu1 }
 0x395   : > { %7810 = vst [vmem:[#allocation20_spill] sm:$0xff] %v7522_v59  ;;  %v5329_v15 = vadd.f32 %v5328_v17, %v5327_v20  ;;  %v7526_v43 = vpop.f32.mrf.mxu0 }
 0x396   : > { %7812 = vst [vmem:[#allocation21_spill] sm:$0xff] %v7526_v43  ;;  %v5330_v53 = vpop.f32.mrf.mxu1 }
 0x397   : > { %v7529_v14 = vadd.f32 %v5329_v15, %v7356_v45  ;;  %v7531_v4 = vpop.f32.mrf.mxu0 }
 0x398   : > { %v5331_v3 = vpop.f32.mrf.mxu1  ;;  %7813 = vst [vmem:[#allocation28_spill] sm:$0xff] %v7531_v4 }
 0x399   : > { %v5332_v34 = vadd.f32 %v5331_v3, %v5330_v53  ;;  %v7536_v38 = vpop.f32.mrf.mxu0 }
 0x39a   : > { %v5333_v8 = vpop.f32.mrf.mxu1 }
 0x39b   : > { %v7534_v51 = vadd.f32 %v5332_v34, %v7359_v36  ;;  %v7541_v43 = vpop.f32.mrf.mxu0 }
 0x39c   : > { %v5334_v54 = vpop.f32.mrf.mxu1 }
 0x39d   : > { %7814 = vst [vmem:[#allocation26_spill] sm:$0xff] %v7534_v51  ;;  %v5335_v59 = vadd.f32 %v5334_v54, %v5333_v8  ;;  %v7546_v3 = vpop.f32.mrf.mxu0 }
 0x39e   : > { %v5336_v60 = vpop.f32.mrf.mxu1 }
 0x39f   : > { %v7539_v20 = vadd.f32 %v5335_v59, %v7362_v27  ;;  %v7551_v54 = vpop.f32.mrf.mxu0 }
 0x3a0   : > { %v5337_v17 = vpop.f32.mrf.mxu1 }
 0x3a1   : > { %7815 = vst [vmem:[#allocation3_spill] sm:$0xff] %v7539_v20  ;;  %v5338_v45 = vadd.f32 %v5337_v17, %v5336_v60  ;;  %v7556_v17 = vpop.f32.mrf.mxu0 }
 0x3a2   : > { %v5339_v15 = vpop.f32.mrf.mxu1 }
 0x3a3   : > { %v7544_v4 = vadd.f32 %v5338_v45, %v7366_v6 }
 0x3a4   : > { %v5340_v53 = vpop.f32.mrf.mxu1 }
 0x3a5   : > { %7816 = vst [vmem:[#allocation31_spill] sm:$0xff] %v7544_v4  ;;  %v5341_v36 = vadd.f32 %v5340_v53, %v5339_v15  ;;  %v7561_v53 = vpop.f32.mrf.mxu0 }
 0x3a6   : > { %v5342_v34 = vpop.f32.mrf.mxu1 }
 0x3a7   : > { %v7549_v51 = vadd.f32 %v5341_v36, %v7369_v32 }
 0x3a8   : > { %v5343_v8 = vpop.f32.mrf.mxu1 }
 0x3a9   : > { %v5344_v27 = vadd.f32 %v5343_v8, %v5342_v34  ;;  %v5381_v8 = vadd.f32 %v7400_v50, %v7396_v2 }
 0x3aa   : > { %v5345_v59 = vpop.f32.mrf.mxu1 }
 0x3ab   : > { %v7554_v20 = vadd.f32 %v5344_v27, %v7372_v63  ;;  %v7572_v27 = vpop.f32.mrf.mxu0 }
 0x3ac   : > { %v5346_v60 = vpop.f32.mrf.mxu1 }
 0x3ad   : > { %v5347_v6 = vadd.f32 %v5346_v60, %v5345_v59  ;;  %v5384_v60 = vadd.f32 %v7407_v12, %v7405_v11  ;;  %v5387_v12 = vadd.f32 %v7414_v39, %v7412_v41  ;;  %v5390_v39 = vadd.f32 %v7421_v23, %v7419_v35 }
 0x3ae   : > { %v5348_v45 = vpop.f32.mrf.mxu1 }
 0x3af   : > { %v7559_v4 = vadd.f32 %v5347_v6, %v7375_v24  ;;  %v7580_v6 = vpop.f32.mrf.mxu0 }
 0x3b0   : > { %v5349_v15 = vpop.f32.mrf.mxu1 }
 0x3b1   : > { %7817 = vst [vmem:[#allocation27_spill] sm:$0xff] %v7559_v4  ;;  %v5350_v32 = vadd.f32 %v5349_v15, %v5348_v45  ;;  %v3783_v45 = vadd.f32 %v5381_v8, %v7389_v48  ;;  %v7585_v2 = vpop.f32.mrf.mxu0  ;;  %v3786_v48 = vadd.f32 %v5384_v60, %v7394_v47 }
 0x3b2   : > { %v7563_v36 = vpop.f32.mrf.mxu1 }
 0x3b3   : > { %v7566_v34 = vadd.f32 %v5350_v32, %v7378_v58  ;;  %v5393_v32 = vadd.f32 %v7428_v52, %v7426_v49 }
 0x3b4   : > { %v7568_v63 = vpop.f32.mrf.mxu1 }
 0x3b5   : > { %7818 = vst [vmem:[#allocation4_spill] sm:$0xff] %v7566_v34 }
 0x3b6   : > { %v7574_v59 = vpop.f32.mrf.mxu1 }
 0x3b8   : > { %v7576_v24 = vpop.f32.mrf.mxu1 }
 0x3b9   : > { %7819 = vst [vmem:[#allocation29_spill] sm:$0xff] %v7576_v24  ;;  %v3799_v24 = vadd.f32 %v5393_v32, %v7417_v37  ;;  %v5405_v37 = vadd.f32 %v7456_v10, %v7454_v30 }
 0x3ba   : > { %v5559_v58 = vpop.f32.mrf.mxu1 }
 0x3bb   : > { %v3944_v15 = vadd.f32 %v5559_v58, %v3783_v45  ;;  %v5396_v58 = vadd.f32 %v7435_v55, %v7433_v40  ;;  %v3791_v40 = vadd.f32 %v5387_v12, %v7403_v28  ;;  %v5399_v28 = vadd.f32 %v7442_v19, %v7440_v7 }
 0x3bc   : > { %v3935_v34 = vpop.f32.mrf.mxu1 }
 0x3bd   : > { %vm4064_vm0 = vcmp.ge.f32.partialorder %v3944_v15, 0.0  ;;  %v4096_v50 = vmul.f32 0.01, %v3944_v15  ;;  %v3936_v11 = vadd.f32 %v3935_v34, %v7391_v25  ;;  %v7602_v25 = vpop.f32.mrf.mxu0 }
 0x3be   : > { %v5560_v49 = vpop.f32.mrf.mxu1 }
 0x3bf   : > { %v4128_v52 = vsel %vm4064_vm0, %v3944_v15, %v4096_v50  ;;  %vm4062_vm1 = vcmp.ge.f32.partialorder %v3936_v11, 0.0  ;;  %v4094_v8 = vmul.f32 0.01, %v3936_v11  ;;  %v3947_v45 = vadd.f32 %v5560_v49, %v3786_v48 }
 0x3c0   : > { %4160 = vst [vmem:[%s7592_s23 + $0x10] sm:$0xff] %v4128_v52  ;;  %v3938_v4 = vpop.f32.mrf.mxu1  ;;  %v3815_v52 = vadd.f32 %v5405_v37, %v7445_v57  ;;  %v5417_v57 = vadd.f32 %v7484_v18, %v7482_v42 }
 0x3c1   : > { %v4126_v47 = vsel %vm4062_vm1, %v3936_v11, %v4094_v8  ;;  %vm4065_vm2 = vcmp.ge.f32.partialorder %v3947_v45, 0.0  ;;  %v4097_v34 = vmul.f32 0.01, %v3947_v45  ;;  %v3939_v41 = vadd.f32 %v3938_v4, %v7398_v22  ;;  %v7613_v4 = vpop.f32.mrf.mxu0 }
 0x3c2   : > { %4158 = vst [vmem:[%s7592_s23] sm:$0xff] %v4126_v47  ;;  %v5563_v60 = vpop.f32.mrf.mxu1  ;;  %v3802_v22 = vadd.f32 %v5396_v58, %v7424_v26  ;;  %v5408_v26 = vadd.f32 %v7463_v62, %v7461_v0  ;;  %v3807_v47 = vadd.f32 %v5399_v28, %v7431_v21  ;;  %v5411_v21 = vadd.f32 %v7470_v9, %v7468_v16  ;;  %v7822_v28 = vld [vmem:[#allocation19_spill] sm:$0xff] }
 0x3c3   : > { %v4129_v55 = vsel %vm4065_vm2, %v3947_v45, %v4097_v34  ;;  %vm4063_vm3 = vcmp.ge.f32.partialorder %v3939_v41, 0.0  ;;  %v4095_v15 = vmul.f32 0.01, %v3939_v41  ;;  %v3960_v50 = vadd.f32 %v5563_v60, %v3799_v24  ;;  %v7623_v8 = vpop.f32.mrf.mxu0 }
 0x3c4   : > { %4161 = vst [vmem:[%s7592_s23 + $0x18] sm:$0xff] %v4129_v55  ;;  %v3951_v32 = vpop.f32.mrf.mxu1  ;;  %v3794_v24 = vadd.f32 %v5390_v39, %v7410_v13  ;;  %v5402_v13 = vadd.f32 %v7449_v29, %v7447_v31  ;;  %v3818_v39 = vadd.f32 %v5408_v26, %v7452_v46  ;;  %v7820_v46 = vld [vmem:[#allocation6_spill] sm:$0xff] }
 0x3c5   : > { %v4127_v35 = vsel %vm4063_vm3, %v3939_v41, %v4095_v15  ;;  %vm4068_vm4 = vcmp.ge.f32.partialorder %v3960_v50, 0.0  ;;  %v4100_v23 = vmul.f32 0.01, %v3960_v50  ;;  %v3952_v11 = vadd.f32 %v3951_v32, %v3791_v40  ;;  %v7633_v60 = vpop.f32.mrf.mxu0 }
 0x3c6   : > { %4159 = vst [vmem:[%s7592_s23 + $0x8] sm:$0xff] %v4127_v35  ;;  %v5564_v48 = vpop.f32.mrf.mxu1  ;;  %v3810_v15 = vadd.f32 %v5402_v13, %v7438_v1  ;;  %v5420_v37 = vadd.f32 %v7820_v46, %v7489_v56  ;;  %v7823_v1 = vld [vmem:[#allocation10_spill] sm:$0xff] }
 0x3c7   : > { %v4132_v30 = vsel %vm4068_vm4, %v3960_v50, %v4100_v23  ;;  %vm4066_vm5 = vcmp.ge.f32.partialorder %v3952_v11, 0.0  ;;  %v4098_v10 = vmul.f32 0.01, %v3952_v11  ;;  %v3963_v12 = vadd.f32 %v5564_v48, %v3802_v22  ;;  %v7821_v22 = vld [vmem:[#allocation5_spill] sm:$0xff]  ;;  %v7643_v23 = vpop.f32.mrf.mxu0  ;;  %v7831_v46 = vld [vmem:[#allocation22_spill] sm:$0xff] }
 0x3c8   : > { %4164 = vst [vmem:[%s7592_s23 + $0x30] sm:$0xff] %v4132_v30  ;;  %v3954_v49 = vpop.f32.mrf.mxu1  ;;  %v3831_v35 = vadd.f32 %v5417_v57, %v7821_v22  ;;  %v5414_v48 = vadd.f32 %v7823_v1, %v7822_v28  ;;  %v7824_v30 = vld [vmem:[#allocation7_spill] sm:$0xff]  ;;  %v7827_v57 = vld [vmem:[#allocation9_spill] sm:$0xff]  ;;  %v7833_v1 = vld [vmem:[#allocation14_spill] sm:$0xff] }
 0x3c9   : > { %v4130_v7 = vsel %vm4066_vm5, %v3952_v11, %v4098_v10  ;;  %vm4069_vm6 = vcmp.ge.f32.partialorder %v3963_v12, 0.0  ;;  %v4101_v19 = vmul.f32 0.01, %v3963_v12  ;;  %v3955_v45 = vadd.f32 %v3954_v49, %v3794_v24  ;;  %v7832_v22 = vld [vmem:[#allocation15_spill] sm:$0xff] }
 0x3ca   : > { %4162 = vst [vmem:[%s7592_s23 + $0x20] sm:$0xff] %v4130_v7  ;;  %v5567_v58 = vpop.f32.mrf.mxu1  ;;  %v3823_v10 = vadd.f32 %v5411_v21, %v7824_v30  ;;  %v5429_v49 = vadd.f32 %v7512_v44, %v7510_v5  ;;  %v7825_v7 = vld [vmem:[#allocation13_spill] sm:$0xff]  ;;  %v7829_v21 = vld [vmem:[#allocation18_spill] sm:$0xff] }
 0x3cb   : > { %v4133_v0 = vsel %vm4069_vm6, %v3963_v12, %v4101_v19  ;;  %vm4067_vm7 = vcmp.ge.f32.partialorder %v3955_v45, 0.0  ;;  %v4099_v62 = vmul.f32 0.01, %v3955_v45  ;;  %v3976_v34 = vadd.f32 %v5567_v58, %v3815_v52 }
 0x3cc   : > { %4165 = vst [vmem:[%s7592_s23 + $0x38] sm:$0xff] %v4133_v0  ;;  %v3967_v41 = vpop.f32.mrf.mxu1  ;;  %v3834_v19 = vadd.f32 %v5420_v37, %v7825_v7  ;;  %v7826_v0 = vld [vmem:[#allocation16_spill] sm:$0xff]  ;;  %v7836_v7 = vld [vmem:[#allocation17_spill] sm:$0xff] }
 0x3cd   : > { %v4131_v31 = vsel %vm4067_vm7, %v3955_v45, %v4099_v62  ;;  %vm4072_vm8 = vcmp.ge.f32.partialorder %v3976_v34, 0.0  ;;  %v4104_v29 = vmul.f32 0.01, %v3976_v34  ;;  %v3968_v40 = vadd.f32 %v3967_v41, %v3807_v47  ;;  %v7653_v45 = vpop.f32.mrf.mxu0 }
 0x3ce   : > { %4163 = vst [vmem:[%s7592_s23 + $0x28] sm:$0xff] %v4131_v31  ;;  %v5568_v55 = vpop.f32.mrf.mxu1  ;;  %v5423_v62 = vadd.f32 %v7826_v0, %v7496_v33  ;;  %v3826_v41 = vadd.f32 %v5414_v48, %v7827_v57  ;;  %v7828_v31 = vld [vmem:[#allocation23_spill] sm:$0xff] }
 0x3cf   : > { %v4136_v42 = vsel %vm4072_vm8, %v3976_v34, %v4104_v29  ;;  %vm4070_vm9 = vcmp.ge.f32.partialorder %v3968_v40, 0.0  ;;  %v4102_v18 = vmul.f32 0.01, %v3968_v40  ;;  %v3979_v50 = vadd.f32 %v5568_v55, %v3818_v39 }
 0x3d0   : > { %4168 = vst [vmem:[%s7592_s23 + $0x50] sm:$0xff] %v4136_v42  ;;  %v3970_v32 = vpop.f32.mrf.mxu1  ;;  %v5432_v29 = vadd.f32 %v7828_v31, %v7517_v61  ;;  %v3847_v55 = vadd.f32 %v5429_v49, %v7829_v21  ;;  %v7838_v31 = vld [vmem:[#allocation24_spill] sm:$0xff] }
 0x3d1   : > { %v4134_v16 = vsel %vm4070_vm9, %v3968_v40, %v4102_v18  ;;  %vm4073_vm10 = vcmp.ge.f32.partialorder %v3979_v50, 0.0  ;;  %v4105_v9 = vmul.f32 0.01, %v3979_v50  ;;  %v3971_v11 = vadd.f32 %v3970_v32, %v3810_v15  ;;  %v7663_v15 = vpop.f32.mrf.mxu0 }
 0x3d2   : > { %4166 = vst [vmem:[%s7592_s23 + $0x40] sm:$0xff] %v4134_v16  ;;  %v5571_v24 = vpop.f32.mrf.mxu1  ;;  %v3850_v48 = vadd.f32 %v5432_v29, %v7833_v1  ;;  %v5450_v1 = vadd.f32 %v7585_v2, %v7580_v6 }
 0x3d3   : > { %v4137_v56 = vsel %vm4073_vm10, %v3979_v50, %v4105_v9  ;;  %vm4071_vm11 = vcmp.ge.f32.partialorder %v3971_v11, 0.0  ;;  %v4103_v12 = vmul.f32 0.01, %v3971_v11  ;;  %v3992_v26 = vadd.f32 %v5571_v24, %v3831_v35  ;;  %v7830_v50 = vld [vmem:[#allocation11_spill] sm:$0xff]  ;;  %v7673_v24 = vpop.f32.mrf.mxu0 }
 0x3d4   : > { %4169 = vst [vmem:[%s7592_s23 + $0x58] sm:$0xff] %v4137_v56  ;;  %v3983_v52 = vpop.f32.mrf.mxu1  ;;  %v5426_v37 = vadd.f32 %v7831_v46, %v7830_v50  ;;  %v3839_v35 = vadd.f32 %v5423_v62, %v7832_v22  ;;  %v5447_v46 = vadd.f32 %v7572_v27, %v7561_v53 }
 0x3d5   : > { %v4135_v13 = vsel %vm4071_vm11, %v3971_v11, %v4103_v12  ;;  %vm4076_vm12 = vcmp.ge.f32.partialorder %v3992_v26, 0.0  ;;  %v4108_v58 = vmul.f32 0.01, %v3992_v26  ;;  %v3984_v47 = vadd.f32 %v3983_v52, %v3823_v10  ;;  %v7834_v12 = vld [vmem:[#allocation25_spill] sm:$0xff]  ;;  %v5463_v62 = vpop.f32.mrf.mxu0 }
 0x3d6   : > { %4167 = vst [vmem:[%s7592_s23 + $0x48] sm:$0xff] %v4135_v13  ;;  %v5572_v34 = vpop.f32.mrf.mxu1  ;;  %v5441_v11 = vadd.f32 %v7546_v3, %v7541_v43 }
 0x3d7   : > { %v4140_v5 = vsel %vm4076_vm12, %v3992_v26, %v4108_v58  ;;  %vm4074_vm13 = vcmp.ge.f32.partialorder %v3984_v47, 0.0  ;;  %v4106_v44 = vmul.f32 0.01, %v3984_v47  ;;  %v3995_v39 = vadd.f32 %v5572_v34, %v3834_v19  ;;  %v7835_v26 = vld [vmem:[#allocation21_spill] sm:$0xff] }
 0x3d8   : > { %4172 = vst [vmem:[%s7592_s23 + $0x70] sm:$0xff] %v4140_v5  ;;  %v3986_v40 = vpop.f32.mrf.mxu1  ;;  %v5435_v49 = vadd.f32 %v7835_v26, %v7834_v12  ;;  %v3842_v19 = vadd.f32 %v5426_v37, %v7836_v7  ;;  %v5444_v58 = vadd.f32 %v7556_v17, %v7551_v54  ;;  %v3863_v0 = vadd.f32 %v5441_v11, %v7529_v14  ;;  %v7837_v5 = vld [vmem:[#allocation28_spill] sm:$0xff] }
 0x3d9   : > { %v4138_v33 = vsel %vm4074_vm13, %v3984_v47, %v4106_v44  ;;  %vm4077_vm14 = vcmp.ge.f32.partialorder %v3995_v39, 0.0  ;;  %v4109_v42 = vmul.f32 0.01, %v3995_v39  ;;  %v3987_v18 = vadd.f32 %v3986_v40, %v3826_v41 }
 0x3da   : > { %4170 = vst [vmem:[%s7592_s23 + $0x60] sm:$0xff] %v4138_v33  ;;  %v5575_v32 = vpop.f32.mrf.mxu1  ;;  %v5438_v44 = vadd.f32 %v7536_v38, %v7837_v5  ;;  %v3855_v29 = vadd.f32 %v5435_v49, %v7838_v31  ;;  %v5453_v14 = vadd.f32 %v7613_v4, %v7602_v25 }
 0x3db   : > { %v4141_v61 = vsel %vm4077_vm14, %v3995_v39, %v4109_v42  ;;  %vm4075_vm15 = vcmp.ge.f32.partialorder %v3987_v18, 0.0  ;;  %v4107_v16 = vmul.f32 0.01, %v3987_v18  ;;  %v4008_v9 = vadd.f32 %v5575_v32, %v3847_v55  ;;  %v7839_v55 = vld [vmem:[#allocation26_spill] sm:$0xff]  ;;  %v5464_v42 = vpop.f32.mrf.mxu0  ;;  %v7840_v32 = vld [vmem:[#allocation20_spill] sm:$0xff] }
 0x3dc   : > { %4173 = vst [vmem:[%s7592_s23 + $0x78] sm:$0xff] %v4141_v61  ;;  %v3999_v28 = vpop.f32.mrf.mxu1  ;;  %v3866_v33 = vadd.f32 %v5444_v58, %v7839_v55  ;;  %v3858_v22 = vadd.f32 %v5438_v44, %v7840_v32  ;;  %v5456_v61 = vadd.f32 %v7633_v60, %v7623_v8  ;;  %v5465_v12 = vadd.f32 %v5464_v42, %v5463_v62  ;;  %v7844_v58 = vld [vmem:[#allocation31_spill] sm:$0xff]  ;;  %v7845_v44 = vld [vmem:[#allocation8_spill] sm:$0xff] }
 0x3dd   : > { %v4139_v30 = vsel %vm4075_vm15, %v3987_v18, %v4107_v16  ;;  %vm4080_vm0 = vcmp.ge.f32.partialorder %v4008_v9, 0.0  ;;  %v4112_v10 = vmul.f32 0.01, %v4008_v9  ;;  %v4000_v56 = vadd.f32 %v3999_v28, %v3839_v35  ;;  %v5466_v11 = vpop.f32.mrf.mxu0 }
 0x3de   : > { %4171 = vst [vmem:[%s7592_s23 + $0x68] sm:$0xff] %v4139_v30  ;;  %v5576_v52 = vpop.f32.mrf.mxu1  ;;  %v3882_v49 = vadd.f32 %v5456_v61, %v7554_v20 }
 0x3df   : > { %v4144_v43 = vsel %vm4080_vm0, %v4008_v9, %v4112_v10  ;;  %vm4078_vm1 = vcmp.ge.f32.partialorder %v4000_v56, 0.0  ;;  %v4110_v3 = vmul.f32 0.01, %v4000_v56  ;;  %v4011_v13 = vadd.f32 %v5576_v52, %v3850_v48  ;;  %v7841_v10 = vld [vmem:[#allocation3_spill] sm:$0xff]  ;;  %v5467_v52 = vpop.f32.mrf.mxu0 }
 0x3e0   : > { %4176 = vst [vmem:[%s7592_s23 + $0x90] sm:$0xff] %v4144_v43  ;;  %v4002_v47 = vpop.f32.mrf.mxu1  ;;  %v3879_v9 = vadd.f32 %v5453_v14, %v7549_v51  ;;  %v5353_v48 = vadd.f32 %v7568_v63, %v7563_v36  ;;  %v3871_v8 = vadd.f32 %v5447_v46, %v7841_v10  ;;  %v7842_v63 = vld [vmem:[#allocation12_spill] sm:$0xff]  ;;  %v7843_v43 = vld [vmem:[#allocation29_spill] sm:$0xff] }
 0x3e1   : > { %v4142_v34 = vsel %vm4078_vm1, %v4000_v56, %v4110_v3  ;;  %vm4081_vm2 = vcmp.ge.f32.partialorder %v4011_v13, 0.0  ;;  %v4113_v57 = vmul.f32 0.01, %v4011_v13  ;;  %v4003_v41 = vadd.f32 %v4002_v47, %v3842_v19 }
 0x3e2   : > { %4174 = vst [vmem:[%s7592_s23 + $0x80] sm:$0xff] %v4142_v34  ;;  %v5579_v39 = vpop.f32.mrf.mxu1  ;;  %v3734_v7 = vadd.f32 %v5353_v48, %v7842_v63  ;;  %v5459_v19 = vadd.f32 %v7653_v45, %v7643_v23  ;;  %v5356_v3 = vadd.f32 %v7843_v43, %v7574_v59  ;;  %v3874_v47 = vadd.f32 %v5450_v1, %v7844_v58 }
 0x3e3   : > { %v4145_v40 = vsel %vm4081_vm2, %v4011_v13, %v4113_v57  ;;  %vm4079_vm3 = vcmp.ge.f32.partialorder %v4003_v41, 0.0  ;;  %v4111_v54 = vmul.f32 0.01, %v4003_v41  ;;  %v4024_v17 = vadd.f32 %v5579_v39, %v3863_v0 }
 0x3e4   : > { %4177 = vst [vmem:[%s7592_s23 + $0x98] sm:$0xff] %v4145_v40  ;;  %v4015_v21 = vpop.f32.mrf.mxu1  ;;  %v5468_v34 = vadd.f32 %v5467_v52, %v5466_v11  ;;  %v3737_v59 = vadd.f32 %v5356_v3, %v7845_v44  ;;  %v5462_v39 = vadd.f32 %v7673_v24, %v7663_v15  ;;  %v7847_v15 = vld [vmem:[#allocation4_spill] sm:$0xff] }
 0x3e5   : > { %v4143_v18 = vsel %vm4079_vm3, %v4003_v41, %v4111_v54  ;;  %vm4084_vm4 = vcmp.ge.f32.partialorder %v4024_v17, 0.0  ;;  %v4116_v38 = vmul.f32 0.01, %v4024_v17  ;;  %v4016_v50 = vadd.f32 %v4015_v21, %v3855_v29  ;;  %v7846_v29 = vld [vmem:[#allocation27_spill] sm:$0xff] }
 0x3e6   : > { %4175 = vst [vmem:[%s7592_s23 + $0x88] sm:$0xff] %v4143_v18  ;;  %v5580_v37 = vpop.f32.mrf.mxu1  ;;  %v3895_v41 = vadd.f32 %v5465_v12, %v3734_v7  ;;  %v3887_v40 = vadd.f32 %v5459_v19, %v7846_v29  ;;  %v3898_v55 = vadd.f32 %v5468_v34, %v3737_v59  ;;  %v3890_v24 = vadd.f32 %v5462_v39, %v7847_v15 }
 0x3e7   : > { %v4148_v35 = vsel %vm4084_vm4, %v4024_v17, %v4116_v38  ;;  %vm4082_vm5 = vcmp.ge.f32.partialorder %v4016_v50, 0.0  ;;  %v4114_v25 = vmul.f32 0.01, %v4016_v50  ;;  %v4027_v4 = vadd.f32 %v5580_v37, %v3866_v33 }
 0x3e8   : > { %4180 = vst [vmem:[%s7592_s23 + $0xb0] sm:$0xff] %v4148_v35  ;;  %v4018_v16 = vpop.f32.mrf.mxu1 }
 0x3e9   : > { %v4146_v28 = vsel %vm4082_vm5, %v4016_v50, %v4114_v25  ;;  %vm4085_vm6 = vcmp.ge.f32.partialorder %v4027_v4, 0.0  ;;  %v4117_v53 = vmul.f32 0.01, %v4027_v4  ;;  %v4019_v27 = vadd.f32 %v4018_v16, %v3858_v22 }
 0x3ea   : > { %4178 = vst [vmem:[%s7592_s23 + $0xa0] sm:$0xff] %v4146_v28  ;;  %v5583_v30 = vpop.f32.mrf.mxu1 }
 0x3eb   : > { %v4149_v60 = vsel %vm4085_vm6, %v4027_v4, %v4117_v53  ;;  %vm4083_vm7 = vcmp.ge.f32.partialorder %v4019_v27, 0.0  ;;  %v4115_v51 = vmul.f32 0.01, %v4019_v27  ;;  %v4040_v56 = vadd.f32 %v5583_v30, %v3879_v9 }
 0x3ec   : > { %4181 = vst [vmem:[%s7592_s23 + $0xb8] sm:$0xff] %v4149_v60  ;;  %v4031_v26 = vpop.f32.mrf.mxu1 }
 0x3ed   : > { %v4147_v6 = vsel %vm4083_vm7, %v4019_v27, %v4115_v51  ;;  %vm4088_vm8 = vcmp.ge.f32.partialorder %v4040_v56, 0.0  ;;  %v4120_v2 = vmul.f32 0.01, %v4040_v56  ;;  %v4032_v36 = vadd.f32 %v4031_v26, %v3871_v8 }
 0x3ee   : > { %4179 = vst [vmem:[%s7592_s23 + $0xa8] sm:$0xff] %v4147_v6  ;;  %v5584_v13 = vpop.f32.mrf.mxu1 }
 0x3ef   : > { %v4152_v20 = vsel %vm4088_vm8, %v4040_v56, %v4120_v2  ;;  %vm4086_vm9 = vcmp.ge.f32.partialorder %v4032_v36, 0.0  ;;  %v4118_v0 = vmul.f32 0.01, %v4032_v36  ;;  %v4043_v62 = vadd.f32 %v5584_v13, %v3882_v49 }
 0x3f0   : > { %4184 = vst [vmem:[%s7592_s23 + $0xd0] sm:$0xff] %v4152_v20  ;;  %v4034_v57 = vpop.f32.mrf.mxu1 }
 0x3f1   : > { %v4150_v5 = vsel %vm4086_vm9, %v4032_v36, %v4118_v0  ;;  %vm4089_vm10 = vcmp.ge.f32.partialorder %v4043_v62, 0.0  ;;  %v4121_v23 = vmul.f32 0.01, %v4043_v62  ;;  %v4035_v45 = vadd.f32 %v4034_v57, %v3874_v47 }
 0x3f2   : > { %4182 = vst [vmem:[%s7592_s23 + $0xc0] sm:$0xff] %v4150_v5  ;;  %v5587_v31 = vpop.f32.mrf.mxu1 }
 0x3f3   : > { %v4153_v54 = vsel %vm4089_vm10, %v4043_v62, %v4121_v23  ;;  %vm4087_vm11 = vcmp.ge.f32.partialorder %v4035_v45, 0.0  ;;  %v4119_v17 = vmul.f32 0.01, %v4035_v45  ;;  %v4056_v14 = vadd.f32 %v5587_v31, %v3895_v41 }
 0x3f4   : > { %4185 = vst [vmem:[%s7592_s23 + $0xd8] sm:$0xff] %v4153_v54  ;;  %v4047_v21 = vpop.f32.mrf.mxu1 }
 0x3f5   : > { %v4151_v33 = vsel %vm4087_vm11, %v4035_v45, %v4119_v17  ;;  %vm4092_vm12 = vcmp.ge.f32.partialorder %v4056_v14, 0.0  ;;  %v4124_v42 = vmul.f32 0.01, %v4056_v14  ;;  %v4048_v18 = vadd.f32 %v4047_v21, %v3887_v40 }
 0x3f6   : > { %4183 = vst [vmem:[%s7592_s23 + $0xc8] sm:$0xff] %v4151_v33  ;;  %v5588_v38 = vpop.f32.mrf.mxu1 }
 0x3f7   : > { %v4156_v50 = vsel %vm4092_vm12, %v4056_v14, %v4124_v42  ;;  %vm4090_vm13 = vcmp.ge.f32.partialorder %v4048_v18, 0.0  ;;  %v4122_v46 = vmul.f32 0.01, %v4048_v18  ;;  %v4059_v37 = vadd.f32 %v5588_v38, %v3898_v55 }
 0x3f8   : > { %4188 = vst [vmem:[%s7592_s23 + $0xf0] sm:$0xff] %v4156_v50  ;;  %v4050_v32 = vpop.f32.mrf.mxu1 }
 0x3f9   : > { %v4154_v22 = vsel %vm4090_vm13, %v4048_v18, %v4122_v46  ;;  %vm4093_vm14 = vcmp.ge.f32.partialorder %v4059_v37, 0.0  ;;  %v4125_v35 = vmul.f32 0.01, %v4059_v37  ;;  %v4051_v25 = vadd.f32 %v4050_v32, %v3890_v24 }
 0x3fa   : > { %4186 = vst [vmem:[%s7592_s23 + $0xe0] sm:$0xff] %v4154_v22 }
 0x3fb   : > { %v4157_v4 = vsel %vm4093_vm14, %v4059_v37, %v4125_v35  ;;  %vm4091_vm15 = vcmp.ge.f32.partialorder %v4051_v25, 0.0  ;;  %v4123_v61 = vmul.f32 0.01, %v4051_v25 }
 0x3fc   : > { %4189 = vst [vmem:[%s7592_s23 + $0xf8] sm:$0xff] %v4157_v4 }
 0x3fd   : > { %v4155_v16 = vsel %vm4091_vm15, %v4051_v25, %v4123_v61 }
 0x3fe   : > { %4187 = vst [vmem:[%s7592_s23 + $0xe8] sm:$0xff] %v4155_v16 }
 0x3ff PF: > { %s13_s12 = sadd.s32 1, %s5750_s12  }
 0x400   : > { %p10_p4 = scmp.ge.s32.totalorder %s13_s12, 4  }
 0x402   :  { %12 = sbr.rel (!%p10_p4) target bundleno = 1 (0x1), region = 66 }

</bundles_post_ra>
